<compile_context>
chip_gen: v5e
topology: v5e:2x2
jax: 0.10.0
libtpu: 0.0.40
codegen_flags: <defaults>
</compile_context>

<pallas_src>
import jax
import jax.numpy as jnp
from jax import lax
from jax.experimental import pallas as pl
from jax.experimental.pallas import tpu as pltpu

EPS = 1e-5

_VMEM_BUDGET = None


def _vmem_budget_bytes():
    """Generation-aware scoped-VMEM budget (~75% of physical: ~48 MiB on v7x,
    ~96 MiB on v5e/v6e). Conservative fallback if the query is unavailable."""
    global _VMEM_BUDGET
    if _VMEM_BUDGET is None:
        try:
            cap = int(pltpu.get_tpu_info().vmem_capacity_bytes)
        except Exception:
            cap = 64 * 1024 * 1024
        _VMEM_BUDGET = max(32 * 1024 * 1024, (cap * 3) // 4)
    return _VMEM_BUDGET


def _compiler_params():
    return pltpu.CompilerParams(
        dimension_semantics=("parallel",),     # per-block work is independent
        vmem_limit_bytes=_vmem_budget_bytes(),
    )


def _pick_images_per_block(n, bytes_per_image, rows_per_image, budget,
                           max_rows=4096):
    """Largest divisor of n whose working set fits ~budget/4 (double-buffering
    headroom) and keeps the matmul M-dim below max_rows."""
    target = max(budget // 4, bytes_per_image)
    best = 1
    for b in range(1, n + 1):
        if n % b:
            continue
        if b * bytes_per_image <= target and b * rows_per_image <= max_rows:
            best = b
    return best


def _fold_weight(w):
    """HWIO (k,k,Ci,Co) -> (k*k*Ci, Co) bf16, matching the in-kernel tap order."""
    kh, kw, ci, co = w.shape
    return w.astype(jnp.bfloat16).reshape(kh * kw * ci, co)


# --------------------- stride-1 conv (+ fused pre-BN-ReLU) -------------------

def _make_conv_s1_kernel(k, pad, B, H, W, Ci, Ho, Wo, Co, has_pre):
    """k x k stride-1 conv over B images.  Builds the zero halo in a bf16 VMEM
    scratch, optionally fuses a per-channel affine+ReLU (the preceding BN) onto
    the input tile, assembles an in-VMEM im2col LHS (K = k*k*Ci) and issues one
    MXU matmul.  Emits per-block BN partial statistics of the f32 accumulator."""
    Hp, Wp = H + 2 * pad, W + 2 * pad
    M, K = B * Ho * Wo, k * k * Ci

    def kernel(*refs):
        i = 0
        x_ref = refs[i]; i += 1
        if has_pre:
            sc_ref, sh_ref = refs[i], refs[i + 1]; i += 2
        w_ref, y_ref, st_ref = refs[i], refs[i + 1], refs[i + 2]; i += 3
        xp_ref = refs[i] if pad > 0 else None

        if has_pre:
            sc = sc_ref[...].reshape(1, 1, 1, Ci)
            sh = sh_ref[...].reshape(1, 1, 1, Ci)
            xin = jnp.maximum(x_ref[...].astype(jnp.float32) * sc + sh, 0.0)
            xin = xin.astype(jnp.bfloat16)
        else:
            xin = x_ref[...]

        if pad > 0:
            # Zero only the halo strips (re-done every step: the scratch is not
            # reset by the pipeline, and a program_id==0 guard would be wrong
            # once the parallel grid axis is sharded across TensorCores).
            zr = jnp.zeros((B, pad, Wp, Ci), jnp.bfloat16)
            zc = jnp.zeros((B, H, pad, Ci), jnp.bfloat16)
            xp_ref[:, 0:pad, :, :] = zr
            xp_ref[:, pad + H:Hp, :, :] = zr
            xp_ref[:, pad:pad + H, 0:pad, :] = zc
            xp_ref[:, pad:pad + H, pad + W:Wp, :] = zc
            xp_ref[:, pad:pad + H, pad:pad + W, :] = xin
            taps = [xp_ref[:, kh:kh + Ho, kw:kw + Wo, :]
                    for kh in range(k) for kw in range(k)]
        else:
            taps = [xin[:, kh:kh + Ho, kw:kw + Wo, :]
                    for kh in range(k) for kw in range(k)]

        lhs = taps[0] if len(taps) == 1 else jnp.concatenate(taps, axis=-1)
        lhs = lhs.reshape(M, K)                                  # bf16, K-folded
        acc = jnp.dot(lhs, w_ref[...], preferred_element_type=jnp.float32)
        y_ref[...] = acc.reshape(B, Ho, Wo, Co).astype(y_ref.dtype)
        # NOTE: E[x^2]-E[x]^2 combine; fine at this scale, Welford for production.
        st_ref[0, 0:1, :] = jnp.sum(acc, axis=0, keepdims=True)
        st_ref[0, 1:2, :] = jnp.sum(acc * acc, axis=0, keepdims=True)

    return kernel


# ----------------------- stride-2 conv (phase-stacked) -----------------------

def _make_conv_s2_kernel(k, s, B, Ht, Wt, Ci, Ho, Wo, Co):
    """k x k stride-s conv over a phase-stacked padded input tile: every tap is
    a contiguous slice of one phase; taps are K-folded into a single matmul."""
    M, K = B * Ho * Wo, k * k * Ci

    def kernel(xph_ref, w_ref, y_ref, st_ref):
        taps = []
        for kh in range(k):
            for kw in range(k):
                p = (kh % s) * s + (kw % s)
                r0 = p * Ht + kh // s
                c0 = kw // s
                taps.append(xph_ref[:, r0:r0 + Ho, c0:c0 + Wo, :])
        lhs = jnp.concatenate(taps, axis=-1).reshape(M, K)       # bf16
        acc = jnp.dot(lhs, w_ref[...], preferred_element_type=jnp.float32)
        y_ref[...] = acc.reshape(B, Ho, Wo, Co).astype(y_ref.dtype)
        st_ref[0, 0:1, :] = jnp.sum(acc, axis=0, keepdims=True)
        st_ref[0, 1:2, :] = jnp.sum(acc * acc, axis=0, keepdims=True)

    return kernel


def _phase_stack(x_bf, k, s, pad, Ho, Wo):
    """Spatial pad + stride-phase decomposition (only used for stride>1 convs;
    unpadded-channel bf16, so this extra XLA pass over x is small)."""
    Ht = Ho + (k - 1) // s
    Wt = Wo + (k - 1) // s
    xp = jnp.pad(x_bf, ((0, 0), (pad, pad), (pad, pad), (0, 0))) if pad else x_bf
    phases = []
    for a in range(s):
        for b in range(s):
            ph = xp[:, a::s, b::s, :][:, :Ht, :Wt, :]
            dh, dw = Ht - ph.shape[1], Wt - ph.shape[2]
            if dh or dw:
                ph = jnp.pad(ph, ((0, 0), (0, dh), (0, dw), (0, 0)))
            phases.append(ph)
    return jnp.concatenate(phases, axis=1), Ht, Wt


# ------------------------------ conv dispatcher -------------------------------

def _conv_bn_stats(x_bf, w_fold, *, k, stride, pad, pre=None):
    """conv (bf16 operands, f32 accumulation) + per-block BN partial stats.
    Returns (y_bf16, stats[nb, 2, Co])."""
    N, H, W, Ci = x_bf.shape
    Co = w_fold.shape[-1]
    s = stride
    Ho = (H + 2 * pad - k) // s + 1
    Wo = (W + 2 * pad - k) // s + 1
    K = k * k * Ci
    budget = _vmem_budget_bytes()

    if s == 1:
        Hp, Wp = H + 2 * pad, W + 2 * pad
        per_img = (2 * H * W * Ci * 2 + Hp * Wp * Ci * 2
                   + Ho * Wo * K * 4 + Ho * Wo * Co * 4 + 2 * Ho * Wo * Co * 2)
        B = _pick_images_per_block(N, per_img, Ho * Wo, budget)
        nb = N // B
        kernel = _make_conv_s1_kernel(k, pad, B, H, W, Ci, Ho, Wo, Co,
                                      pre is not None)
        in_specs = [pl.BlockSpec((B, H, W, Ci), lambda n: (n, 0, 0, 0))]
        args = [x_bf]
        if pre is not None:
            in_specs += [pl.BlockSpec((1, Ci), lambda n: (0, 0)),
                         pl.BlockSpec((1, Ci), lambda n: (0, 0))]
            args += [pre[0], pre[1]]
        in_specs.append(pl.BlockSpec((K, Co), lambda n: (0, 0)))
        args.append(w_fold)
        scratch = [pltpu.VMEM((B, Hp, Wp, Ci), jnp.bfloat16)] if pad > 0 else []
        return pl.pallas_call(
            kernel,
            out_shape=(jax.ShapeDtypeStruct((N, Ho, Wo, Co), jnp.bfloat16),
                       jax.ShapeDtypeStruct((nb, 2, Co), jnp.float32)),
            grid=(nb,),
            in_specs=in_specs,
            out_specs=(pl.BlockSpec((B, Ho, Wo, Co), lambda n: (n, 0, 0, 0)),
                       pl.BlockSpec((1, 2, Co), lambda n: (n, 0, 0))),
            scratch_shapes=scratch,
            compiler_params=_compiler_params(),
        )(*args)

    # stride > 1 (3x3 stride-2 conv1): phase-stacked padded input, no pre-op.
    assert pre is None
    xph, Ht, Wt = _phase_stack(x_bf, k, s, pad, Ho, Wo)
    P = s * s
    per_img = (2 * P * Ht * Wt * Ci * 2 + Ho * Wo * K * 4
               + Ho * Wo * Co * 4 + 2 * Ho * Wo * Co * 2)
    B = _pick_images_per_block(N, per_img, Ho * Wo, budget)
    nb = N // B
    kernel = _make_conv_s2_kernel(k, s, B, Ht, Wt, Ci, Ho, Wo, Co)
    return pl.pallas_call(
        kernel,
        out_shape=(jax.ShapeDtypeStruct((N, Ho, Wo, Co), jnp.bfloat16),
                   jax.ShapeDtypeStruct((nb, 2, Co), jnp.float32)),
        grid=(nb,),
        in_specs=[pl.BlockSpec((B, P * Ht, Wt, Ci), lambda n: (n, 0, 0, 0)),
                  pl.BlockSpec((K, Co), lambda n: (0, 0))],
        out_specs=(pl.BlockSpec((B, Ho, Wo, Co), lambda n: (n, 0, 0, 0)),
                   pl.BlockSpec((1, 2, Co), lambda n: (n, 0, 0))),
        compiler_params=_compiler_params(),
    )(xph, w_fold)


def _bn_scale_shift(stats, gamma, beta, count):
    """Combine per-block (sum, sum_sq) into per-channel BN (scale, shift).
    Training-mode batch stats, biased variance, eps=1e-5 (PyTorch defaults)."""
    ssum = jnp.sum(stats[:, 0, :], axis=0)
    ssq = jnp.sum(stats[:, 1, :], axis=0)
    mean = ssum / count
    var = jnp.maximum(ssq / count - mean * mean, 0.0)
    scale = gamma * lax.rsqrt(var + EPS)
    shift = beta - mean * scale
    return (scale.reshape(1, -1).astype(jnp.float32),
            shift.reshape(1, -1).astype(jnp.float32))


# ------------------------ bn2 + shortcut + relu kernel ------------------------

def _make_tail_kernel(conv_shortcut, C):
    if conv_shortcut:
        def kernel(y2_ref, ysc_ref, sc2_ref, sh2_ref, scs_ref, shs_ref, o_ref):
            sc2 = sc2_ref[...].reshape(1, 1, 1, C)
            sh2 = sh2_ref[...].reshape(1, 1, 1, C)
            scs = scs_ref[...].reshape(1, 1, 1, C)
            shs = shs_ref[...].reshape(1, 1, 1, C)
            o_ref[...] = jnp.maximum(
                y2_ref[...].astype(jnp.float32) * sc2 + sh2
                + ysc_ref[...].astype(jnp.float32) * scs + shs, 0.0)
    else:
        def kernel(y2_ref, xid_ref, sc2_ref, sh2_ref, o_ref):
            sc2 = sc2_ref[...].reshape(1, 1, 1, C)
            sh2 = sh2_ref[...].reshape(1, 1, 1, C)
            o_ref[...] = jnp.maximum(
                y2_ref[...].astype(jnp.float32) * sc2 + sh2
                + xid_ref[...].astype(jnp.float32), 0.0)
    return kernel


def _tail(y2, sc2, sh2, residual, scs=None, shs=None):
    N, Ho, Wo, C = y2.shape
    conv_shortcut = scs is not None
    B = _pick_images_per_block(N, Ho * Wo * C * 20, Ho * Wo,
                               _vmem_budget_bytes())
    nb = N // B
    spat = pl.BlockSpec((B, Ho, Wo, C), lambda n: (n, 0, 0, 0))
    chan = pl.BlockSpec((1, C), lambda n: (0, 0))
    kernel = _make_tail_kernel(conv_shortcut, C)
    if conv_shortcut:
        in_specs = [spat, spat, chan, chan, chan, chan]
        args = (y2, residual, sc2, sh2, scs, shs)
    else:
        in_specs = [spat, spat, chan, chan]
        args = (y2, residual, sc2, sh2)
    return pl.pallas_call(
        kernel,
        out_shape=jax.ShapeDtypeStruct((N, Ho, Wo, C), jnp.float32),
        grid=(nb,),
        in_specs=in_specs,
        out_specs=spat,
        compiler_params=_compiler_params(),
    )(*args)


# ------------------------------- JAX wrapper ----------------------------------

def init_basic_block_params(key, in_planes, planes, stride):
    ks = jax.random.split(key, 8)
    p = {
        "stride": stride,
        "w1": 0.1 * jax.random.normal(ks[0], (3, 3, in_planes, planes), jnp.float32),  # HWIO
        "g1": 1.0 + 0.1 * jax.random.normal(ks[1], (planes,), jnp.float32),
        "b1": 0.1 * jax.random.normal(ks[2], (planes,), jnp.float32),
        "w2": 0.1 * jax.random.normal(ks[3], (3, 3, planes, planes), jnp.float32),
        "g2": 1.0 + 0.1 * jax.random.normal(ks[4], (planes,), jnp.float32),
        "b2": 0.1 * jax.random.normal(ks[5], (planes,), jnp.float32),
        "has_sc_conv": (stride != 1) or (in_planes != planes),
    }
    if p["has_sc_conv"]:
        p["ws"] = 0.1 * jax.random.normal(ks[6], (1, 1, in_planes, planes), jnp.float32)
        p["gs"] = 1.0 + 0.1 * jax.random.normal(ks[7], (planes,), jnp.float32)
        p["bs"] = 0.1 * jax.random.normal(jax.random.fold_in(key, 99), (planes,), jnp.float32)
    return p


def basic_block_forward_nhwc(x_nhwc, params):
    s = params["stride"]
    N, H, W, Cin = x_nhwc.shape
    x_bf = x_nhwc.astype(jnp.bfloat16)

    w1 = _fold_weight(params["w1"])
    w2 = _fold_weight(params["w2"])

    # conv1 (stride s) -> bf16 output + BN partial stats
    y1, st1 = _conv_bn_stats(x_bf, w1, k=3, stride=s, pad=1)
    _, Ho, Wo, Cp = y1.shape
    count = N * Ho * Wo
    sc1, sh1 = _bn_scale_shift(st1, params["g1"], params["b1"], count)

    # conv2 (stride 1) with bn1+ReLU fused into its input prologue
    y2, st2 = _conv_bn_stats(y1, w2, k=3, stride=1, pad=1, pre=(sc1, sh1))
    sc2, sh2 = _bn_scale_shift(st2, params["g2"], params["b2"], count)

    if params["has_sc_conv"]:
        ws = _fold_weight(params["ws"])
        # 1x1 stride-s conv == plain matmul over the subsampled rows.
        xs = x_bf[:, ::s, ::s, :]
        ysc, sts = _conv_bn_stats(xs, ws, k=1, stride=1, pad=0)
        scs, shs = _bn_scale_shift(sts, params["gs"], params["bs"], count)
        out = _tail(y2, sc2, sh2, ysc, scs, shs)
    else:
        out = _tail(y2, sc2, sh2, x_nhwc)    # identity shortcut (Cin == Cp, s == 1)
    return out


def basic_block_forward_nchw(x_nchw, params):
    y = basic_block_forward_nhwc(jnp.transpose(x_nchw, (0, 2, 3, 1)), params)
    return jnp.transpose(y, (0, 3, 1, 2))


# ------------------------- plain-JAX numerical reference ----------------------
# Mirrors the kernels' numerics: bf16 conv operands with f32 accumulation,
# bf16-rounded conv outputs feeding BN apply, f32 BN (batch stats, biased var).

def _ref_conv(x, w, stride, pad):
    return lax.conv_general_dilated(
        x.astype(jnp.bfloat16), w.astype(jnp.bfloat16),
        window_strides=(stride, stride), padding=((pad, pad), (pad, pad)),
        dimension_numbers=("NHWC", "HWIO", "NHWC"),
        preferred_element_type=jnp.float32)


def _ref_bn_scale_shift(y_f32, g, b):
    mean = jnp.mean(y_f32, axis=(0, 1, 2))
    var = jnp.maximum(jnp.mean(y_f32 * y_f32, axis=(0, 1, 2)) - mean * mean, 0.0)
    scale = g * lax.rsqrt(var + EPS)
    shift = b - mean * scale
    return scale, shift


def basic_block_reference_nhwc(x, p):
    s = p["stride"]
    r16 = lambda t: t.astype(jnp.bfloat16).astype(jnp.float32)
    y1 = _ref_conv(x, p["w1"], s, 1)
    sc1, sh1 = _ref_bn_scale_shift(y1, p["g1"], p["b1"])
    act = jax.nn.relu(r16(y1) * sc1 + sh1)
    y2 = _ref_conv(act, p["w2"], 1, 1)
    sc2, sh2 = _ref_bn_scale_shift(y2, p["g2"], p["b2"])
    out = r16(y2) * sc2 + sh2
    if p["has_sc_conv"]:
        ys = _ref_conv(x, p["ws"], s, 0)
        scs, shs = _ref_bn_scale_shift(ys, p["gs"], p["bs"])
        out = out + r16(ys) * scs + shs
    else:
        out = out + x
    return jax.nn.relu(out)


# ---------------------------------- main ---------------------------------------

if __name__ == "__main__":
    key = jax.random.PRNGKey(0)
    kx, kp1, kp2 = jax.random.split(key, 3)
    TOL = 5e-3

    # Config A: in_planes != planes, stride 2  -> 1x1 conv + BN shortcut
    x_nchw = jax.random.normal(kx, (2, 4, 16, 16), jnp.float32)   # NCHW like PyTorch
    params_a = init_basic_block_params(kp1, in_planes=4, planes=8, stride=2)
    fwd_a = jax.jit(lambda x: basic_block_forward_nchw(x, params_a))
    y_a = jax.block_until_ready(fwd_a(x_nchw))
    ref_a = basic_block_reference_nhwc(jnp.transpose(x_nchw, (0, 2, 3, 1)), params_a)
    ref_a = jnp.transpose(ref_a, (0, 3, 1, 2))
    assert y_a.shape == (2, 8, 8, 8)
    assert bool(jnp.allclose(y_a, ref_a, rtol=TOL, atol=TOL)), "config A mismatch"

    # Config B: in_planes == planes, stride 1  -> identity shortcut
    x2_nchw = jax.random.normal(jax.random.fold_in(kx, 1), (2, 8, 16, 16), jnp.float32)
    params_b = init_basic_block_params(kp2, in_planes=8, planes=8, stride=1)
    fwd_b = jax.jit(lambda x: basic_block_forward_nchw(x, params_b))
    y_b = jax.block_until_ready(fwd_b(x2_nchw))
    ref_b = basic_block_reference_nhwc(jnp.transpose(x2_nchw, (0, 2, 3, 1)), params_b)
    ref_b = jnp.transpose(ref_b, (0, 3, 1, 2))
    assert y_b.shape == (2, 8, 16, 16)
    assert bool(jnp.allclose(y_b, ref_b, rtol=TOL, atol=TOL)), "config B mismatch"

    print("KERNEL_OK")
</pallas_src>

<mosaic_0001>
module attributes {stable_mosaic.version = 11 : i64} {
  func.func @kernel(%arg0: i32, %arg1: memref<2x8x8x4xbf16, #tpu.memory_space<vmem>>, %arg2: memref<4x8xbf16, #tpu.memory_space<vmem>>, %arg3: memref<2x8x8x8xbf16, #tpu.memory_space<vmem>>, %arg4: memref<1x2x8xf32, #tpu.memory_space<vmem>>) attributes {dimension_semantics = [#tpu.dimension_semantics<parallel>], iteration_bounds = array<i64: 1>, scalar_prefetch = 0 : i64, scratch_operands = 0 : i64, tpu.core_type = #tpu.core_type<tc>, window_params = [{transform_indices = @transform_0, window_bounds = array<i64: 2, 8, 8, 4>}, {pipeline_mode = #tpu.pipeline_mode<synchronous>, transform_indices = @transform_1, window_bounds = array<i64: 4, 8>}, {transform_indices = @transform_2, window_bounds = array<i64: 2, 8, 8, 8>}, {transform_indices = @transform_3, window_bounds = array<i64: 1, 2, 8>}]} {
    %c0 = arith.constant 0 : index
    %c0_0 = arith.constant 0 : index
    %c0_1 = arith.constant 0 : index
    %c0_2 = arith.constant 0 : index
    %0 = vector.load %arg1[%c0, %c0_0, %c0_1, %c0_2] : memref<2x8x8x4xbf16, #tpu.memory_space<vmem>>, vector<2x8x8x4xbf16>
    %1 = vector.shape_cast %0 : vector<2x8x8x4xbf16> to vector<128x4xbf16>
    %c0_3 = arith.constant 0 : index
    %c0_4 = arith.constant 0 : index
    %2 = vector.load %arg2[%c0_3, %c0_4] : memref<4x8xbf16, #tpu.memory_space<vmem>>, vector<4x8xbf16>
    %cst = arith.constant dense<0.000000e+00> : vector<128x8xf32>
    %3 = tpu.matmul %1, %2, %cst {dimension_numbers = #tpu.dot_dimension_numbers<[1], [0], [0], [1], [0, 0, 1, 1], [], []>} : vector<128x4xbf16>, vector<4x8xbf16>, vector<128x8xf32> -> vector<128x8xf32>
    %4 = vector.shape_cast %3 : vector<128x8xf32> to vector<2x8x8x8xf32>
    %5 = arith.truncf %4 : vector<2x8x8x8xf32> to vector<2x8x8x8xbf16>
    %c0_5 = arith.constant 0 : index
    %c0_6 = arith.constant 0 : index
    %c0_7 = arith.constant 0 : index
    %c0_8 = arith.constant 0 : index
    %6 = vector.load %arg3[%c0_5, %c0_6, %c0_7, %c0_8] : memref<2x8x8x8xbf16, #tpu.memory_space<vmem>>, vector<2x8x8x8xbf16>
    tpu.vector_store %arg3[%c0_5, %c0_6, %c0_7, %c0_8], %5 {strides = array<i32>} : memref<2x8x8x8xbf16, #tpu.memory_space<vmem>>, vector<2x8x8x8xbf16>,
    %cst_9 = arith.constant dense<0.000000e+00> : vector<8xf32>
    %7 = vector.multi_reduction <add>, %3, %cst_9 [0] : vector<128x8xf32> to vector<8xf32>
    %8 = vector.shape_cast %7 : vector<8xf32> to vector<1x8xf32>
    %c0_10 = arith.constant 0 : index
    %c0_11 = arith.constant 0 : index
    %c0_12 = arith.constant 0 : index
    %9 = vector.load %arg4[%c0_10, %c0_11, %c0_12] : memref<1x2x8xf32, #tpu.memory_space<vmem>>, vector<1x1x8xf32>
    %10 = vector.shape_cast %9 : vector<1x1x8xf32> to vector<1x8xf32>
    %11 = vector.shape_cast %8 : vector<1x8xf32> to vector<1x1x8xf32>
    tpu.vector_store %arg4[%c0_10, %c0_11, %c0_12], %11 {strides = array<i32>} : memref<1x2x8xf32, #tpu.memory_space<vmem>>, vector<1x1x8xf32>,
    %12 = arith.mulf %3, %3 : vector<128x8xf32>
    %cst_13 = arith.constant dense<0.000000e+00> : vector<8xf32>
    %13 = vector.multi_reduction <add>, %12, %cst_13 [0] : vector<128x8xf32> to vector<8xf32>
    %14 = vector.shape_cast %13 : vector<8xf32> to vector<1x8xf32>
    %c0_14 = arith.constant 0 : index
    %c1 = arith.constant 1 : index
    %c0_15 = arith.constant 0 : index
    %15 = vector.load %arg4[%c0_14, %c1, %c0_15] : memref<1x2x8xf32, #tpu.memory_space<vmem>>, vector<1x1x8xf32>
    %16 = vector.shape_cast %15 : vector<1x1x8xf32> to vector<1x8xf32>
    %17 = vector.shape_cast %14 : vector<1x8xf32> to vector<1x1x8xf32>
    tpu.vector_store %arg4[%c0_14, %c1, %c0_15], %17 {strides = array<i32>} : memref<1x2x8xf32, #tpu.memory_space<vmem>>, vector<1x1x8xf32>,
    return
  }
  func.func @transform_0(%arg0: i32) -> (i32, i32, i32, i32) {
    %c0_i32 = arith.constant 0 : i32
    %c0_i32_0 = arith.constant 0 : i32
    %c0_i32_1 = arith.constant 0 : i32
    %c0_i32_2 = arith.constant 0 : i32
    return %arg0, %c0_i32, %c0_i32_0, %c0_i32_1 : i32, i32, i32, i32
  }
  func.func @transform_1(%arg0: i32) -> (i32, i32) {
    %c0_i32 = arith.constant 0 : i32
    %c0_i32_0 = arith.constant 0 : i32
    %c0_i32_1 = arith.constant 0 : i32
    return %c0_i32, %c0_i32_0 : i32, i32
  }
  func.func @transform_2(%arg0: i32) -> (i32, i32, i32, i32) {
    %c0_i32 = arith.constant 0 : i32
    %c0_i32_0 = arith.constant 0 : i32
    %c0_i32_1 = arith.constant 0 : i32
    %c0_i32_2 = arith.constant 0 : i32
    return %arg0, %c0_i32, %c0_i32_0, %c0_i32_1 : i32, i32, i32, i32
  }
  func.func @transform_3(%arg0: i32) -> (i32, i32, i32) {
    %c0_i32 = arith.constant 0 : i32
    %c0_i32_0 = arith.constant 0 : i32
    %c0_i32_1 = arith.constant 0 : i32
    return %arg0, %c0_i32, %c0_i32_0 : i32, i32, i32
  }
}

module attributes {stable_mosaic.version = 11 : i64} {
  func.func @kernel(%arg0: i32, %arg1: memref<2x8x8x8xbf16, #tpu.memory_space<vmem>>, %arg2: memref<1x8xf32, #tpu.memory_space<vmem>>, %arg3: memref<1x8xf32, #tpu.memory_space<vmem>>, %arg4: memref<72x8xbf16, #tpu.memory_space<vmem>>, %arg5: memref<2x8x8x8xbf16, #tpu.memory_space<vmem>>, %arg6: memref<1x2x8xf32, #tpu.memory_space<vmem>>, %arg7: memref<2x10x10x8xbf16, #tpu.memory_space<vmem>>) attributes {dimension_semantics = [#tpu.dimension_semantics<parallel>], iteration_bounds = array<i64: 1>, scalar_prefetch = 0 : i64, scratch_operands = 1 : i64, tpu.core_type = #tpu.core_type<tc>, window_params = [{transform_indices = @transform_0, window_bounds = array<i64: 2, 8, 8, 8>}, {pipeline_mode = #tpu.pipeline_mode<synchronous>, transform_indices = @transform_1, window_bounds = array<i64: 1, 8>}, {pipeline_mode = #tpu.pipeline_mode<synchronous>, transform_indices = @transform_2, window_bounds = array<i64: 1, 8>}, {pipeline_mode = #tpu.pipeline_mode<synchronous>, transform_indices = @transform_3, window_bounds = array<i64: 72, 8>}, {transform_indices = @transform_4, window_bounds = array<i64: 2, 8, 8, 8>}, {transform_indices = @transform_5, window_bounds = array<i64: 1, 2, 8>}]} {
    %c0 = arith.constant 0 : index
    %c0_0 = arith.constant 0 : index
    %0 = vector.load %arg2[%c0, %c0_0] : memref<1x8xf32, #tpu.memory_space<vmem>>, vector<1x8xf32>
    %1 = vector.shape_cast %0 : vector<1x8xf32> to vector<1x1x1x8xf32>
    %c0_1 = arith.constant 0 : index
    %c0_2 = arith.constant 0 : index
    %2 = vector.load %arg3[%c0_1, %c0_2] : memref<1x8xf32, #tpu.memory_space<vmem>>, vector<1x8xf32>
    %3 = vector.shape_cast %2 : vector<1x8xf32> to vector<1x1x1x8xf32>
    %c0_3 = arith.constant 0 : index
    %c0_4 = arith.constant 0 : index
    %c0_5 = arith.constant 0 : index
    %c0_6 = arith.constant 0 : index
    %4 = vector.load %arg1[%c0_3, %c0_4, %c0_5, %c0_6] : memref<2x8x8x8xbf16, #tpu.memory_space<vmem>>, vector<2x8x8x8xbf16>
    %5 = arith.extf %4 : vector<2x8x8x8xbf16> to vector<2x8x8x8xf32>
    %6 = vector.broadcast %1 : vector<1x1x1x8xf32> to vector<2x8x8x8xf32>
    %7 = arith.mulf %5, %6 : vector<2x8x8x8xf32>
    %8 = vector.broadcast %3 : vector<1x1x1x8xf32> to vector<2x8x8x8xf32>
    %9 = arith.addf %7, %8 : vector<2x8x8x8xf32>
    %cst = arith.constant 0.000000e+00 : f32
    %10 = vector.broadcast %cst : f32 to vector<2x8x8x8xf32>
    %11 = arith.maximumf %9, %10 : vector<2x8x8x8xf32>
    %12 = arith.truncf %11 : vector<2x8x8x8xf32> to vector<2x8x8x8xbf16>
    %cst_7 = arith.constant 0.000000e+00 : bf16
    %13 = vector.broadcast %cst_7 : bf16 to vector<2x1x10x8xbf16>
    %cst_8 = arith.constant 0.000000e+00 : bf16
    %14 = vector.broadcast %cst_8 : bf16 to vector<2x8x1x8xbf16>
    %c0_9 = arith.constant 0 : index
    %c0_10 = arith.constant 0 : index
    %c0_11 = arith.constant 0 : index
    %c0_12 = arith.constant 0 : index
    %15 = vector.load %arg7[%c0_9, %c0_10, %c0_11, %c0_12] : memref<2x10x10x8xbf16, #tpu.memory_space<vmem>>, vector<2x1x10x8xbf16>
    tpu.vector_store %arg7[%c0_9, %c0_10, %c0_11, %c0_12], %13 {strides = array<i32>} : memref<2x10x10x8xbf16, #tpu.memory_space<vmem>>, vector<2x1x10x8xbf16>,
    %c0_13 = arith.constant 0 : index
    %c9 = arith.constant 9 : index
    %c0_14 = arith.constant 0 : index
    %c0_15 = arith.constant 0 : index
    %16 = vector.load %arg7[%c0_13, %c9, %c0_14, %c0_15] : memref<2x10x10x8xbf16, #tpu.memory_space<vmem>>, vector<2x1x10x8xbf16>
    tpu.vector_store %arg7[%c0_13, %c9, %c0_14, %c0_15], %13 {strides = array<i32>} : memref<2x10x10x8xbf16, #tpu.memory_space<vmem>>, vector<2x1x10x8xbf16>,
    %c0_16 = arith.constant 0 : index
    %c1 = arith.constant 1 : index
    %c0_17 = arith.constant 0 : index
    %c0_18 = arith.constant 0 : index
    %17 = vector.load %arg7[%c0_16, %c1, %c0_17, %c0_18] : memref<2x10x10x8xbf16, #tpu.memory_space<vmem>>, vector<2x8x1x8xbf16>
    tpu.vector_store %arg7[%c0_16, %c1, %c0_17, %c0_18], %14 {strides = array<i32>} : memref<2x10x10x8xbf16, #tpu.memory_space<vmem>>, vector<2x8x1x8xbf16>,
    %c0_19 = arith.constant 0 : index
    %c1_20 = arith.constant 1 : index
    %c9_21 = arith.constant 9 : index
    %c0_22 = arith.constant 0 : index
    %18 = vector.load %arg7[%c0_19, %c1_20, %c9_21, %c0_22] : memref<2x10x10x8xbf16, #tpu.memory_space<vmem>>, vector<2x8x1x8xbf16>
    tpu.vector_store %arg7[%c0_19, %c1_20, %c9_21, %c0_22], %14 {strides = array<i32>} : memref<2x10x10x8xbf16, #tpu.memory_space<vmem>>, vector<2x8x1x8xbf16>,
    %c0_23 = arith.constant 0 : index
    %c1_24 = arith.constant 1 : index
    %c1_25 = arith.constant 1 : index
    %c0_26 = arith.constant 0 : index
    %19 = vector.load %arg7[%c0_23, %c1_24, %c1_25, %c0_26] : memref<2x10x10x8xbf16, #tpu.memory_space<vmem>>, vector<2x8x8x8xbf16>
    tpu.vector_store %arg7[%c0_23, %c1_24, %c1_25, %c0_26], %12 {strides = array<i32>} : memref<2x10x10x8xbf16, #tpu.memory_space<vmem>>, vector<2x8x8x8xbf16>,
    %c0_27 = arith.constant 0 : index
    %c0_28 = arith.constant 0 : index
    %c0_29 = arith.constant 0 : index
    %c0_30 = arith.constant 0 : index
    %20 = vector.load %arg7[%c0_27, %c0_28, %c0_29, %c0_30] : memref<2x10x10x8xbf16, #tpu.memory_space<vmem>>, vector<2x8x8x8xbf16>
    %c0_31 = arith.constant 0 : index
    %c0_32 = arith.constant 0 : index
    %c1_33 = arith.constant 1 : index
    %c0_34 = arith.constant 0 : index
    %21 = vector.load %arg7[%c0_31, %c0_32, %c1_33, %c0_34] : memref<2x10x10x8xbf16, #tpu.memory_space<vmem>>, vector<2x8x8x8xbf16>
    %c0_35 = arith.constant 0 : index
    %c0_36 = arith.constant 0 : index
    %c2 = arith.constant 2 : index
    %c0_37 = arith.constant 0 : index
    %22 = vector.load %arg7[%c0_35, %c0_36, %c2, %c0_37] : memref<2x10x10x8xbf16, #tpu.memory_space<vmem>>, vector<2x8x8x8xbf16>
    %c0_38 = arith.constant 0 : index
    %c1_39 = arith.constant 1 : index
    %c0_40 = arith.constant 0 : index
    %c0_41 = arith.constant 0 : index
    %23 = vector.load %arg7[%c0_38, %c1_39, %c0_40, %c0_41] : memref<2x10x10x8xbf16, #tpu.memory_space<vmem>>, vector<2x8x8x8xbf16>
    %c0_42 = arith.constant 0 : index
    %c1_43 = arith.constant 1 : index
    %c1_44 = arith.constant 1 : index
    %c0_45 = arith.constant 0 : index
    %24 = vector.load %arg7[%c0_42, %c1_43, %c1_44, %c0_45] : memref<2x10x10x8xbf16, #tpu.memory_space<vmem>>, vector<2x8x8x8xbf16>
    %c0_46 = arith.constant 0 : index
    %c1_47 = arith.constant 1 : index
    %c2_48 = arith.constant 2 : index
    %c0_49 = arith.constant 0 : index
    %25 = vector.load %arg7[%c0_46, %c1_47, %c2_48, %c0_49] : memref<2x10x10x8xbf16, #tpu.memory_space<vmem>>, vector<2x8x8x8xbf16>
    %c0_50 = arith.constant 0 : index
    %c2_51 = arith.constant 2 : index
    %c0_52 = arith.constant 0 : index
    %c0_53 = arith.constant 0 : index
    %26 = vector.load %arg7[%c0_50, %c2_51, %c0_52, %c0_53] : memref<2x10x10x8xbf16, #tpu.memory_space<vmem>>, vector<2x8x8x8xbf16>
    %c0_54 = arith.constant 0 : index
    %c2_55 = arith.constant 2 : index
    %c1_56 = arith.constant 1 : index
    %c0_57 = arith.constant 0 : index
    %27 = vector.load %arg7[%c0_54, %c2_55, %c1_56, %c0_57] : memref<2x10x10x8xbf16, #tpu.memory_space<vmem>>, vector<2x8x8x8xbf16>
    %c0_58 = arith.constant 0 : index
    %c2_59 = arith.constant 2 : index
    %c2_60 = arith.constant 2 : index
    %c0_61 = arith.constant 0 : index
    %28 = vector.load %arg7[%c0_58, %c2_59, %c2_60, %c0_61] : memref<2x10x10x8xbf16, #tpu.memory_space<vmem>>, vector<2x8x8x8xbf16>
    %29 = tpu.concatenate %20, %21, %22, %23, %24, %25, %26, %27, %28 in 3 : vector<2x8x8x8xbf16>, vector<2x8x8x8xbf16>, vector<2x8x8x8xbf16>, vector<2x8x8x8xbf16>, vector<2x8x8x8xbf16>, vector<2x8x8x8xbf16>, vector<2x8x8x8xbf16>, vector<2x8x8x8xbf16>, vector<2x8x8x8xbf16> -> vector<2x8x8x72xbf16>
    %30 = vector.shape_cast %29 : vector<2x8x8x72xbf16> to vector<128x72xbf16>
    %c0_62 = arith.constant 0 : index
    %c0_63 = arith.constant 0 : index
    %31 = vector.load %arg4[%c0_62, %c0_63] : memref<72x8xbf16, #tpu.memory_space<vmem>>, vector<72x8xbf16>
    %cst_64 = arith.constant dense<0.000000e+00> : vector<128x8xf32>
    %32 = tpu.matmul %30, %31, %cst_64 {dimension_numbers = #tpu.dot_dimension_numbers<[1], [0], [0], [1], [0, 0, 1, 1], [], []>} : vector<128x72xbf16>, vector<72x8xbf16>, vector<128x8xf32> -> vector<128x8xf32>
    %33 = vector.shape_cast %32 : vector<128x8xf32> to vector<2x8x8x8xf32>
    %34 = arith.truncf %33 : vector<2x8x8x8xf32> to vector<2x8x8x8xbf16>
    %c0_65 = arith.constant 0 : index
    %c0_66 = arith.constant 0 : index
    %c0_67 = arith.constant 0 : index
    %c0_68 = arith.constant 0 : index
    %35 = vector.load %arg5[%c0_65, %c0_66, %c0_67, %c0_68] : memref<2x8x8x8xbf16, #tpu.memory_space<vmem>>, vector<2x8x8x8xbf16>
    tpu.vector_store %arg5[%c0_65, %c0_66, %c0_67, %c0_68], %34 {strides = array<i32>} : memref<2x8x8x8xbf16, #tpu.memory_space<vmem>>, vector<2x8x8x8xbf16>,
    %cst_69 = arith.constant dense<0.000000e+00> : vector<8xf32>
    %36 = vector.multi_reduction <add>, %32, %cst_69 [0] : vector<128x8xf32> to vector<8xf32>
    %37 = vector.shape_cast %36 : vector<8xf32> to vector<1x8xf32>
    %c0_70 = arith.constant 0 : index
    %c0_71 = arith.constant 0 : index
    %c0_72 = arith.constant 0 : index
    %38 = vector.load %arg6[%c0_70, %c0_71, %c0_72] : memref<1x2x8xf32, #tpu.memory_space<vmem>>, vector<1x1x8xf32>
    %39 = vector.shape_cast %38 : vector<1x1x8xf32> to vector<1x8xf32>
    %40 = vector.shape_cast %37 : vector<1x8xf32> to vector<1x1x8xf32>
    tpu.vector_store %arg6[%c0_70, %c0_71, %c0_72], %40 {strides = array<i32>} : memref<1x2x8xf32, #tpu.memory_space<vmem>>, vector<1x1x8xf32>,
    %41 = arith.mulf %32, %32 : vector<128x8xf32>
    %cst_73 = arith.constant dense<0.000000e+00> : vector<8xf32>
    %42 = vector.multi_reduction <add>, %41, %cst_73 [0] : vector<128x8xf32> to vector<8xf32>
    %43 = vector.shape_cast %42 : vector<8xf32> to vector<1x8xf32>
    %c0_74 = arith.constant 0 : index
    %c1_75 = arith.constant 1 : index
    %c0_76 = arith.constant 0 : index
    %44 = vector.load %arg6[%c0_74, %c1_75, %c0_76] : memref<1x2x8xf32, #tpu.memory_space<vmem>>, vector<1x1x8xf32>
    %45 = vector.shape_cast %44 : vector<1x1x8xf32> to vector<1x8xf32>
    %46 = vector.shape_cast %43 : vector<1x8xf32> to vector<1x1x8xf32>
    tpu.vector_store %arg6[%c0_74, %c1_75, %c0_76], %46 {strides = array<i32>} : memref<1x2x8xf32, #tpu.memory_space<vmem>>, vector<1x1x8xf32>,
    return
  }
  func.func @transform_0(%arg0: i32) -> (i32, i32, i32, i32) {
    %c0_i32 = arith.constant 0 : i32
    %c0_i32_0 = arith.constant 0 : i32
    %c0_i32_1 = arith.constant 0 : i32
    %c0_i32_2 = arith.constant 0 : i32
    return %arg0, %c0_i32, %c0_i32_0, %c0_i32_1 : i32, i32, i32, i32
  }
  func.func @transform_1(%arg0: i32) -> (i32, i32) {
    %c0_i32 = arith.constant 0 : i32
    %c0_i32_0 = arith.constant 0 : i32
    %c0_i32_1 = arith.constant 0 : i32
    return %c0_i32, %c0_i32_0 : i32, i32
  }
  func.func @transform_2(%arg0: i32) -> (i32, i32) {
    %c0_i32 = arith.constant 0 : i32
    %c0_i32_0 = arith.constant 0 : i32
    %c0_i32_1 = arith.constant 0 : i32
    return %c0_i32, %c0_i32_0 : i32, i32
  }
  func.func @transform_3(%arg0: i32) -> (i32, i32) {
    %c0_i32 = arith.constant 0 : i32
    %c0_i32_0 = arith.constant 0 : i32
    %c0_i32_1 = arith.constant 0 : i32
    return %c0_i32, %c0_i32_0 : i32, i32
  }
  func.func @transform_4(%arg0: i32) -> (i32, i32, i32, i32) {
    %c0_i32 = arith.constant 0 : i32
    %c0_i32_0 = arith.constant 0 : i32
    %c0_i32_1 = arith.constant 0 : i32
    %c0_i32_2 = arith.constant 0 : i32
    return %arg0, %c0_i32, %c0_i32_0, %c0_i32_1 : i32, i32, i32, i32
  }
  func.func @transform_5(%arg0: i32) -> (i32, i32, i32) {
    %c0_i32 = arith.constant 0 : i32
    %c0_i32_0 = arith.constant 0 : i32
    %c0_i32_1 = arith.constant 0 : i32
    return %arg0, %c0_i32, %c0_i32_0 : i32, i32, i32
  }
}

module attributes {stable_mosaic.version = 11 : i64} {
  func.func @kernel(%arg0: i32, %arg1: memref<2x36x9x4xbf16, #tpu.memory_space<vmem>>, %arg2: memref<36x8xbf16, #tpu.memory_space<vmem>>, %arg3: memref<2x8x8x8xbf16, #tpu.memory_space<vmem>>, %arg4: memref<1x2x8xf32, #tpu.memory_space<vmem>>) attributes {dimension_semantics = [#tpu.dimension_semantics<parallel>], iteration_bounds = array<i64: 1>, scalar_prefetch = 0 : i64, scratch_operands = 0 : i64, tpu.core_type = #tpu.core_type<tc>, window_params = [{transform_indices = @transform_0, window_bounds = array<i64: 2, 36, 9, 4>}, {pipeline_mode = #tpu.pipeline_mode<synchronous>, transform_indices = @transform_1, window_bounds = array<i64: 36, 8>}, {transform_indices = @transform_2, window_bounds = array<i64: 2, 8, 8, 8>}, {transform_indices = @transform_3, window_bounds = array<i64: 1, 2, 8>}]} {
    %c0 = arith.constant 0 : index
    %c0_0 = arith.constant 0 : index
    %c0_1 = arith.constant 0 : index
    %c0_2 = arith.constant 0 : index
    %0 = vector.load %arg1[%c0, %c0_0, %c0_1, %c0_2] : memref<2x36x9x4xbf16, #tpu.memory_space<vmem>>, vector<2x8x8x4xbf16>
    %c0_3 = arith.constant 0 : index
    %c9 = arith.constant 9 : index
    %c0_4 = arith.constant 0 : index
    %c0_5 = arith.constant 0 : index
    %1 = vector.load %arg1[%c0_3, %c9, %c0_4, %c0_5] : memref<2x36x9x4xbf16, #tpu.memory_space<vmem>>, vector<2x8x8x4xbf16>
    %c0_6 = arith.constant 0 : index
    %c0_7 = arith.constant 0 : index
    %c1 = arith.constant 1 : index
    %c0_8 = arith.constant 0 : index
    %2 = vector.load %arg1[%c0_6, %c0_7, %c1, %c0_8] : memref<2x36x9x4xbf16, #tpu.memory_space<vmem>>, vector<2x8x8x4xbf16>
    %c0_9 = arith.constant 0 : index
    %c18 = arith.constant 18 : index
    %c0_10 = arith.constant 0 : index
    %c0_11 = arith.constant 0 : index
    %3 = vector.load %arg1[%c0_9, %c18, %c0_10, %c0_11] : memref<2x36x9x4xbf16, #tpu.memory_space<vmem>>, vector<2x8x8x4xbf16>
    %c0_12 = arith.constant 0 : index
    %c27 = arith.constant 27 : index
    %c0_13 = arith.constant 0 : index
    %c0_14 = arith.constant 0 : index
    %4 = vector.load %arg1[%c0_12, %c27, %c0_13, %c0_14] : memref<2x36x9x4xbf16, #tpu.memory_space<vmem>>, vector<2x8x8x4xbf16>
    %c0_15 = arith.constant 0 : index
    %c18_16 = arith.constant 18 : index
    %c1_17 = arith.constant 1 : index
    %c0_18 = arith.constant 0 : index
    %5 = vector.load %arg1[%c0_15, %c18_16, %c1_17, %c0_18] : memref<2x36x9x4xbf16, #tpu.memory_space<vmem>>, vector<2x8x8x4xbf16>
    %c0_19 = arith.constant 0 : index
    %c1_20 = arith.constant 1 : index
    %c0_21 = arith.constant 0 : index
    %c0_22 = arith.constant 0 : index
    %6 = vector.load %arg1[%c0_19, %c1_20, %c0_21, %c0_22] : memref<2x36x9x4xbf16, #tpu.memory_space<vmem>>, vector<2x8x8x4xbf16>
    %c0_23 = arith.constant 0 : index
    %c10 = arith.constant 10 : index
    %c0_24 = arith.constant 0 : index
    %c0_25 = arith.constant 0 : index
    %7 = vector.load %arg1[%c0_23, %c10, %c0_24, %c0_25] : memref<2x36x9x4xbf16, #tpu.memory_space<vmem>>, vector<2x8x8x4xbf16>
    %c0_26 = arith.constant 0 : index
    %c1_27 = arith.constant 1 : index
    %c1_28 = arith.constant 1 : index
    %c0_29 = arith.constant 0 : index
    %8 = vector.load %arg1[%c0_26, %c1_27, %c1_28, %c0_29] : memref<2x36x9x4xbf16, #tpu.memory_space<vmem>>, vector<2x8x8x4xbf16>
    %9 = tpu.concatenate %0, %1, %2, %3, %4, %5, %6, %7, %8 in 3 : vector<2x8x8x4xbf16>, vector<2x8x8x4xbf16>, vector<2x8x8x4xbf16>, vector<2x8x8x4xbf16>, vector<2x8x8x4xbf16>, vector<2x8x8x4xbf16>, vector<2x8x8x4xbf16>, vector<2x8x8x4xbf16>, vector<2x8x8x4xbf16> -> vector<2x8x8x36xbf16>
    %10 = vector.shape_cast %9 : vector<2x8x8x36xbf16> to vector<128x36xbf16>
    %c0_30 = arith.constant 0 : index
    %c0_31 = arith.constant 0 : index
    %11 = vector.load %arg2[%c0_30, %c0_31] : memref<36x8xbf16, #tpu.memory_space<vmem>>, vector<36x8xbf16>
    %cst = arith.constant dense<0.000000e+00> : vector<128x8xf32>
    %12 = tpu.matmul %10, %11, %cst {dimension_numbers = #tpu.dot_dimension_numbers<[1], [0], [0], [1], [0, 0, 1, 1], [], []>} : vector<128x36xbf16>, vector<36x8xbf16>, vector<128x8xf32> -> vector<128x8xf32>
    %13 = vector.shape_cast %12 : vector<128x8xf32> to vector<2x8x8x8xf32>
    %14 = arith.truncf %13 : vector<2x8x8x8xf32> to vector<2x8x8x8xbf16>
    %c0_32 = arith.constant 0 : index
    %c0_33 = arith.constant 0 : index
    %c0_34 = arith.constant 0 : index
    %c0_35 = arith.constant 0 : index
    %15 = vector.load %arg3[%c0_32, %c0_33, %c0_34, %c0_35] : memref<2x8x8x8xbf16, #tpu.memory_space<vmem>>, vector<2x8x8x8xbf16>
    tpu.vector_store %arg3[%c0_32, %c0_33, %c0_34, %c0_35], %14 {strides = array<i32>} : memref<2x8x8x8xbf16, #tpu.memory_space<vmem>>, vector<2x8x8x8xbf16>,
    %cst_36 = arith.constant dense<0.000000e+00> : vector<8xf32>
    %16 = vector.multi_reduction <add>, %12, %cst_36 [0] : vector<128x8xf32> to vector<8xf32>
    %17 = vector.shape_cast %16 : vector<8xf32> to vector<1x8xf32>
    %c0_37 = arith.constant 0 : index
    %c0_38 = arith.constant 0 : index
    %c0_39 = arith.constant 0 : index
    %18 = vector.load %arg4[%c0_37, %c0_38, %c0_39] : memref<1x2x8xf32, #tpu.memory_space<vmem>>, vector<1x1x8xf32>
    %19 = vector.shape_cast %18 : vector<1x1x8xf32> to vector<1x8xf32>
    %20 = vector.shape_cast %17 : vector<1x8xf32> to vector<1x1x8xf32>
    tpu.vector_store %arg4[%c0_37, %c0_38, %c0_39], %20 {strides = array<i32>} : memref<1x2x8xf32, #tpu.memory_space<vmem>>, vector<1x1x8xf32>,
    %21 = arith.mulf %12, %12 : vector<128x8xf32>
    %cst_40 = arith.constant dense<0.000000e+00> : vector<8xf32>
    %22 = vector.multi_reduction <add>, %21, %cst_40 [0] : vector<128x8xf32> to vector<8xf32>
    %23 = vector.shape_cast %22 : vector<8xf32> to vector<1x8xf32>
    %c0_41 = arith.constant 0 : index
    %c1_42 = arith.constant 1 : index
    %c0_43 = arith.constant 0 : index
    %24 = vector.load %arg4[%c0_41, %c1_42, %c0_43] : memref<1x2x8xf32, #tpu.memory_space<vmem>>, vector<1x1x8xf32>
    %25 = vector.shape_cast %24 : vector<1x1x8xf32> to vector<1x8xf32>
    %26 = vector.shape_cast %23 : vector<1x8xf32> to vector<1x1x8xf32>
    tpu.vector_store %arg4[%c0_41, %c1_42, %c0_43], %26 {strides = array<i32>} : memref<1x2x8xf32, #tpu.memory_space<vmem>>, vector<1x1x8xf32>,
    return
  }
  func.func @transform_0(%arg0: i32) -> (i32, i32, i32, i32) {
    %c0_i32 = arith.constant 0 : i32
    %c0_i32_0 = arith.constant 0 : i32
    %c0_i32_1 = arith.constant 0 : i32
    %c0_i32_2 = arith.constant 0 : i32
    return %arg0, %c0_i32, %c0_i32_0, %c0_i32_1 : i32, i32, i32, i32
  }
  func.func @transform_1(%arg0: i32) -> (i32, i32) {
    %c0_i32 = arith.constant 0 : i32
    %c0_i32_0 = arith.constant 0 : i32
    %c0_i32_1 = arith.constant 0 : i32
    return %c0_i32, %c0_i32_0 : i32, i32
  }
  func.func @transform_2(%arg0: i32) -> (i32, i32, i32, i32) {
    %c0_i32 = arith.constant 0 : i32
    %c0_i32_0 = arith.constant 0 : i32
    %c0_i32_1 = arith.constant 0 : i32
    %c0_i32_2 = arith.constant 0 : i32
    return %arg0, %c0_i32, %c0_i32_0, %c0_i32_1 : i32, i32, i32, i32
  }
  func.func @transform_3(%arg0: i32) -> (i32, i32, i32) {
    %c0_i32 = arith.constant 0 : i32
    %c0_i32_0 = arith.constant 0 : i32
    %c0_i32_1 = arith.constant 0 : i32
    return %arg0, %c0_i32, %c0_i32_0 : i32, i32, i32
  }
}

module attributes {stable_mosaic.version = 11 : i64} {
  func.func @kernel(%arg0: i32, %arg1: memref<2x8x8x8xbf16, #tpu.memory_space<vmem>>, %arg2: memref<2x8x8x8xbf16, #tpu.memory_space<vmem>>, %arg3: memref<1x8xf32, #tpu.memory_space<vmem>>, %arg4: memref<1x8xf32, #tpu.memory_space<vmem>>, %arg5: memref<1x8xf32, #tpu.memory_space<vmem>>, %arg6: memref<1x8xf32, #tpu.memory_space<vmem>>, %arg7: memref<2x8x8x8xf32, #tpu.memory_space<vmem>>) attributes {dimension_semantics = [#tpu.dimension_semantics<parallel>], iteration_bounds = array<i64: 1>, scalar_prefetch = 0 : i64, scratch_operands = 0 : i64, tpu.core_type = #tpu.core_type<tc>, window_params = [{transform_indices = @transform_0, window_bounds = array<i64: 2, 8, 8, 8>}, {transform_indices = @transform_1, window_bounds = array<i64: 2, 8, 8, 8>}, {pipeline_mode = #tpu.pipeline_mode<synchronous>, transform_indices = @transform_2, window_bounds = array<i64: 1, 8>}, {pipeline_mode = #tpu.pipeline_mode<synchronous>, transform_indices = @transform_3, window_bounds = array<i64: 1, 8>}, {pipeline_mode = #tpu.pipeline_mode<synchronous>, transform_indices = @transform_4, window_bounds = array<i64: 1, 8>}, {pipeline_mode = #tpu.pipeline_mode<synchronous>, transform_indices = @transform_5, window_bounds = array<i64: 1, 8>}, {transform_indices = @transform_6, window_bounds = array<i64: 2, 8, 8, 8>}]} {
    %c0 = arith.constant 0 : index
    %c0_0 = arith.constant 0 : index
    %0 = vector.load %arg3[%c0, %c0_0] : memref<1x8xf32, #tpu.memory_space<vmem>>, vector<1x8xf32>
    %1 = vector.shape_cast %0 : vector<1x8xf32> to vector<1x1x1x8xf32>
    %c0_1 = arith.constant 0 : index
    %c0_2 = arith.constant 0 : index
    %2 = vector.load %arg4[%c0_1, %c0_2] : memref<1x8xf32, #tpu.memory_space<vmem>>, vector<1x8xf32>
    %3 = vector.shape_cast %2 : vector<1x8xf32> to vector<1x1x1x8xf32>
    %c0_3 = arith.constant 0 : index
    %c0_4 = arith.constant 0 : index
    %4 = vector.load %arg5[%c0_3, %c0_4] : memref<1x8xf32, #tpu.memory_space<vmem>>, vector<1x8xf32>
    %5 = vector.shape_cast %4 : vector<1x8xf32> to vector<1x1x1x8xf32>
    %c0_5 = arith.constant 0 : index
    %c0_6 = arith.constant 0 : index
    %6 = vector.load %arg6[%c0_5, %c0_6] : memref<1x8xf32, #tpu.memory_space<vmem>>, vector<1x8xf32>
    %7 = vector.shape_cast %6 : vector<1x8xf32> to vector<1x1x1x8xf32>
    %c0_7 = arith.constant 0 : index
    %c0_8 = arith.constant 0 : index
    %c0_9 = arith.constant 0 : index
    %c0_10 = arith.constant 0 : index
    %8 = vector.load %arg1[%c0_7, %c0_8, %c0_9, %c0_10] : memref<2x8x8x8xbf16, #tpu.memory_space<vmem>>, vector<2x8x8x8xbf16>
    %9 = arith.extf %8 : vector<2x8x8x8xbf16> to vector<2x8x8x8xf32>
    %10 = vector.broadcast %1 : vector<1x1x1x8xf32> to vector<2x8x8x8xf32>
    %11 = arith.mulf %9, %10 : vector<2x8x8x8xf32>
    %12 = vector.broadcast %3 : vector<1x1x1x8xf32> to vector<2x8x8x8xf32>
    %13 = arith.addf %11, %12 : vector<2x8x8x8xf32>
    %c0_11 = arith.constant 0 : index
    %c0_12 = arith.constant 0 : index
    %c0_13 = arith.constant 0 : index
    %c0_14 = arith.constant 0 : index
    %14 = vector.load %arg2[%c0_11, %c0_12, %c0_13, %c0_14] : memref<2x8x8x8xbf16, #tpu.memory_space<vmem>>, vector<2x8x8x8xbf16>
    %15 = arith.extf %14 : vector<2x8x8x8xbf16> to vector<2x8x8x8xf32>
    %16 = vector.broadcast %5 : vector<1x1x1x8xf32> to vector<2x8x8x8xf32>
    %17 = arith.mulf %15, %16 : vector<2x8x8x8xf32>
    %18 = arith.addf %13, %17 : vector<2x8x8x8xf32>
    %19 = vector.broadcast %7 : vector<1x1x1x8xf32> to vector<2x8x8x8xf32>
    %20 = arith.addf %18, %19 : vector<2x8x8x8xf32>
    %cst = arith.constant 0.000000e+00 : f32
    %21 = vector.broadcast %cst : f32 to vector<2x8x8x8xf32>
    %22 = arith.maximumf %20, %21 : vector<2x8x8x8xf32>
    %c0_15 = arith.constant 0 : index
    %c0_16 = arith.constant 0 : index
    %c0_17 = arith.constant 0 : index
    %c0_18 = arith.constant 0 : index
    %23 = vector.load %arg7[%c0_15, %c0_16, %c0_17, %c0_18] : memref<2x8x8x8xf32, #tpu.memory_space<vmem>>, vector<2x8x8x8xf32>
    tpu.vector_store %arg7[%c0_15, %c0_16, %c0_17, %c0_18], %22 {strides = array<i32>} : memref<2x8x8x8xf32, #tpu.memory_space<vmem>>, vector<2x8x8x8xf32>,
    return
  }
  func.func @transform_0(%arg0: i32) -> (i32, i32, i32, i32) {
    %c0_i32 = arith.constant 0 : i32
    %c0_i32_0 = arith.constant 0 : i32
    %c0_i32_1 = arith.constant 0 : i32
    %c0_i32_2 = arith.constant 0 : i32
    return %arg0, %c0_i32, %c0_i32_0, %c0_i32_1 : i32, i32, i32, i32
  }
  func.func @transform_1(%arg0: i32) -> (i32, i32, i32, i32) {
    %c0_i32 = arith.constant 0 : i32
    %c0_i32_0 = arith.constant 0 : i32
    %c0_i32_1 = arith.constant 0 : i32
    %c0_i32_2 = arith.constant 0 : i32
    return %arg0, %c0_i32, %c0_i32_0, %c0_i32_1 : i32, i32, i32, i32
  }
  func.func @transform_2(%arg0: i32) -> (i32, i32) {
    %c0_i32 = arith.constant 0 : i32
    %c0_i32_0 = arith.constant 0 : i32
    %c0_i32_1 = arith.constant 0 : i32
    return %c0_i32, %c0_i32_0 : i32, i32
  }
  func.func @transform_3(%arg0: i32) -> (i32, i32) {
    %c0_i32 = arith.constant 0 : i32
    %c0_i32_0 = arith.constant 0 : i32
    %c0_i32_1 = arith.constant 0 : i32
    return %c0_i32, %c0_i32_0 : i32, i32
  }
  func.func @transform_4(%arg0: i32) -> (i32, i32) {
    %c0_i32 = arith.constant 0 : i32
    %c0_i32_0 = arith.constant 0 : i32
    %c0_i32_1 = arith.constant 0 : i32
    return %c0_i32, %c0_i32_0 : i32, i32
  }
  func.func @transform_5(%arg0: i32) -> (i32, i32) {
    %c0_i32 = arith.constant 0 : i32
    %c0_i32_0 = arith.constant 0 : i32
    %c0_i32_1 = arith.constant 0 : i32
    return %c0_i32, %c0_i32_0 : i32, i32
  }
  func.func @transform_6(%arg0: i32) -> (i32, i32, i32, i32) {
    %c0_i32 = arith.constant 0 : i32
    %c0_i32_0 = arith.constant 0 : i32
    %c0_i32_1 = arith.constant 0 : i32
    %c0_i32_2 = arith.constant 0 : i32
    return %arg0, %c0_i32, %c0_i32_0, %c0_i32_1 : i32, i32, i32, i32
  }
}

</mosaic_0001>

<bundles_post_ra>
// kernel: _lambda_.6
= control target key start
LH: loop header
LB: loop body
LE: loop exit
PB: predicated region body
PF: predicated region fallthrough
CT: control target
= control target key end

     0   :  { %vm96_vm0 = vcmask 1041408   ;;  %vm71_vm1 = vcmask 31744   ;;  %vm165_vm2 = vcmask 60416   ;;  %vm182_vm3 = vcmask 64512   ;;  %s527_s1 = inlined_call_operand.vmem [shape: bf16[4,8], index: 1, kind: input, shape index: {}]   ;;  %s528_s0 = inlined_call_operand.vmem [shape: bf16[2,8,8,4], index: 0, kind: input, shape index: {}]   ;;  %s529_s2 = inlined_call_operand.vmem [shape: bf16[2,8,8,8], index: 2, kind: output, shape index: {0}]   ;;  %s530_s3 = inlined_call_operand.vmem [shape: f32[1,2,8], index: 3, kind: output, shape index: {1}]  }
   0x1   :  { %v30_v0 = vld [vmem:[%s527_s1] sm:$0x3]  ;;  %v326_v3 = vld [vmem:[%s528_s0 + $0x10] sm:$0xff]  ;;  %v325_v6 = vld [vmem:[%s528_s0 + $0x8] sm:$0xff]  ;;  %vm220_vm4 = vcmask 57344  }
   0x2   :  { %v98_v1 = vsel %vm96_vm0, %v30_v0, 0  ;;  %v324_v2 = vld [vmem:[%s528_s0] sm:$0xff]  ;;  %v330_v5 = vld [vmem:[%s528_s0 + $0x30] sm:$0xff]  ;;  %v327_v7 = vld [vmem:[%s528_s0 + $0x18] sm:$0xff] }
   0x3   :  { %107 = vmatpush.bf16.msra.mxu0 %v98_v1  ;;  %332 = vmatpush.bf16.msra.mxu1 %v98_v1  ;;  %v328_v4 = vld [vmem:[%s528_s0 + $0x20] sm:$0xff]  ;;  %v329_v8 = vld [vmem:[%s528_s0 + $0x28] sm:$0xff]  ;;  %v331_v9 = vld [vmem:[%s528_s0 + $0x38] sm:$0xff] }
   0x4   :  { %333 = vmatpush.bf16.msra.mxu2 %v98_v1  ;;  %334 = vmatpush.bf16.msra.mxu3 %v98_v1 }
   0x6   :  { %316 = vmatmul.msk.bf16.vlgmr.msra.gmra.mxu0 %vm71_vm1, %v324_v2  ;;  %318 = vmatmul.msk.bf16.vlgmr.msra.gmra.mxu1 %vm71_vm1, %v326_v3 }
   0x7   :  { %320 = vmatmul.msk.bf16.vlgmr.msra.gmra.mxu2 %vm71_vm1, %v328_v4  ;;  %322 = vmatmul.msk.bf16.vlgmr.msra.gmra.mxu3 %vm71_vm1, %v330_v5 }
  0x16   :  { %317 = vmatmul.msk.bf16.gmra.mxu0 %vm71_vm1, %v325_v6  ;;  %319 = vmatmul.msk.bf16.gmra.mxu1 %vm71_vm1, %v327_v7 }
  0x17   :  { %321 = vmatmul.msk.bf16.gmra.mxu2 %vm71_vm1, %v329_v8  ;;  %323 = vmatmul.msk.bf16.gmra.mxu3 %vm71_vm1, %v331_v9 }
  0x83   :  { %v109_v10 = vpop.f32.mrf.mxu0  ;;  %v119_v11 = vpop.f32.mrf.mxu1 }
  0x84   :  { %v149_v12 = vpack.c.bf16 %v109_v10, %v109_v10  ;;  %v153_v13 = vpack.c.bf16 %v119_v11, %v119_v11  ;;  %v222_v31 = vmul.f32 %v109_v10, %v109_v10  ;;  %v183_v34 = vsel %vm182_vm3, %v109_v10, 0.0 }
  0x85   :  { %v226_v39 = vmul.f32 %v119_v11, %v119_v11  ;;  %v190_v55 = vsel %vm182_vm3, %v119_v11, 0.0 }
  0x86   :  { %166 = vst.msk [vmem:[%s529_s2] sm:$0xf] %vm165_vm2, %v149_v12  ;;  %v238_v38 = vsel %vm182_vm3, %v222_v31, 0.0 }
  0x87   :  { %170 = vst.msk [vmem:[%s529_s2 + $0x10] sm:$0xf] %vm165_vm2, %v153_v13  ;;  %v245_v60 = vsel %vm182_vm3, %v226_v39, 0.0 }
  0x8a   :  { %v398_v14 = vpop.f32.mrf.mxu2  ;;  %v400_v15 = vpop.f32.mrf.mxu3 }
  0x8b   :  { %v111_v16 = vpop.f32.mrf.mxu0  ;;  %v121_v17 = vpop.f32.mrf.mxu1  ;;  %v157_v18 = vpack.c.bf16 %v398_v14, %v398_v14  ;;  %v161_v21 = vpack.c.bf16 %v400_v15, %v400_v15  ;;  %v230_v9 = vmul.f32 %v398_v14, %v398_v14 }
  0x8c   :  { %v150_v19 = vpack.c.bf16 %v111_v16, %v111_v16  ;;  %v154_v20 = vpack.c.bf16 %v121_v17, %v121_v17  ;;  %v223_v27 = vmul.f32 %v111_v16, %v111_v16  ;;  %v184_v32 = vsel %vm182_vm3, %v111_v16, 0.0 }
  0x8d   :  { %174 = vst.msk [vmem:[%s529_s2 + $0x20] sm:$0xf] %vm165_vm2, %v157_v18  ;;  %v185_v37 = vadd.f32 %v184_v32, %v183_v34  ;;  %v227_v56 = vmul.f32 %v121_v17, %v121_v17  ;;  %v192_v61 = vsel %vm182_vm3, %v121_v17, 0.0  ;;  %v198_v17 = vsel %vm182_vm3, %v398_v14, 0.0 }
  0x8e   :  { %167 = vst.msk [vmem:[%s529_s2 + $0x4] sm:$0xf] %vm165_vm2, %v150_v19  ;;  %v239_v35 = vsel %vm182_vm3, %v223_v27, 0.0 }
  0x8f   :  { %171 = vst.msk [vmem:[%s529_s2 + $0x14] sm:$0xf] %vm165_vm2, %v154_v20  ;;  %v240_v43 = vadd.f32 %v239_v35, %v238_v38  ;;  %v247_v1 = vsel %vm182_vm3, %v227_v56, 0.0 }
  0x90   :  { %178 = vst.msk [vmem:[%s529_s2 + $0x30] sm:$0xf] %vm165_vm2, %v161_v21 }
  0x92   :  { %v422_v22 = vpop.f32.mrf.mxu2  ;;  %v424_v23 = vpop.f32.mrf.mxu3 }
  0x93   :  { %v114_v24 = vpop.f32.mrf.mxu0  ;;  %v124_v25 = vpop.f32.mrf.mxu1  ;;  %v158_v26 = vpack.c.bf16 %v422_v22, %v422_v22  ;;  %v162_v30 = vpack.c.bf16 %v424_v23, %v424_v23  ;;  %v231_v18 = vmul.f32 %v422_v22, %v422_v22  ;;  %v235_v38 = vmul.f32 %v424_v23, %v424_v23 }
  0x94   :  { %v151_v28 = vpack.c.bf16 %v114_v24, %v114_v24  ;;  %v155_v29 = vpack.c.bf16 %v124_v25, %v124_v25  ;;  %v224_v33 = vmul.f32 %v114_v24, %v114_v24  ;;  %v186_v36 = vsel %vm182_vm3, %v114_v24, 0.0 }
  0x95   :  { %175 = vst.msk [vmem:[%s529_s2 + $0x24] sm:$0xf] %vm165_vm2, %v158_v26  ;;  %v187_v44 = vadd.f32 %v186_v36, %v185_v37  ;;  %v228_v62 = vmul.f32 %v124_v25, %v124_v25  ;;  %v194_v2 = vsel %vm182_vm3, %v124_v25, 0.0  ;;  %v253_v24 = vsel %vm182_vm3, %v230_v9, 0.0 }
  0x96   :  { %168 = vst.msk [vmem:[%s529_s2 + $0x8] sm:$0xf] %vm165_vm2, %v151_v28  ;;  %v241_v40 = vsel %vm182_vm3, %v224_v33, 0.0  ;;  %v200_v25 = vsel %vm182_vm3, %v422_v22, 0.0  ;;  %v255_v28 = vsel %vm182_vm3, %v231_v18, 0.0  ;;  %v234_v33 = vmul.f32 %v400_v15, %v400_v15 }
  0x97   :  { %172 = vst.msk [vmem:[%s529_s2 + $0x18] sm:$0xf] %vm165_vm2, %v155_v29  ;;  %v242_v53 = vadd.f32 %v241_v40, %v240_v43  ;;  %v249_v10 = vsel %vm182_vm3, %v228_v62, 0.0  ;;  %v206_v22 = vsel %vm182_vm3, %v400_v15, 0.0 }
  0x98   :  { %179 = vst.msk [vmem:[%s529_s2 + $0x34] sm:$0xf] %vm165_vm2, %v162_v30  ;;  %v261_v43 = vsel %vm182_vm3, %v234_v33, 0.0 }
  0x9a   :  { %v134_v41 = vpop.f32.mrf.mxu2  ;;  %v452_v42 = vpop.f32.mrf.mxu3 }
  0x9b   :  { %v116_v45 = vpop.f32.mrf.mxu0  ;;  %v126_v46 = vpop.f32.mrf.mxu1  ;;  %v159_v47 = vpack.c.bf16 %v134_v41, %v134_v41  ;;  %v163_v48 = vpack.c.bf16 %v452_v42, %v452_v42  ;;  %v232_v26 = vmul.f32 %v134_v41, %v134_v41  ;;  %v202_v29 = vsel %vm182_vm3, %v134_v41, 0.0 }
  0x9c   :  { %v152_v49 = vpack.c.bf16 %v116_v45, %v116_v45  ;;  %v188_v50 = vsel %vm182_vm3, %v116_v45, 0.0  ;;  %v225_v51 = vmul.f32 %v116_v45, %v116_v45  ;;  %v156_v52 = vpack.c.bf16 %v126_v46, %v126_v46 }
  0x9d   :  { %v189_v54 = vadd.f32 %v188_v50, %v187_v44  ;;  %176 = vst.msk [vmem:[%s529_s2 + $0x28] sm:$0xf] %vm165_vm2, %v159_v47  ;;  %v229_v3 = vmul.f32 %v126_v46, %v126_v46  ;;  %v196_v11 = vsel %vm182_vm3, %v126_v46, 0.0  ;;  %v257_v34 = vsel %vm182_vm3, %v232_v26, 0.0 }
  0x9e   :  { %169 = vst.msk [vmem:[%s529_s2 + $0xc] sm:$0xf] %vm165_vm2, %v152_v49  ;;  %v243_v57 = vsel %vm182_vm3, %v225_v51, 0.0  ;;  %v208_v44 = vsel %vm182_vm3, %v424_v23, 0.0  ;;  %v236_v45 = vmul.f32 %v452_v42, %v452_v42  ;;  %v210_v15 = vsel %vm182_vm3, %v452_v42, 0.0 }
  0x9f   :  { %v191_v58 = vadd.f32 %v190_v55, %v189_v54  ;;  %v244_v59 = vadd.f32 %v243_v57, %v242_v53  ;;  %173 = vst.msk [vmem:[%s529_s2 + $0x1c] sm:$0xf] %vm165_vm2, %v156_v52  ;;  %v251_v19 = vsel %vm182_vm3, %v229_v3, 0.0 }
  0xa0   :  { %180 = vst.msk [vmem:[%s529_s2 + $0x38] sm:$0xf] %vm165_vm2, %v163_v48  ;;  %v263_v48 = vsel %vm182_vm3, %v235_v38, 0.0  ;;  %v265_v52 = vsel %vm182_vm3, %v236_v45, 0.0 }
  0xa1   :  { %v246_v63 = vadd.f32 %v245_v60, %v244_v59  ;;  %v193_v0 = vadd.f32 %v192_v61, %v191_v58 }
  0xa2   :  { %v136_v4 = vpop.f32.mrf.mxu2  ;;  %v146_v5 = vpop.f32.mrf.mxu3 }
  0xa3   :  { %v195_v6 = vadd.f32 %v194_v2, %v193_v0  ;;  %v248_v7 = vadd.f32 %v247_v1, %v246_v63  ;;  %v160_v8 = vpack.c.bf16 %v136_v4, %v136_v4  ;;  %v164_v12 = vpack.c.bf16 %v146_v5, %v146_v5 }
  0xa4   :  { %v233_v30 = vmul.f32 %v136_v4, %v136_v4  ;;  %v204_v35 = vsel %vm182_vm3, %v136_v4, 0.0  ;;  %v237_v49 = vmul.f32 %v146_v5, %v146_v5  ;;  %v212_v53 = vsel %vm182_vm3, %v146_v5, 0.0 }
  0xa5   :  { %v197_v13 = vadd.f32 %v196_v11, %v195_v6  ;;  %v250_v16 = vadd.f32 %v249_v10, %v248_v7  ;;  %177 = vst.msk [vmem:[%s529_s2 + $0x2c] sm:$0xf] %vm165_vm2, %v160_v8 }
  0xa6   :  { %181 = vst.msk [vmem:[%s529_s2 + $0x3c] sm:$0xf] %vm165_vm2, %v164_v12  ;;  %v259_v39 = vsel %vm182_vm3, %v233_v30, 0.0  ;;  %v267_v23 = vsel %vm182_vm3, %v237_v49, 0.0 }
  0xa7   :  { %v199_v20 = vadd.f32 %v198_v17, %v197_v13  ;;  %v252_v21 = vadd.f32 %v251_v19, %v250_v16 }
  0xa9   :  { %v254_v27 = vadd.f32 %v253_v24, %v252_v21  ;;  %v201_v14 = vadd.f32 %v200_v25, %v199_v20 }
  0xab   :  { %v203_v31 = vadd.f32 %v202_v29, %v201_v14  ;;  %v256_v32 = vadd.f32 %v255_v28, %v254_v27 }
  0xad   :  { %v258_v36 = vadd.f32 %v257_v34, %v256_v32  ;;  %v205_v37 = vadd.f32 %v204_v35, %v203_v31 }
  0xaf   :  { %v207_v40 = vadd.f32 %v206_v22, %v205_v37  ;;  %v260_v41 = vadd.f32 %v259_v39, %v258_v36 }
  0xb1   :  { %v262_v46 = vadd.f32 %v261_v43, %v260_v41  ;;  %v209_v47 = vadd.f32 %v208_v44, %v207_v40 }
  0xb3   :  { %v211_v50 = vadd.f32 %v210_v15, %v209_v47  ;;  %v264_v51 = vadd.f32 %v263_v48, %v262_v46 }
  0xb5   :  { %v266_v54 = vadd.f32 %v265_v52, %v264_v51  ;;  %v213_v55 = vadd.f32 %v212_v53, %v211_v50 }
  0xb7   :  { %v214_v56 = vrot.slane %v213_v55, 4  ;;  %v268_v57 = vadd.f32 %v267_v23, %v266_v54 }
  0xb9   :  { %v215_v58 = vadd.f32 %v214_v56, %v213_v55  ;;  %v269_v59 = vrot.slane %v268_v57, 4 }
  0xbb   :  { %v216_v60 = vrot.slane %v215_v58, 2  ;;  %v270_v61 = vadd.f32 %v269_v59, %v268_v57 }
  0xbd   :  { %v217_v62 = vadd.f32 %v216_v60, %v215_v58  ;;  %v271_v63 = vrot.slane %v270_v61, 2 }
  0xbf   :  { %v218_v42 = vrot.slane %v217_v62, 1  ;;  %v272_v0 = vadd.f32 %v271_v63, %v270_v61 }
  0xc1   :  { %v219_v1 = vadd.f32 %v218_v42, %v217_v62  ;;  %v273_v2 = vrot.slane %v272_v0, 1 }
  0xc3   :  { %221 = vst.msk [vmem:[%s530_s3] sm:$0x1] %vm220_vm4, %v219_v1  ;;  %v274_v3 = vadd.f32 %v273_v2, %v272_v0 }
  0xc5   :  { %275 = vst.msk [vmem:[%s530_s3 + $0x1] sm:$0x1] %vm220_vm4, %v274_v3 }

// kernel: _lambda_.7
= control target key start
LH: loop header
LB: loop body
LE: loop exit
PB: predicated region body
PF: predicated region fallthrough
CT: control target
= control target key end

     0   :  { %vm199_vm0 = vcmask 64512   ;;  %s533_s0 = inlined_call_operand.vmem [shape: bf16[2,8,8,8], index: 0, kind: input, shape index: {}]   ;;  %s534_s1 = inlined_call_operand.vmem [shape: bf16[2,8,8,8], index: 1, kind: input, shape index: {}]   ;;  %s535_s2 = inlined_call_operand.vmem [shape: f32[1,8], index: 2, kind: input, shape index: {}]   ;;  %s536_s3 = inlined_call_operand.vmem [shape: f32[1,8], index: 3, kind: input, shape index: {}]   ;;  %s537_s4 = inlined_call_operand.vmem [shape: f32[1,8], index: 4, kind: input, shape index: {}]   ;;  %s538_s5 = inlined_call_operand.vmem [shape: f32[1,8], index: 5, kind: input, shape index: {}]   ;;  %s539_s6 = inlined_call_operand.vmem [shape: f32[2,8,8,8], index: 6, kind: output, shape index: {}]  }
   0x1   :  { %v221_v0 = vld [vmem:[%s533_s0] sm:$0xff]   ;;  %v284_v9 = vld [vmem:[%s533_s0 + $0x8] sm:$0xff]   ;;  %v285_v15 = vld [vmem:[%s533_s0 + $0x10] sm:$0xff]  }
   0x2   :  { %v343_v1 = vld [vmem:[%s535_s2] ss:$0 sm:$0xff]  ;;  %v222_v2 = vunpack.c.l.bf16 %v221_v0  ;;  %v223_v6 = vunpack.c.h.bf16 %v221_v0  ;;  %v291_v10 = vld [vmem:[%s534_s1 + $0x8] sm:$0xff]   ;;  %v226_v13 = vunpack.c.l.bf16 %v284_v9  ;;  %v292_v16 = vld [vmem:[%s534_s1 + $0x10] sm:$0xff]   ;;  %v227_v19 = vunpack.c.h.bf16 %v284_v9 }
   0x3   :  { %v348_v3 = vld [vmem:[%s536_s3] ss:$0 sm:$0xff]  ;;  %v258_v14 = vunpack.c.l.bf16 %v291_v10  ;;  %v259_v20 = vunpack.c.h.bf16 %v291_v10  ;;  %v230_v28 = vunpack.c.l.bf16 %v285_v15  ;;  %v262_v29 = vunpack.c.l.bf16 %v292_v16  ;;  %v286_v34 = vld [vmem:[%s533_s0 + $0x18] sm:$0xff]   ;;  %v288_v9 = vld [vmem:[%s533_s0 + $0x28] sm:$0xff]  }
   0x4   :  { %v253_v4 = vld [vmem:[%s534_s1] sm:$0xff]   ;;  %v62_v11 = vmul.f32 %v343_v1, %v222_v2  ;;  %v63_v12 = vmul.f32 %v343_v1, %v223_v6  ;;  %v64_v24 = vmul.f32 %v343_v1, %v226_v13  ;;  %v65_v26 = vmul.f32 %v343_v1, %v227_v19  ;;  %v293_v43 = vld [vmem:[%s534_s1 + $0x18] sm:$0xff]  }
   0x5   :  { %v356_v5 = vld [vmem:[%s537_s4] ss:$0 sm:$0xff]  ;;  %v254_v7 = vunpack.c.l.bf16 %v253_v4  ;;  %v255_v8 = vunpack.c.h.bf16 %v253_v4  ;;  %v231_v33 = vunpack.c.h.bf16 %v285_v15  ;;  %v66_v36 = vmul.f32 %v343_v1, %v230_v28  ;;  %v289_v28 = vld [vmem:[%s533_s0 + $0x30] sm:$0xff]  }
   0x6   :  { %v81_v21 = vadd.f32 %v348_v3, %v62_v11  ;;  %v378_v22 = vld [vmem:[%s538_s5] ss:$0 sm:$0xff]  ;;  %v82_v23 = vadd.f32 %v348_v3, %v63_v12  ;;  %v134_v25 = vmul.f32 %v356_v5, %v258_v14  ;;  %v135_v27 = vmul.f32 %v356_v5, %v259_v20  ;;  %v295_v14 = vld [vmem:[%s534_s1 + $0x28] sm:$0xff]  }
   0x7   :  { %v132_v17 = vmul.f32 %v356_v5, %v254_v7  ;;  %v133_v18 = vmul.f32 %v356_v5, %v255_v8  ;;  %v83_v32 = vadd.f32 %v348_v3, %v64_v24  ;;  %v84_v35 = vadd.f32 %v348_v3, %v65_v26  ;;  %v287_v56 = vld [vmem:[%s533_s0 + $0x20] sm:$0xff]  }
   0x8   :  { %v136_v37 = vmul.f32 %v356_v5, %v262_v29  ;;  %v263_v38 = vunpack.c.h.bf16 %v292_v16  ;;  %v67_v42 = vmul.f32 %v343_v1, %v231_v33  ;;  %v85_v45 = vadd.f32 %v348_v3, %v66_v36  ;;  %v294_v61 = vld [vmem:[%s534_s1 + $0x20] sm:$0xff]   ;;  %v296_v33 = vld [vmem:[%s534_s1 + $0x30] sm:$0xff]  }
   0x9   :  { %v148_v30 = vadd.f32 %v132_v17, %v81_v21  ;;  %v149_v31 = vadd.f32 %v133_v18, %v82_v23  ;;  %v150_v41 = vadd.f32 %v134_v25, %v83_v32  ;;  %v151_v44 = vadd.f32 %v135_v27, %v84_v35 }
   0xa   :  { %v137_v46 = vmul.f32 %v356_v5, %v263_v38  ;;  %v234_v47 = vunpack.c.l.bf16 %v286_v34  ;;  %v86_v51 = vadd.f32 %v348_v3, %v67_v42  ;;  %v152_v53 = vadd.f32 %v136_v37, %v85_v45 }
   0xb   :  { %v167_v39 = vadd.f32 %v378_v22, %v148_v30  ;;  %v168_v40 = vadd.f32 %v378_v22, %v149_v31  ;;  %v169_v50 = vadd.f32 %v378_v22, %v150_v41  ;;  %v170_v52 = vadd.f32 %v378_v22, %v151_v44 }
   0xc   :  { %v68_v54 = vmul.f32 %v343_v1, %v234_v47  ;;  %v266_v55 = vunpack.c.l.bf16 %v293_v43  ;;  %v153_v58 = vadd.f32 %v137_v46, %v86_v51  ;;  %v235_v59 = vunpack.c.h.bf16 %v286_v34  ;;  %v297_v51 = vld [vmem:[%s534_s1 + $0x38] sm:$0xff]  }
   0xd   :  { %v183_v48 = vmax.f32 %v167_v39, 0.0  ;;  %v184_v49 = vmax.f32 %v168_v40, 0.0  ;;  %v185_v57 = vmax.f32 %v169_v50, 0.0  ;;  %v267_v60 = vunpack.c.h.bf16 %v293_v43  ;;  %v290_v50 = vld [vmem:[%s533_s0 + $0x38] sm:$0xff]  }
   0xe   :  { %v186_v62 = vmax.f32 %v170_v52, 0.0  ;;  %v171_v63 = vadd.f32 %v378_v22, %v152_v53  ;;  %v87_v0 = vadd.f32 %v348_v3, %v68_v54  ;;  %v138_v2 = vmul.f32 %v356_v5, %v266_v55 }
   0xf   :  { %200 = vst.msk [vmem:[%s539_s6] sm:$0xff] %vm199_vm0, %v183_v48  ;;  %v172_v4 = vadd.f32 %v378_v22, %v153_v58  ;;  %v69_v6 = vmul.f32 %v343_v1, %v235_v59  ;;  %v139_v7 = vmul.f32 %v356_v5, %v267_v60  ;;  %v238_v8 = vunpack.c.l.bf16 %v287_v56 }
  0x10   :  { %201 = vst.msk [vmem:[%s539_s6 + $0x8] sm:$0xff] %vm199_vm0, %v184_v49  ;;  %v187_v10 = vmax.f32 %v171_v63, 0.0  ;;  %v154_v11 = vadd.f32 %v138_v2, %v87_v0  ;;  %v270_v12 = vunpack.c.l.bf16 %v294_v61  ;;  %v239_v13 = vunpack.c.h.bf16 %v287_v56 }
  0x11   :  { %202 = vst.msk [vmem:[%s539_s6 + $0x10] sm:$0xff] %vm199_vm0, %v185_v57  ;;  %v188_v15 = vmax.f32 %v172_v4, 0.0  ;;  %v88_v16 = vadd.f32 %v348_v3, %v69_v6  ;;  %v70_v17 = vmul.f32 %v343_v1, %v238_v8  ;;  %v271_v18 = vunpack.c.h.bf16 %v294_v61 }
  0x12   :  { %203 = vst.msk [vmem:[%s539_s6 + $0x18] sm:$0xff] %vm199_vm0, %v186_v62  ;;  %v173_v19 = vadd.f32 %v378_v22, %v154_v11  ;;  %v140_v20 = vmul.f32 %v356_v5, %v270_v12  ;;  %v71_v21 = vmul.f32 %v343_v1, %v239_v13  ;;  %v242_v23 = vunpack.c.l.bf16 %v288_v9 }
  0x13   :  { %204 = vst.msk [vmem:[%s539_s6 + $0x20] sm:$0xff] %vm199_vm0, %v187_v10  ;;  %v155_v24 = vadd.f32 %v139_v7, %v88_v16  ;;  %v89_v25 = vadd.f32 %v348_v3, %v70_v17  ;;  %v141_v26 = vmul.f32 %v356_v5, %v271_v18  ;;  %v274_v27 = vunpack.c.l.bf16 %v295_v14 }
  0x14   :  { %205 = vst.msk [vmem:[%s539_s6 + $0x28] sm:$0xff] %vm199_vm0, %v188_v15  ;;  %v189_v29 = vmax.f32 %v173_v19, 0.0  ;;  %v90_v30 = vadd.f32 %v348_v3, %v71_v21  ;;  %v72_v31 = vmul.f32 %v343_v1, %v242_v23  ;;  %v243_v32 = vunpack.c.h.bf16 %v288_v9 }
  0x15   :  { %v174_v34 = vadd.f32 %v378_v22, %v155_v24  ;;  %v156_v35 = vadd.f32 %v140_v20, %v89_v25  ;;  %v142_v36 = vmul.f32 %v356_v5, %v274_v27  ;;  %v275_v37 = vunpack.c.h.bf16 %v295_v14 }
  0x16   :  { %206 = vst.msk [vmem:[%s539_s6 + $0x30] sm:$0xff] %vm199_vm0, %v189_v29  ;;  %v157_v38 = vadd.f32 %v141_v26, %v90_v30  ;;  %v91_v39 = vadd.f32 %v348_v3, %v72_v31  ;;  %v73_v40 = vmul.f32 %v343_v1, %v243_v32  ;;  %v246_v41 = vunpack.c.l.bf16 %v289_v28 }
  0x17   :  { %v190_v42 = vmax.f32 %v174_v34, 0.0  ;;  %v175_v43 = vadd.f32 %v378_v22, %v156_v35  ;;  %v143_v44 = vmul.f32 %v356_v5, %v275_v37  ;;  %v278_v45 = vunpack.c.l.bf16 %v296_v33 }
  0x18   :  { %v176_v46 = vadd.f32 %v378_v22, %v157_v38  ;;  %v158_v47 = vadd.f32 %v142_v36, %v91_v39  ;;  %v92_v48 = vadd.f32 %v348_v3, %v73_v40  ;;  %v74_v49 = vmul.f32 %v343_v1, %v246_v41 }
  0x19   :  { %207 = vst.msk [vmem:[%s539_s6 + $0x38] sm:$0xff] %vm199_vm0, %v190_v42  ;;  %v191_v52 = vmax.f32 %v175_v43, 0.0  ;;  %v144_v53 = vmul.f32 %v356_v5, %v278_v45  ;;  %v247_v54 = vunpack.c.h.bf16 %v289_v28  ;;  %v279_v55 = vunpack.c.h.bf16 %v296_v33 }
  0x1a   :  { %v192_v56 = vmax.f32 %v176_v46, 0.0  ;;  %v177_v57 = vadd.f32 %v378_v22, %v158_v47  ;;  %v159_v58 = vadd.f32 %v143_v44, %v92_v48  ;;  %v93_v59 = vadd.f32 %v348_v3, %v74_v49 }
  0x1b   :  { %208 = vst.msk [vmem:[%s539_s6 + $0x40] sm:$0xff] %vm199_vm0, %v191_v52  ;;  %v75_v60 = vmul.f32 %v343_v1, %v247_v54  ;;  %v145_v61 = vmul.f32 %v356_v5, %v279_v55  ;;  %v250_v62 = vunpack.c.l.bf16 %v290_v50  ;;  %v282_v63 = vunpack.c.l.bf16 %v297_v51 }
  0x1c   :  { %209 = vst.msk [vmem:[%s539_s6 + $0x48] sm:$0xff] %vm199_vm0, %v192_v56  ;;  %v193_v0 = vmax.f32 %v177_v57, 0.0  ;;  %v178_v2 = vadd.f32 %v378_v22, %v159_v58  ;;  %v160_v4 = vadd.f32 %v144_v53, %v93_v59  ;;  %v251_v6 = vunpack.c.h.bf16 %v290_v50 }
  0x1d   :  { %v94_v7 = vadd.f32 %v348_v3, %v75_v60  ;;  %v76_v8 = vmul.f32 %v343_v1, %v250_v62  ;;  %v146_v9 = vmul.f32 %v356_v5, %v282_v63  ;;  %v283_v10 = vunpack.c.h.bf16 %v297_v51 }
  0x1e   :  { %210 = vst.msk [vmem:[%s539_s6 + $0x50] sm:$0xff] %vm199_vm0, %v193_v0  ;;  %v194_v11 = vmax.f32 %v178_v2, 0.0  ;;  %v179_v12 = vadd.f32 %v378_v22, %v160_v4  ;;  %v77_v13 = vmul.f32 %v343_v1, %v251_v6 }
  0x1f   :  { %v161_v14 = vadd.f32 %v145_v61, %v94_v7  ;;  %v95_v15 = vadd.f32 %v348_v3, %v76_v8  ;;  %v147_v16 = vmul.f32 %v356_v5, %v283_v10 }
  0x20   :  { %211 = vst.msk [vmem:[%s539_s6 + $0x58] sm:$0xff] %vm199_vm0, %v194_v11  ;;  %v195_v17 = vmax.f32 %v179_v12, 0.0  ;;  %v96_v18 = vadd.f32 %v348_v3, %v77_v13 }
  0x21   :  { %v180_v19 = vadd.f32 %v378_v22, %v161_v14  ;;  %v162_v20 = vadd.f32 %v146_v9, %v95_v15 }
  0x22   :  { %212 = vst.msk [vmem:[%s539_s6 + $0x60] sm:$0xff] %vm199_vm0, %v195_v17  ;;  %v163_v1 = vadd.f32 %v147_v16, %v96_v18 }
  0x23   :  { %v196_v21 = vmax.f32 %v180_v19, 0.0  ;;  %v181_v5 = vadd.f32 %v378_v22, %v162_v20 }
  0x24   :  { %v182_v23 = vadd.f32 %v378_v22, %v163_v1 }
  0x25   :  { %213 = vst.msk [vmem:[%s539_s6 + $0x68] sm:$0xff] %vm199_vm0, %v196_v21  ;;  %v197_v3 = vmax.f32 %v181_v5, 0.0 }
  0x26   :  { %v198_v24 = vmax.f32 %v182_v23, 0.0 }
  0x27   :  { %214 = vst.msk [vmem:[%s539_s6 + $0x70] sm:$0xff] %vm199_vm0, %v197_v3 }
  0x28   :  { %215 = vst.msk [vmem:[%s539_s6 + $0x78] sm:$0xff] %vm199_vm0, %v198_v24 }

// kernel: _lambda_.4
= control target key start
LH: loop header
LB: loop body
LE: loop exit
PB: predicated region body
PF: predicated region fallthrough
CT: control target
= control target key end

     0   :  { %s1950_s24 = smov 4   ;;  %s1951_s25 = smov 8   ;;  %vm1220_vm0 = vcmask 64512   ;;  %vm1171_vm1 = vcmask 31744   ;;  %vm1253_vm2 = vcmask 97280   ;;  %vm1536_vm3 = vcmask 1041408   ;;  %s3106_s0 = inlined_call_operand.vmem [shape: bf16[2,36,9,4], index: 0, kind: input, shape index: {}]   ;;  %s3107_s1 = inlined_call_operand.vmem [shape: bf16[36,8], index: 1, kind: input, shape index: {}]   ;;  %s3108_s2 = inlined_call_operand.vmem [shape: bf16[2,8,8,8], index: 2, kind: output, shape index: {0}]   ;;  %s3109_s3 = inlined_call_operand.vmem [shape: f32[1,2,8], index: 3, kind: output, shape index: {1}]  }
   0x1   :  { %v1727_v0 = vld [vmem:[%s3106_s0 + $0x68] sm:$0xf]  ;;  %v1725_v1 = vld [vmem:[%s3106_s0 + $0x58] sm:$0xf]  ;;  %v1728_v6 = vld [vmem:[%s3106_s0 + $0x70] sm:$0xf] }
   0x2   :  { %v1723_v2 = vld [vmem:[%s3106_s0 + $0x48] sm:$0xf]  ;;  %v183_v3 = vunpack.c.l.b16 %v1727_v0  ;;  %v181_v4 = vunpack.c.l.b16 %v1725_v1  ;;  %v1726_v7 = vld [vmem:[%s3106_s0 + $0x60] sm:$0xf]  ;;  %v1724_v11 = vld [vmem:[%s3106_s0 + $0x50] sm:$0xf]  ;;  %v184_v12 = vunpack.c.l.b16 %v1728_v6 }
   0x3   :  { %v179_v5 = vunpack.c.l.b16 %v1723_v2  ;;  %v182_v13 = vunpack.c.l.b16 %v1726_v7  ;;  %v180_v14 = vunpack.c.l.b16 %v1724_v11  ;;  %v1731_v18 = vld [vmem:[%s3106_s0 + $0x168] sm:$0xf]  ;;  %v1730_v19 = vld [vmem:[%s3106_s0 + $0x80] sm:$0xf]  ;;  %v1729_v20 = vld [vmem:[%s3106_s0 + $0x78] sm:$0xf] }
   0x4   :  { %v199_v8 = vpack.c.b16 %v183_v3, %v183_v3  ;;  %v197_v9 = vpack.c.b16 %v181_v4, %v181_v4  ;;  %v200_v15 = vpack.c.b16 %v184_v12, %v184_v12  ;;  %v187_v21 = vunpack.c.l.b16 %v1731_v18  ;;  %v1734_v27 = vld [vmem:[%s3106_s0 + $0x180] sm:$0xf]  ;;  %v1733_v28 = vld [vmem:[%s3106_s0 + $0x178] sm:$0xf]  ;;  %v1732_v29 = vld [vmem:[%s3106_s0 + $0x170] sm:$0xf] }
   0x5   :  { %v195_v10 = vpack.c.b16 %v179_v5, %v179_v5  ;;  %v198_v16 = vpack.c.b16 %v182_v13, %v182_v13  ;;  %v196_v17 = vpack.c.b16 %v180_v14, %v180_v14  ;;  %v186_v22 = vunpack.c.l.b16 %v1730_v19  ;;  %v1737_v35 = vld [vmem:[%s3106_s0 + $0x198] sm:$0xf]  ;;  %v1736_v36 = vld [vmem:[%s3106_s0 + $0x190] sm:$0xf]  ;;  %v1841_v37 = vld [vmem:[%s3106_s0 + $0x8] sm:$0xf] }
   0x6   :  { %219 = vrot.lane.b32.xlu2 %v199_v8, %s1950_s24  ;;  %215 = vrot.lane.b32.xlu1 %v197_v9, %s1950_s24  ;;  %v185_v23 = vunpack.c.l.b16 %v1729_v20  ;;  %v203_v24 = vpack.c.b16 %v187_v21, %v187_v21  ;;  %v190_v30 = vunpack.c.l.b16 %v1734_v27  ;;  %v189_v31 = vunpack.c.l.b16 %v1733_v28  ;;  %v1916_v39 = vld [vmem:[%s3106_s0 + $0x8] sm:$0x10]  ;;  %v1837_v40 = vld [vmem:[%s3106_s0] sm:$0xf]  ;;  %s1952_s12 = smov 12   ;;  %s1953_s27 = smov 20  }
   0x7   :  { %211 = vrot.lane.b32.xlu0 %v195_v10, %s1950_s24  ;;  %v202_v25 = vpack.c.b16 %v186_v22, %v186_v22  ;;  %v188_v32 = vunpack.c.l.b16 %v1732_v29  ;;  %v1915_v41 = vld [vmem:[%s3106_s0] sm:$0x10]  ;;  %v1735_v42 = vld [vmem:[%s3106_s0 + $0x188] sm:$0xf]  ;;  %v193_v43 = vunpack.c.l.b16 %v1737_v35  ;;  %v192_v44 = vunpack.c.l.b16 %v1736_v36  ;;  %v1853_v48 = vld [vmem:[%s3106_s0 + $0x20] sm:$0xf] }
   0x8   :  { %v201_v26 = vpack.c.b16 %v185_v23, %v185_v23  ;;  %v206_v33 = vpack.c.b16 %v190_v30, %v190_v30  ;;  %v205_v34 = vpack.c.b16 %v189_v31, %v189_v31  ;;  %v1842_v45 = vor.u32 %v1916_v39, %v1841_v37  ;;  %v1919_v49 = vld [vmem:[%s3106_s0 + $0x20] sm:$0x10]  ;;  %v1849_v50 = vld [vmem:[%s3106_s0 + $0x18] sm:$0xf]  ;;  %v1918_v51 = vld [vmem:[%s3106_s0 + $0x18] sm:$0x10] }
   0x9   :  { %v204_v38 = vpack.c.b16 %v188_v32, %v188_v32  ;;  %v1838_v46 = vor.u32 %v1915_v41, %v1837_v40  ;;  %v191_v47 = vunpack.c.l.b16 %v1735_v42  ;;  %v209_v52 = vpack.c.b16 %v193_v43, %v193_v43  ;;  %v1738_v57 = vld [vmem:[%s3106_s0 + $0x1a0] sm:$0xf]  ;;  %v1845_v58 = vld [vmem:[%s3106_s0 + $0x10] sm:$0xf]  ;;  %v1917_v59 = vld [vmem:[%s3106_s0 + $0x10] sm:$0x10] }
   0xa   :  { %v208_v53 = vpack.c.b16 %v192_v44, %v192_v44  ;;  %v333_v54 = vshll.u32 %v1842_v45, 16  ;;  %v1854_v60 = vor.u32 %v1919_v49, %v1853_v48  ;;  %v1850_v61 = vor.u32 %v1918_v51, %v1849_v50  ;;  %v1857_v6 = vld [vmem:[%s3106_s0 + $0x28] sm:$0xf]  ;;  %v1920_v7 = vld [vmem:[%s3106_s0 + $0x28] sm:$0x10]  ;;  %s1954_s28 = smov 16  }
   0xb   :  { %v326_v55 = vshll.u32 %v1838_v46, 16  ;;  %v207_v56 = vpack.c.b16 %v191_v47, %v191_v47  ;;  %v331_v62 = vshrl.u32 %v1842_v45, 16  ;;  %v324_v0 = vshrl.u32 %v1838_v46, 16  ;;  %v1865_v8 = vld [vmem:[%s3106_s0 + $0x38] sm:$0xf]  ;;  %s1955_s9 = smov 24  }
   0xc   :  { %v335_v63 = vrot.slane %v333_v54, 1  ;;  %v194_v2 = vunpack.c.l.b16 %v1738_v57  ;;  %v1846_v3 = vor.u32 %v1917_v59, %v1845_v58  ;;  %v354_v4 = vshll.u32 %v1854_v60, 16  ;;  %v1922_v11 = vld [vmem:[%s3106_s0 + $0x38] sm:$0x10]  ;;  %v1861_v12 = vld [vmem:[%s3106_s0 + $0x30] sm:$0xf] }
   0xd   :  { %v328_v1 = vrot.slane %v326_v55, 1  ;;  %v347_v5 = vshll.u32 %v1850_v61, 16  ;;  %v1921_v13 = vld [vmem:[%s3106_s0 + $0x30] sm:$0x10]  ;;  %v352_v19 = vshrl.u32 %v1854_v60, 16  ;;  %v345_v21 = vshrl.u32 %v1850_v61, 16 }
   0xe   :  { %221 = vrot.lane.b32.xlu2 %v200_v15, %s1950_s24  ;;  %217 = vrot.lane.b32.xlu1 %v198_v16, %s1950_s24  ;;  %v336_v9 = vor.u32 %v335_v63, %v331_v62  ;;  %v210_v14 = vpack.c.b16 %v194_v2, %v194_v2  ;;  %v340_v15 = vshll.u32 %v1846_v3, 16  ;;  %v1858_v16 = vor.u32 %v1920_v7, %v1857_v6  ;;  %v1869_v30 = vld [vmem:[%s3106_s0 + $0x120] sm:$0xf]  ;;  %v1923_v31 = vld [vmem:[%s3106_s0 + $0x120] sm:$0x10]  ;;  %s1956_s20 = smov 32  }
   0xf   :  { %213 = vrot.lane.b32.xlu0 %v196_v17, %s1950_s24  ;;  %v329_v10 = vor.u32 %v328_v1, %v324_v0  ;;  %v1866_v17 = vor.u32 %v1922_v11, %v1865_v8  ;;  %v1862_v18 = vor.u32 %v1921_v13, %v1861_v12  ;;  %v356_v20 = vrot.slane %v354_v4, 1  ;;  %v1877_v32 = vld [vmem:[%s3106_s0 + $0x130] sm:$0xf]  ;;  %v1873_v35 = vld [vmem:[%s3106_s0 + $0x128] sm:$0xf]  ;;  %s1957_s21 = smov 28  }
  0x10   :  { %v349_v22 = vrot.slane %v347_v5, 1  ;;  %v338_v23 = vshrl.u32 %v1846_v3, 16  ;;  %v1924_v36 = vld [vmem:[%s3106_s0 + $0x128] sm:$0x10]  ;;  %v1870_v41 = vor.u32 %v1923_v31, %v1869_v30  ;;  %v359_v44 = vshrl.u32 %v1858_v16, 16 }
  0x11   :  { %v368_v27 = vshll.u32 %v1862_v18, 16  ;;  %v357_v28 = vor.u32 %v356_v20, %v352_v19  ;;  %v373_v37 = vshrl.u32 %v1866_v17, 16  ;;  %v366_v39 = vshrl.u32 %v1862_v18, 16  ;;  %v1889_v51 = vld [vmem:[%s3106_s0 + $0x148] sm:$0xf] }
  0x12   :  { %v350_v29 = vor.u32 %v349_v22, %v345_v21  ;;  %v1874_v43 = vor.u32 %v1924_v36, %v1873_v35  ;;  %v382_v48 = vshll.u32 %v1870_v41, 16  ;;  %v1885_v54 = vld [vmem:[%s3106_s0 + $0x140] sm:$0xf]  ;;  %v1927_v55 = vld [vmem:[%s3106_s0 + $0x140] sm:$0x10]  ;;  %v380_v0 = vshrl.u32 %v1870_v41, 16 }
  0x13   :  { %v370_v40 = vrot.slane %v368_v27, 1  ;;  %v1926_v57 = vld [vmem:[%s3106_s0 + $0x138] sm:$0x10]  ;;  %v1886_v63 = vor.u32 %v1927_v55, %v1885_v54  ;;  %v1893_v11 = vld [vmem:[%s3106_s0 + $0x150] sm:$0xf]  ;;  %vm1286_vm4 = vcmask 130048  }
  0x14   :  { %v389_v50 = vshll.u32 %v1874_v43, 16  ;;  %v387_v59 = vshrl.u32 %v1874_v43, 16  ;;  %v384_v1 = vrot.slane %v382_v48, 1  ;;  %v1929_v12 = vld [vmem:[%s3106_s0 + $0x150] sm:$0x10]  ;;  %vm1319_vm5 = vcmask 162816  }
  0x15   :  { %v371_v47 = vor.u32 %v370_v40, %v366_v39  ;;  %v410_v6 = vshll.u32 %v1886_v63, 16  ;;  %v1894_v20 = vor.u32 %v1929_v12, %v1893_v11  ;;  %v1742_v35 = vld [vmem:[%s3106_s0 + $0xa8] sm:$0xf]  ;;  %v1741_v36 = vld [vmem:[%s3106_s0 + $0xa0] sm:$0xf]  ;;  %vm1352_vm6 = vcmask 195584  }
  0x16   :  { %227 = vrot.lane.b32.xlu2 %v203_v24, %s1950_s24  ;;  %225 = vrot.lane.b32.xlu1 %v202_v25, %s1950_s24  ;;  %v342_v24 = vrot.slane %v340_v15, 1  ;;  %v361_v25 = vshll.u32 %v1858_v16, 16  ;;  %v391_v61 = vrot.slane %v389_v50, 1  ;;  %v385_v7 = vor.u32 %v384_v1, %v380_v0  ;;  %v1748_v54 = vld [vmem:[%s3106_s0 + $0x1b8] sm:$0xf] }
  0x17   :  { %223 = vrot.lane.b32.xlu0 %v201_v26, %s1950_s24  ;;  %v375_v26 = vshll.u32 %v1866_v17, 16  ;;  %v408_v15 = vshrl.u32 %v1886_v63, 16  ;;  %v412_v16 = vrot.slane %v410_v6, 1  ;;  %v422_v30 = vshrl.u32 %v1894_v20, 16  ;;  %v1747_v55 = vld [vmem:[%s3106_s0 + $0x1b0] sm:$0xf] }
  0x18   :  { %v363_v45 = vrot.slane %v361_v25, 1  ;;  %v392_v4 = vor.u32 %v391_v61, %v387_v59  ;;  %v424_v25 = vshll.u32 %v1894_v20, 16  ;;  %v2172_v39 = vunpack.c.l.b16 %v1741_v36  ;;  %v1751_v0 = vld [vmem:[%s3106_s0 + $0x1d0] sm:$0xf]  ;;  %v1750_v1 = vld [vmem:[%s3106_s0 + $0x1c8] sm:$0xf] }
  0x19   :  { %v413_v22 = vor.u32 %v412_v16, %v408_v15  ;;  %v1771_v6 = vld [vmem:[%s3106_s0 + $0x94] sm:$0x1]  ;;  %v1754_v12 = vld [vmem:[%s3106_s0 + $0x1e8] sm:$0xf]  ;;  %vm1385_vm7 = vcmask 228352   ;;  %vm1418_vm8 = vcmask 261120  }
  0x1a   :  { %v426_v31 = vrot.slane %v424_v25, 1  ;;  %v2275_v15 = vunpack.c.l.b16 %v1754_v12  ;;  %v1804_v12 = vld [vmem:[%s3106_s0 + $0x58] sm:$0xf]  ;;  %vm1511_vm9 = vcmask 293888   ;;  %vm1605_vm10 = vcmask 60416  }
  0x1b   :  { %vm1659_vm11 = vcmask 57344  }
  0x1e   :  { %233 = vrot.lane.b32.xlu2 %v206_v33, %s1950_s24  ;;  %231 = vrot.lane.b32.xlu1 %v205_v34, %s1950_s24  ;;  %v343_v33 = vor.u32 %v342_v24, %v338_v23  ;;  %v1925_v34 = vld [vmem:[%s3106_s0 + $0x130] sm:$0x10] }
  0x1f   :  { %229 = vrot.lane.b32.xlu0 %v204_v38, %s1950_s24  ;;  %v377_v38 = vrot.slane %v375_v26, 1  ;;  %v1878_v42 = vor.u32 %v1925_v34, %v1877_v32  ;;  %v1739_v26 = vld [vmem:[%s3106_s0 + $0x90] sm:$0xf]  ;;  %v427_v34 = vor.u32 %v426_v31, %v422_v30 }
  0x20   :  { %v2154_v27 = vunpack.c.l.b16 %v1739_v26 }
  0x21   :  { %v378_v46 = vor.u32 %v377_v38, %v373_v37  ;;  %v396_v49 = vshll.u32 %v1878_v42, 16  ;;  %v394_v58 = vshrl.u32 %v1878_v42, 16  ;;  %v1740_v37 = vld [vmem:[%s3106_s0 + $0x98] sm:$0xf]  ;;  %v2170_v38 = vunpack.c.l.b16 %v1742_v35  ;;  %v1819_v35 = vld [vmem:[%s3106_s0 + $0xc] sm:$0x1] }
  0x22   :  { %v499_v32 = vpack.c.b16 %v2154_v27, %v2154_v27  ;;  %v2175_v40 = vunpack.c.l.b16 %v1740_v37  ;;  %v501_v42 = vpack.c.b16 %v2172_v39, %v2172_v39 }
  0x23   :  { %v398_v60 = vrot.slane %v396_v49, 1  ;;  %v502_v41 = vpack.c.b16 %v2170_v38, %v2170_v38 }
  0x24   :  { %v500_v43 = vpack.c.b16 %v2175_v40, %v2175_v40 }
  0x25   :  { %v399_v3 = vor.u32 %v398_v60, %v394_v58  ;;  %v2222_v58 = vunpack.c.l.b16 %v1747_v55 }
  0x26   :  { %239 = vrot.lane.b32.xlu2 %v209_v52, %s1950_s24  ;;  %237 = vrot.lane.b32.xlu1 %v208_v53, %s1950_s24  ;;  %v364_v52 = vor.u32 %v363_v45, %v359_v44  ;;  %v1928_v53 = vld [vmem:[%s3106_s0 + $0x148] sm:$0x10]  ;;  %v1745_v44 = vld [vmem:[%s3106_s0 + $0xc0] sm:$0xf] }
  0x27   :  { %235 = vrot.lane.b32.xlu0 %v207_v56, %s1950_s24  ;;  %v1881_v56 = vld [vmem:[%s3106_s0 + $0x138] sm:$0xf]  ;;  %v1890_v62 = vor.u32 %v1928_v53, %v1889_v51 }
  0x28   :  { %v1882_v2 = vor.u32 %v1926_v57, %v1881_v56  ;;  %v1744_v45 = vld [vmem:[%s3106_s0 + $0xb8] sm:$0xf]  ;;  %v1746_v56 = vld [vmem:[%s3106_s0 + $0xc8] sm:$0xf]  ;;  %v2220_v57 = vunpack.c.l.b16 %v1748_v54 }
  0x29   :  { %v417_v5 = vshll.u32 %v1890_v62, 16  ;;  %v415_v13 = vshrl.u32 %v1890_v62, 16  ;;  %v2196_v48 = vunpack.c.l.b16 %v1744_v45  ;;  %v2225_v59 = vunpack.c.l.b16 %v1746_v56 }
  0x2a   :  { %v403_v8 = vshll.u32 %v1882_v2, 16  ;;  %v401_v18 = vshrl.u32 %v1882_v2, 16  ;;  %v508_v61 = vpack.c.b16 %v2220_v57, %v2220_v57  ;;  %v507_v62 = vpack.c.b16 %v2222_v58, %v2222_v58  ;;  %v1749_v2 = vld [vmem:[%s3106_s0 + $0x1c0] sm:$0xf] }
  0x2b   :  { %v506_v63 = vpack.c.b16 %v2225_v59, %v2225_v59  ;;  %v995_v45 = vunpack.c.l.b16 %v1819_v35 }
  0x2c   :  { %v405_v19 = vrot.slane %v403_v8, 1 }
  0x2e   :  { %437 = vrot.lane.b32.xlu2 %v336_v9, %s1951_s25  ;;  %435 = vrot.lane.b32.xlu1 %v329_v10, %s1951_s25  ;;  %v1897_v9 = vld [vmem:[%s3106_s0 + $0x158] sm:$0xf]  ;;  %v1930_v10 = vld [vmem:[%s3106_s0 + $0x158] sm:$0x10]  ;;  %v406_v24 = vor.u32 %v405_v19, %v401_v18 }
  0x2f   :  { %241 = vrot.lane.b32.xlu0 %v210_v14, %s1950_s24  ;;  %v419_v14 = vrot.slane %v417_v5, 1  ;;  %v1898_v17 = vor.u32 %v1930_v10, %v1897_v9  ;;  %v2251_v5 = vunpack.c.l.b16 %v1749_v2  ;;  %v643_v10 = vunpack.c.l.b16 %v1771_v6 }
  0x31   :  { %v420_v21 = vor.u32 %v419_v14, %v415_v13  ;;  %v431_v23 = vshll.u32 %v1898_v17, 16  ;;  %v509_v11 = vpack.c.b16 %v2251_v5, %v2251_v5  ;;  %v1753_v13 = vld [vmem:[%s3106_s0 + $0x1e0] sm:$0xf]  ;;  %v1752_v14 = vld [vmem:[%s3106_s0 + $0x1d8] sm:$0xf] }
  0x32   :  { %v2277_v16 = vunpack.c.l.b16 %v1753_v13  ;;  %v2281_v18 = vunpack.c.l.b16 %v1752_v14  ;;  %v1803_v14 = vld [vmem:[%s3106_s0 + $0x50] sm:$0xf] }
  0x34   :  { %v512_v26 = vpack.c.b16 %v2281_v18, %v2281_v18 }
  0x36   :  { %443 = vrot.lane.b32.xlu2 %v357_v28, %s1951_s25  ;;  %441 = vrot.lane.b32.xlu1 %v350_v29, %s1951_s25  ;;  %v429_v28 = vshrl.u32 %v1898_v17, 16  ;;  %v433_v29 = vrot.slane %v431_v23, 1  ;;  %v659_v17 = vpack.c.b16 %v643_v10, %v2154_v27  ;;  %v514_v23 = vpack.c.b16 %v2275_v15, %v2275_v15  ;;  %v1756_v27 = vld [vmem:[%s3106_s0 + $0xe0] sm:$0xf] }
  0x37   :  { %439 = vrot.lane.b32.xlu0 %v343_v33, %s1951_s25 }
  0x38   :  { %v434_v33 = vor.u32 %v433_v29, %v429_v28  ;;  %v678_v25 = vshll.u32 %v659_v17, 16  ;;  %v1755_v29 = vld [vmem:[%s3106_s0 + $0xd8] sm:$0xf]  ;;  %v676_v30 = vshrl.u32 %v659_v17, 16  ;;  %v18_v17 = vld [vmem:[%s3106_s0 + $0x20] sm:$0xf] }
  0x3a   :  { %v680_v31 = vrot.slane %v678_v25, 1  ;;  %v915_v25 = vunpack.c.l.b16 %v1803_v14 }
  0x3e   :  { %449 = vrot.lane.b32.xlu2 %v378_v46, %s1951_s25  ;;  %447 = vrot.lane.b32.xlu1 %v371_v47, %s1951_s25  ;;  %v1743_v46 = vld [vmem:[%s3106_s0 + $0xb0] sm:$0xf]  ;;  %v2194_v47 = vunpack.c.l.b16 %v1745_v44 }
  0x3f   :  { %445 = vrot.lane.b32.xlu0 %v364_v52, %s1951_s25  ;;  %v2199_v49 = vunpack.c.l.b16 %v1743_v46  ;;  %v504_v52 = vpack.c.b16 %v2196_v48, %v2196_v48 }
  0x40   :  { %v505_v51 = vpack.c.b16 %v2194_v47, %v2194_v47 }
  0x41   :  { %v503_v53 = vpack.c.b16 %v2199_v49, %v2199_v49 }
  0x46   :  { %455 = vrot.lane.b32.xlu2 %v399_v3, %s1951_s25  ;;  %453 = vrot.lane.b32.xlu1 %v392_v4, %s1951_s25  ;;  %v2246_v3 = vunpack.c.l.b16 %v1751_v0  ;;  %v2248_v4 = vunpack.c.l.b16 %v1750_v1  ;;  %v1820_v1 = vld [vmem:[%s3106_s0 + $0x14] sm:$0x1] }
  0x47   :  { %451 = vrot.lane.b32.xlu0 %v385_v7, %s1951_s25  ;;  %v996_v13 = vunpack.c.l.b16 %v1820_v1 }
  0x48   :  { %v511_v8 = vpack.c.b16 %v2246_v3, %v2246_v3  ;;  %v510_v9 = vpack.c.b16 %v2248_v4, %v2248_v4 }
  0x4e   :  { %461 = vrot.lane.b32.xlu2 %v420_v21, %s1951_s25  ;;  %459 = vrot.lane.b32.xlu1 %v413_v22, %s1951_s25  ;;  %v1772_v21 = vld [vmem:[%s3106_s0 + $0x9c] sm:$0x1] }
  0x4f   :  { %457 = vrot.lane.b32.xlu0 %v406_v24, %s1951_s25  ;;  %v513_v24 = vpack.c.b16 %v2277_v16, %v2277_v16  ;;  %v644_v28 = vunpack.c.l.b16 %v1772_v21 }
  0x56   :  { %515 = vrot.lane.b32.xlu2 %v499_v32, %s1952_s12  ;;  %465 = vrot.lane.b32.xlu1 %v434_v33, %s1951_s25  ;;  %v564_v32 = vunpack.c.l.b16 %v1756_v27  ;;  %v563_v33 = vunpack.c.l.b16 %v1755_v29  ;;  %v1776_v27 = vld [vmem:[%s3106_s0 + $0xbc] sm:$0x1] }
  0x57   :  { %463 = vrot.lane.b32.xlu0 %v427_v34, %s1951_s25  ;;  %v660_v34 = vpack.c.b16 %v644_v28, %v2175_v40  ;;  %v1788_v40 = vld [vmem:[%s3106_s0 + $0x10] sm:$0xf] }
  0x58   :  { %v580_v44 = vpack.c.b16 %v564_v32, %v564_v32  ;;  %v579_v46 = vpack.c.b16 %v563_v33, %v563_v33  ;;  %v836_v54 = vunpack.c.l.b16 %v1788_v40 }
  0x59   :  { %v683_v56 = vshrl.u32 %v660_v34, 16 }
  0x5e   :  { %521 = vrot.lane.b32.xlu2 %v502_v41, %s1952_s12  ;;  %519 = vrot.lane.b32.xlu1 %v501_v42, %s1952_s12  ;;  %v1787_v42 = vld [vmem:[%s3106_s0 + $0x8] sm:$0xf] }
  0x5f   :  { %517 = vrot.lane.b32.xlu0 %v500_v43, %s1952_s12  ;;  %v681_v43 = vor.u32 %v680_v31, %v676_v30  ;;  %v1775_v31 = vld [vmem:[%s3106_s0 + $0xb4] sm:$0x1] }
  0x60   :  { %v2201_v50 = vpop.permute.xlu2 %219 }
  0x61   :  { %v1186_v28 = vsel %vm1171_vm1, %v18_v17, %v2201_v50  ;;  %v1760_v50 = vld [vmem:[%s3106_s0 + $0x100] sm:$0xf] }
  0x66   :  { %527 = vrot.lane.b32.xlu2 %v505_v51, %s1952_s12  ;;  %525 = vrot.lane.b32.xlu1 %v504_v52, %s1952_s12  ;;  %v685_v51 = vshll.u32 %v660_v34, 16  ;;  %v835_v52 = vunpack.c.l.b16 %v1787_v42  ;;  %v931_v42 = vpack.c.b16 %v915_v25, %v915_v25 }
  0x67   :  { %523 = vrot.lane.b32.xlu0 %v503_v53, %s1952_s12  ;;  %v15_v53 = vld [vmem:[%s3106_s0 + $0x8] sm:$0xf] }
  0x68   :  { %v2227_v60 = vpop.permute.xlu2 %221  ;;  %v1011_v55 = vpack.c.b16 %v995_v45, %v835_v52  ;;  %v647_v45 = vunpack.c.l.b16 %v1775_v31 }
  0x6a   :  { %v1030_v10 = vshll.u32 %v1011_v55, 16  ;;  %v1028_v21 = vshrl.u32 %v1011_v55, 16  ;;  %v663_v55 = vpack.c.b16 %v647_v45, %v2199_v49  ;;  %v14_v49 = vld [vmem:[%s3106_s0] sm:$0xf] }
  0x6b   :  { %v1764_v45 = vld [vmem:[%s3106_s0 + $0x200] sm:$0xf] }
  0x6e   :  { %533 = vrot.lane.b32.xlu2 %v508_v61, %s1952_s12  ;;  %531 = vrot.lane.b32.xlu1 %v507_v62, %s1952_s12  ;;  %v687_v61 = vrot.slane %v685_v51, 1  ;;  %v568_v51 = vunpack.c.l.b16 %v1760_v50 }
  0x6f   :  { %529 = vrot.lane.b32.xlu0 %v506_v63, %s1952_s12 }
  0x70   :  { %v2256_v7 = vpop.permute.xlu2 %227 }
  0x76   :  { %539 = vrot.lane.b32.xlu2 %v511_v8, %s1952_s12  ;;  %537 = vrot.lane.b32.xlu1 %v510_v9, %s1952_s12  ;;  %v852_v8 = vpack.c.b16 %v836_v54, %v836_v54  ;;  %v851_v9 = vpack.c.b16 %v835_v52, %v835_v52 }
  0x77   :  { %535 = vrot.lane.b32.xlu0 %v509_v11, %s1952_s12  ;;  %v688_v11 = vor.u32 %v687_v61, %v683_v56 }
  0x78   :  { %v2283_v19 = vpop.permute.xlu2 %233  ;;  %v2285_v20 = vpop.permute.xlu1 %215 }
  0x79   :  { %v2290_v22 = vpop.permute.xlu0 %211 }
  0x7a   :  { %v1174_v25 = vsel %vm1171_vm1, %v14_v49, %v2290_v22  ;;  %v1792_v22 = vld [vmem:[%s3106_s0 + $0x30] sm:$0xf] }
  0x7e   :  { %545 = vrot.lane.b32.xlu2 %v514_v23, %s1952_s12  ;;  %543 = vrot.lane.b32.xlu1 %v513_v24, %s1952_s12  ;;  %v1032_v23 = vrot.slane %v1030_v10, 1  ;;  %v916_v24 = vunpack.c.l.b16 %v1804_v12  ;;  %v1763_v12 = vld [vmem:[%s3106_s0 + $0x1f8] sm:$0xf] }
  0x7f   :  { %541 = vrot.lane.b32.xlu0 %v512_v26, %s1952_s12  ;;  %v1012_v26 = vpack.c.b16 %v996_v13, %v836_v54  ;;  %v571_v13 = vunpack.c.l.b16 %v1763_v12 }
  0x80   :  { %v2311_v36 = vpop.permute.xlu2 %239  ;;  %v2313_v37 = vpop.permute.xlu1 %217  ;;  %v1033_v34 = vor.u32 %v1032_v23, %v1028_v21  ;;  %v932_v35 = vpack.c.b16 %v916_v24, %v916_v24  ;;  %v704_v21 = vshrl.u32 %v663_v55, 16  ;;  %v1780_v24 = vld [vmem:[%s3106_s0 + $0x1bc] sm:$0x1] }
  0x81   :  { %v214_v41 = vpop.permute.xlu0 %213 }
  0x82   :  { %v1177_v62 = vsel %vm1171_vm1, %v15_v53, %v214_v41  ;;  %v648_v41 = vunpack.c.l.b16 %v1776_v27  ;;  %v1035_v53 = vshrl.u32 %v1012_v26, 16 }
  0x84   :  { %v664_v52 = vpack.c.b16 %v648_v41, %v2196_v48  ;;  %v706_v48 = vshll.u32 %v663_v55, 16  ;;  %v587_v41 = vpack.c.b16 %v571_v13, %v571_v13  ;;  %v572_v55 = vunpack.c.l.b16 %v1764_v45 }
  0x86   :  { %787 = vrot.lane.b32.xlu2 %v681_v43, %s1953_s27  ;;  %597 = vrot.lane.b32.xlu1 %v580_v44, %s1954_s28  ;;  %v1037_v43 = vshll.u32 %v1012_v26, 16  ;;  %v1759_v44 = vld [vmem:[%s3106_s0 + $0xf8] sm:$0xf]  ;;  %v713_v10 = vshll.u32 %v664_v52, 16  ;;  %v711_v14 = vshrl.u32 %v664_v52, 16  ;;  %v708_v23 = vrot.slane %v706_v48, 1 }
  0x87   :  { %595 = vrot.lane.b32.xlu0 %v579_v46, %s1954_s28  ;;  %v21_v46 = vld [vmem:[%s3106_s0 + $0x38] sm:$0xf]  ;;  %v567_v40 = vunpack.c.l.b16 %v1759_v44  ;;  %v840_v52 = vunpack.c.l.b16 %v1792_v22 }
  0x88   :  { %v226_v63 = vpop.permute.xlu1 %225  ;;  %v438_v0 = vpop.permute.xlu2 %437  ;;  %v1039_v54 = vrot.slane %v1037_v43, 1  ;;  %v715_v17 = vrot.slane %v713_v10, 1  ;;  %v652_v43 = vunpack.c.l.b16 %v1780_v24  ;;  %v709_v50 = vor.u32 %v708_v23, %v704_v21 }
  0x89   :  { %v2331_v2 = vpop.permute.xlu0 %223  ;;  %v2334_v6 = vsel %vm1220_vm0, %v1177_v62, %v438_v0  ;;  %v1195_v56 = vsel %vm1171_vm1, %v21_v46, %v226_v63  ;;  %v24_v63 = vld [vmem:[%s3106_s0 + $0x130] sm:$0xf]  ;;  %v17_v46 = vld [vmem:[%s3106_s0 + $0x18] sm:$0xf] }
  0x8e   :  { %869 = vrot.lane.b32.xlu2 %v852_v8, %s1955_s9  ;;  %867 = vrot.lane.b32.xlu1 %v851_v9, %s1955_s9  ;;  %v584_v8 = vpack.c.b16 %v568_v51, %v568_v51  ;;  %v583_v9 = vpack.c.b16 %v567_v40, %v567_v40  ;;  %v27_v51 = vld [vmem:[%s3106_s0 + $0x148] sm:$0xf]  ;;  %v16_v40 = vld [vmem:[%s3106_s0 + $0x10] sm:$0xf] }
  0x8f   :  { %789 = vrot.lane.b32.xlu0 %v688_v11, %s1953_s27  ;;  %v1040_v11 = vor.u32 %v1039_v54, %v1035_v53  ;;  %v668_v54 = vpack.c.b16 %v652_v43, %v2220_v57 }
  0x90   :  { %v232_v29 = vpop.permute.xlu1 %231  ;;  %v444_v30 = vpop.permute.xlu2 %443 }
  0x91   :  { %v2356_v32 = vpop.permute.xlu0 %229  ;;  %v2359_v33 = vsel %vm1220_vm0, %v1186_v28, %v444_v30  ;;  %v1204_v26 = vsel %vm1171_vm1, %v24_v63, %v232_v29  ;;  %v1779_v30 = vld [vmem:[%s3106_s0 + $0x1b4] sm:$0x1]  ;;  %v1791_v29 = vld [vmem:[%s3106_s0 + $0x28] sm:$0xf]  ;;  %v741_v13 = vshll.u32 %v668_v54, 16  ;;  %v739_v23 = vshrl.u32 %v668_v54, 16 }
  0x92   :  { %v651_v44 = vunpack.c.l.b16 %v1779_v30  ;;  %v839_v53 = vunpack.c.l.b16 %v1791_v29 }
  0x93   :  { %v743_v24 = vrot.slane %v741_v13, 1 }
  0x94   :  { %v855_v63 = vpack.c.b16 %v839_v53, %v839_v53 }
  0x96   :  { %1139 = vrot.lane.b32.xlu2 %v1033_v34, %s1956_s20  ;;  %949 = vrot.lane.b32.xlu1 %v932_v35, %s1957_s21 }
  0x97   :  { %947 = vrot.lane.b32.xlu0 %v931_v42, %s1957_s21  ;;  %v716_v42 = vor.u32 %v715_v17, %v711_v14  ;;  %v20_v17 = vld [vmem:[%s3106_s0 + $0x30] sm:$0xf] }
  0x98   :  { %v238_v61 = vpop.permute.xlu1 %237  ;;  %v450_v62 = vpop.permute.xlu2 %449 }
  0x99   :  { %v2376_v0 = vpop.permute.xlu0 %235  ;;  %v2379_v1 = vsel %vm1220_vm0, %v1195_v56, %v450_v62  ;;  %v667_v56 = vpack.c.b16 %v651_v44, %v2222_v58  ;;  %v1183_v62 = vsel %vm1171_vm1, %v17_v46, %v2313_v37  ;;  %v856_v58 = vpack.c.b16 %v840_v52, %v840_v52 }
  0x9a   :  { %v588_v37 = vpack.c.b16 %v572_v55, %v572_v55  ;;  %v744_v46 = vor.u32 %v743_v24, %v739_v23  ;;  %v22_v55 = vld [vmem:[%s3106_s0 + $0x120] sm:$0xf] }
  0x9b   :  { %v734_v14 = vshll.u32 %v667_v56, 16 }
  0x9e   :  { %605 = vrot.lane.b32.xlu2 %v584_v8, %s1954_s28  ;;  %603 = vrot.lane.b32.xlu1 %v583_v9, %s1954_s28  ;;  %v1213_v8 = vsel %vm1171_vm1, %v27_v51, %v238_v61  ;;  %v1807_v61 = vld [vmem:[%s3106_s0 + $0x70] sm:$0xf] }
  0x9f   :  { %1141 = vrot.lane.b32.xlu0 %v1040_v11, %s1956_s20  ;;  %v1180_v11 = vsel %vm1171_vm1, %v16_v40, %v2285_v20  ;;  %v19_v20 = vld [vmem:[%s3106_s0 + $0x28] sm:$0xf]  ;;  %v919_v21 = vunpack.c.l.b16 %v1807_v61  ;;  %v1796_v51 = vld [vmem:[%s3106_s0 + $0x130] sm:$0xf] }
  0xa0   :  { %v456_v27 = vpop.permute.xlu2 %455  ;;  %v436_v28 = vpop.permute.xlu1 %435  ;;  %v1189_v43 = vsel %vm1171_vm1, %v19_v20, %v2227_v60  ;;  %v1795_v60 = vld [vmem:[%s3106_s0 + $0x128] sm:$0xf] }
  0xa1   :  { %v2402_v31 = vpop.permute.xlu0 %241  ;;  %v2405_v34 = vsel %vm1220_vm0, %v1204_v26, %v456_v27  ;;  %v1222_v35 = vsel %vm1220_vm0, %v1174_v25, %v436_v28  ;;  %v1824_v25 = vld [vmem:[%s3106_s0 + $0x34] sm:$0x1]  ;;  %v732_v26 = vshrl.u32 %v667_v56, 16  ;;  %v736_v27 = vrot.slane %v734_v14, 1  ;;  %v23_v56 = vld [vmem:[%s3106_s0 + $0x128] sm:$0xf] }
  0xa2   :  { %v1192_v28 = vsel %vm1171_vm1, %v20_v17, %v2331_v2  ;;  %v1000_v44 = vunpack.c.l.b16 %v1824_v25  ;;  %v935_v2 = vpack.c.b16 %v919_v21, %v919_v21 }
  0xa3   :  { %v737_v40 = vor.u32 %v736_v27, %v732_v26  ;;  %v26_v27 = vld [vmem:[%s3106_s0 + $0x140] sm:$0xf] }
  0xa6   :  { %611 = vrot.lane.b32.xlu2 %v587_v41, %s1954_s28  ;;  %797 = vrot.lane.b32.xlu1 %v716_v42, %s1953_s27  ;;  %v1823_v42 = vld [vmem:[%s3106_s0 + $0x2c] sm:$0x1] }
  0xa7   :  { %795 = vrot.lane.b32.xlu0 %v709_v50, %s1953_s27  ;;  %v999_v54 = vunpack.c.l.b16 %v1823_v42 }
  0xa8   :  { %v462_v9 = vpop.permute.xlu2 %461  ;;  %v442_v10 = vpop.permute.xlu1 %441 }
  0xa9   :  { %v440_v48 = vpop.permute.xlu0 %439  ;;  %v2437_v12 = vsel %vm1220_vm0, %v1213_v8, %v462_v9  ;;  %v1228_v57 = vsel %vm1220_vm0, %v1183_v62, %v442_v10  ;;  %v844_v62 = vunpack.c.l.b16 %v1796_v51  ;;  %v1016_v8 = vpack.c.b16 %v1000_v44, %v840_v52 }
  0xaa   :  { %v2441_v49 = vsel %vm1220_vm0, %v1180_v11, %v440_v48  ;;  %v843_v9 = vunpack.c.l.b16 %v1795_v60  ;;  %v1015_v11 = vpack.c.b16 %v999_v54, %v839_v53  ;;  %v1828_v48 = vld [vmem:[%s3106_s0 + $0x134] sm:$0x1]  ;;  %v1198_v52 = vsel %vm1171_vm1, %v22_v55, %v2256_v7  ;;  %v1811_v7 = vld [vmem:[%s3106_s0 + $0x170] sm:$0xf] }
  0xab   :  { %v860_v20 = vpack.c.b16 %v844_v62, %v844_v62  ;;  %v1065_v17 = vshll.u32 %v1016_v8, 16  ;;  %v1004_v24 = vunpack.c.l.b16 %v1828_v48  ;;  %v1210_v51 = vsel %vm1171_vm1, %v26_v27, %v2376_v0  ;;  %v1812_v0 = vld [vmem:[%s3106_s0 + $0x178] sm:$0xf] }
  0xac   :  { %v859_v23 = vpack.c.b16 %v843_v9, %v843_v9  ;;  %v1058_v26 = vshll.u32 %v1015_v11, 16 }
  0xad   :  { %v1020_v42 = vpack.c.b16 %v1004_v24, %v844_v62 }
  0xae   :  { %877 = vrot.lane.b32.xlu2 %v856_v58, %s1955_s9  ;;  %875 = vrot.lane.b32.xlu1 %v855_v63, %s1955_s9  ;;  %v1827_v58 = vld [vmem:[%s3106_s0 + $0x12c] sm:$0x1]  ;;  %v1201_v63 = vsel %vm1171_vm1, %v23_v56, %v2356_v32  ;;  %v1060_v44 = vrot.slane %v1058_v26, 1 }
  0xaf   :  { %613 = vrot.lane.b32.xlu0 %v588_v37, %s1954_s28  ;;  %v1003_v32 = vunpack.c.l.b16 %v1827_v58  ;;  %v1091_v48 = vshrl.u32 %v1020_v42, 16  ;;  %v28_v58 = vld [vmem:[%s3106_s0 + $0x150] sm:$0xf] }
  0xb0   :  { %v516_v30 = vpop.permute.xlu2 %515  ;;  %v448_v41 = vpop.permute.xlu1 %447  ;;  %v1216_v24 = vsel %vm1171_vm1, %v28_v58, %v2311_v36  ;;  %v1757_v36 = vld [vmem:[%s3106_s0 + $0xe8] sm:$0xf] }
  0xb1   :  { %v446_v50 = vpop.permute.xlu0 %445  ;;  %v2466_v22 = vsel %vm1253_vm2, %v1222_v35, %v516_v30  ;;  %v1234_v29 = vsel %vm1220_vm0, %v1192_v28, %v448_v41  ;;  %v1808_v35 = vld [vmem:[%s3106_s0 + $0x78] sm:$0xf]  ;;  %v923_v28 = vunpack.c.l.b16 %v1811_v7  ;;  %v1063_v30 = vshrl.u32 %v1016_v8, 16  ;;  %v1774_v7 = vld [vmem:[%s3106_s0 + $0xac] sm:$0x1] }
  0xb2   :  { %v2470_v45 = vsel %vm1220_vm0, %v1189_v43, %v446_v50  ;;  %v920_v10 = vunpack.c.l.b16 %v1808_v35  ;;  %v1067_v41 = vrot.slane %v1065_v17, 1  ;;  %v1019_v43 = vpack.c.b16 %v1003_v32, %v843_v9 }
  0xb3   :  { %v1056_v50 = vshrl.u32 %v1015_v11, 16  ;;  %v939_v56 = vpack.c.b16 %v923_v28, %v923_v28  ;;  %v1093_v9 = vshll.u32 %v1020_v42, 16 }
  0xb4   :  { %v936_v25 = vpack.c.b16 %v920_v10, %v920_v10  ;;  %v1068_v62 = vor.u32 %v1067_v41, %v1063_v30  ;;  %v1086_v10 = vshll.u32 %v1019_v43, 16  ;;  %v1758_v30 = vld [vmem:[%s3106_s0 + $0xf0] sm:$0xf]  ;;  %v646_v41 = vunpack.c.l.b16 %v1774_v7 }
  0xb6   :  { %955 = vrot.lane.b32.xlu2 %v935_v2, %s1957_s21  ;;  %805 = vrot.lane.b32.xlu1 %v744_v46, %s1953_s27  ;;  %v1773_v2 = vld [vmem:[%s3106_s0 + $0xa4] sm:$0x1] }
  0xb7   :  { %803 = vrot.lane.b32.xlu0 %v737_v40, %s1953_s27  ;;  %v645_v11 = vunpack.c.l.b16 %v1773_v2  ;;  %v1783_v2 = vld [vmem:[%s3106_s0 + $0x1d4] sm:$0x1] }
  0xb8   :  { %v522_v13 = vpop.permute.xlu2 %521  ;;  %v454_v37 = vpop.permute.xlu1 %453 }
  0xb9   :  { %v452_v14 = vpop.permute.xlu0 %451  ;;  %v2501_v61 = vsel %vm1253_vm2, %v1228_v57, %v522_v13  ;;  %v1240_v53 = vsel %vm1220_vm0, %v1201_v63, %v454_v37  ;;  %v25_v57 = vld [vmem:[%s3106_s0 + $0x138] sm:$0xf]  ;;  %v1084_v63 = vshrl.u32 %v1019_v43, 16  ;;  %v1088_v13 = vrot.slane %v1086_v10, 1 }
  0xba   :  { %v2505_v21 = vsel %vm1220_vm0, %v1198_v52, %v452_v14  ;;  %v1207_v46 = vsel %vm1171_vm1, %v25_v57, %v2283_v19  ;;  %v1061_v19 = vor.u32 %v1060_v44, %v1056_v50  ;;  %v1095_v52 = vrot.slane %v1093_v9, 1 }
  0xbb   :  { %v661_v37 = vpack.c.b16 %v645_v11, %v2172_v39  ;;  %v924_v14 = vunpack.c.l.b16 %v1812_v0  ;;  %v566_v43 = vunpack.c.l.b16 %v1758_v30  ;;  %v565_v50 = vunpack.c.l.b16 %v1757_v36  ;;  %v1768_v11 = vld [vmem:[%s3106_s0 + $0x220] sm:$0xf] }
  0xbc   :  { %v1096_v57 = vor.u32 %v1095_v52, %v1091_v48  ;;  %v662_v44 = vpack.c.b16 %v646_v41, %v2170_v38  ;;  %v655_v9 = vunpack.c.l.b16 %v1783_v2 }
  0xbd   :  { %v692_v27 = vshll.u32 %v661_v37, 16  ;;  %v940_v28 = vpack.c.b16 %v924_v14, %v924_v14  ;;  %v581_v10 = vpack.c.b16 %v565_v50, %v565_v50 }
  0xbe   :  { %885 = vrot.lane.b32.xlu2 %v860_v20, %s1955_s9  ;;  %883 = vrot.lane.b32.xlu1 %v859_v23, %s1955_s9  ;;  %v699_v38 = vshll.u32 %v662_v44, 16  ;;  %v671_v0 = vpack.c.b16 %v655_v9, %v2246_v3 }
  0xbf   :  { %957 = vrot.lane.b32.xlu0 %v936_v25, %s1957_s21  ;;  %v694_v42 = vrot.slane %v692_v27, 1 }
  0xc0   :  { %v528_v40 = vpop.permute.xlu2 %527  ;;  %v460_v60 = vpop.permute.xlu1 %459  ;;  %v701_v48 = vrot.slane %v699_v38, 1 }
  0xc1   :  { %v458_v54 = vpop.permute.xlu0 %457  ;;  %v2527_v35 = vsel %vm1253_vm2, %v1234_v29, %v528_v40  ;;  %v1246_v55 = vsel %vm1220_vm0, %v1210_v51, %v460_v60  ;;  %v29_v29 = vld [vmem:[%s3106_s0 + $0x158] sm:$0xf] }
  0xc2   :  { %v2531_v8 = vsel %vm1220_vm0, %v1207_v46, %v458_v54  ;;  %v1219_v20 = vsel %vm1171_vm1, %v29_v29, %v2402_v31  ;;  %v1089_v31 = vor.u32 %v1088_v13, %v1084_v63  ;;  %v697_v29 = vshrl.u32 %v662_v44, 16  ;;  %v1784_v63 = vld [vmem:[%s3106_s0 + $0x1dc] sm:$0x1] }
  0xc4   :  { %v702_v7 = vor.u32 %v701_v48, %v697_v29 }
  0xc6   :  { %963 = vrot.lane.b32.xlu2 %v939_v56, %s1957_s21  ;;  %1149 = vrot.lane.b32.xlu1 %v1068_v62, %s1956_s20  ;;  %v582_v62 = vpack.c.b16 %v566_v43, %v566_v43 }
  0xc7   :  { %1147 = vrot.lane.b32.xlu0 %v1061_v19, %s1956_s20  ;;  %v1767_v19 = vld [vmem:[%s3106_s0 + $0x218] sm:$0xf] }
  0xc8   :  { %v534_v17 = vpop.permute.xlu2 %533  ;;  %v466_v23 = vpop.permute.xlu1 %465 }
  0xc9   :  { %v464_v32 = vpop.permute.xlu0 %463  ;;  %v2554_v25 = vsel %vm1253_vm2, %v1240_v53, %v534_v17  ;;  %v1252_v39 = vsel %vm1220_vm0, %v1219_v20, %v466_v23  ;;  %v690_v53 = vshrl.u32 %v661_v37, 16  ;;  %v762_v23 = vshll.u32 %v671_v0, 16 }
  0xca   :  { %v2558_v26 = vsel %vm1220_vm0, %v1216_v24, %v464_v32  ;;  %v1790_v24 = vld [vmem:[%s3106_s0 + $0x20] sm:$0xf]  ;;  %v656_v32 = vunpack.c.l.b16 %v1784_v63 }
  0xcb   :  { %v695_v56 = vor.u32 %v694_v42, %v690_v53 }
  0xcc   :  { %v672_v27 = vpack.c.b16 %v656_v32, %v2281_v18  ;;  %v1806_v18 = vld [vmem:[%s3106_s0 + $0x68] sm:$0xf] }
  0xcd   :  { %v1932_v32 = vld [vmem:[%s3107_s1 + $0x8] sm:$0xff] }
  0xce   :  { %1157 = vrot.lane.b32.xlu2 %v1096_v57, %s1956_s20  ;;  %1155 = vrot.lane.b32.xlu1 %v1089_v31, %s1956_s20  ;;  %v838_v57 = vunpack.c.l.b16 %v1790_v24  ;;  %v767_v9 = vshrl.u32 %v672_v27, 16 }
  0xcf   :  { %965 = vrot.lane.b32.xlu0 %v940_v28, %s1957_s21  ;;  %v1821_v28 = vld [vmem:[%s3106_s0 + $0x1c] sm:$0x1] }
  0xd0   :  { %v540_v46 = vpop.permute.xlu2 %539  ;;  %v520_v51 = vpop.permute.xlu1 %519  ;;  %v854_v50 = vpack.c.b16 %v838_v57, %v838_v57  ;;  %v997_v44 = vunpack.c.l.b16 %v1821_v28  ;;  %v1831_v28 = vld [vmem:[%s3106_s0 + $0x14c] sm:$0x1] }
  0xd1   :  { %v2573_v40 = vpop.permute.xlu0 %517  ;;  %v2576_v60 = vsel %vm1253_vm2, %v1246_v55, %v540_v46  ;;  %v2580_v54 = vsel %vm1253_vm2, %v2441_v49, %v520_v51  ;;  %v576_v55 = vunpack.c.l.b16 %v1768_v11  ;;  %v575_v49 = vunpack.c.l.b16 %v1767_v19  ;;  %v1805_v51 = vld [vmem:[%s3106_s0 + $0x60] sm:$0xf] }
  0xd2   :  { %v769_v46 = vshll.u32 %v672_v27, 16 }
  0xd3   :  { %v592_v20 = vpack.c.b16 %v576_v55, %v576_v55  ;;  %v591_v17 = vpack.c.b16 %v575_v49, %v575_v49  ;;  %v1822_v55 = vld [vmem:[%s3106_s0 + $0x24] sm:$0x1] }
  0xd6   :  { %791 = vrot.lane.b32.xlu2 %v695_v56, %s1953_s27  ;;  %601 = vrot.lane.b32.xlu1 %v582_v62, %s1954_s28  ;;  %v918_v56 = vunpack.c.l.b16 %v1806_v18  ;;  %v1455_v62 = vld [vmem:[%s3107_s1 + $0x10] sm:$0x3]  ;;  %v1816_v18 = vld [vmem:[%s3106_s0 + $0x198] sm:$0xf] }
  0xd7   :  { %599 = vrot.lane.b32.xlu0 %v581_v10, %s1954_s28  ;;  %v771_v10 = vrot.slane %v769_v46, 1  ;;  %v1505_v38 = vunpack.c.l.b16 %v1455_v62 }
  0xd8   :  { %v546_v58 = vpop.permute.xlu2 %545  ;;  %v526_v52 = vpop.permute.xlu1 %525  ;;  %v934_v29 = vpack.c.b16 %v918_v56, %v918_v56  ;;  %v1007_v56 = vunpack.c.l.b16 %v1831_v28 }
  0xd9   :  { %v524_v13 = vpop.permute.xlu0 %523  ;;  %v2596_v37 = vsel %vm1253_vm2, %v1252_v39, %v546_v58  ;;  %v2600_v14 = vsel %vm1253_vm2, %v2470_v45, %v526_v52  ;;  %v1789_v39 = vld [vmem:[%s3106_s0 + $0x18] sm:$0xf]  ;;  %v760_v45 = vshrl.u32 %v671_v0, 16  ;;  %v1508_v48 = vpack.c.b16 %v1505_v38, %v1505_v38  ;;  %v1778_v38 = vld [vmem:[%s3106_s0 + $0xcc] sm:$0x1] }
  0xda   :  { %v2604_v3 = vsel %vm1253_vm2, %v2359_v33, %v524_v13  ;;  %v764_v33 = vrot.slane %v762_v23, 1  ;;  %v837_v31 = vunpack.c.l.b16 %v1789_v39  ;;  %v772_v13 = vor.u32 %v771_v10, %v767_v9 }
  0xdb   :  { %v1538_v23 = vsel %vm1536_vm3, %v1508_v48, 0 }
  0xdc   :  { %v765_v43 = vor.u32 %v764_v33, %v760_v45  ;;  %v853_v2 = vpack.c.b16 %v837_v31, %v837_v31  ;;  %1545 = vmatpush.bf16.msra.mxu0 %v1538_v23  ;;  %1933 = vmatpush.bf16.msra.mxu1 %v1538_v23  ;;  %v1832_v33 = vld [vmem:[%s3106_s0 + $0x154] sm:$0x1] }
  0xdd   :  { %1934 = vmatpush.bf16.msra.mxu2 %v1538_v23  ;;  %1935 = vmatpush.bf16.msra.mxu3 %v1538_v23 }
  0xde   :  { %621 = vrot.lane.b32.xlu2 %v592_v20, %s1954_s28  ;;  %619 = vrot.lane.b32.xlu1 %v591_v17, %s1954_s28  ;;  %v1800_v20 = vld [vmem:[%s3106_s0 + $0x150] sm:$0xf]  ;;  %v998_v17 = vunpack.c.l.b16 %v1822_v55 }
  0xdf   :  { %793 = vrot.lane.b32.xlu0 %v702_v7, %s1953_s27  ;;  %v848_v24 = vunpack.c.l.b16 %v1800_v20  ;;  %v650_v20 = vunpack.c.l.b16 %v1778_v38 }
  0xe0   :  { %v2619_v30 = vpop.permute.xlu2 %787  ;;  %v532_v41 = vpop.permute.xlu1 %531  ;;  %v1014_v45 = vpack.c.b16 %v998_v17, %v838_v57  ;;  %1546 = vmatpush.bf16.msra.mxu0 %v1932_v32  ;;  %1936 = vmatpush.bf16.msra.mxu1 %v1932_v32 }
  0xe1   :  { %v530_v36 = vpop.permute.xlu0 %529  ;;  %v2623_v53 = vsel %vm1253_vm2, %v2505_v21, %v532_v41  ;;  %v1013_v21 = vpack.c.b16 %v997_v44, %v837_v31  ;;  %1937 = vmatpush.bf16.msra.mxu2 %v1932_v32  ;;  %1938 = vmatpush.bf16.msra.mxu3 %v1932_v32  ;;  %v1008_v44 = vunpack.c.l.b16 %v1832_v33  ;;  %v666_v32 = vpack.c.b16 %v650_v20, %v2225_v59  ;;  %v1766_v20 = vld [vmem:[%s3106_s0 + $0x210] sm:$0xf] }
  0xe2   :  { %v2627_v42 = vsel %vm1253_vm2, %v2379_v1, %v530_v36  ;;  %v917_v1 = vunpack.c.l.b16 %v1805_v51  ;;  %v1815_v51 = vld [vmem:[%s3106_s0 + $0x190] sm:$0xf]  ;;  %v1049_v62 = vshrl.u32 %v1014_v45, 16 }
  0xe3   :  { %v1044_v63 = vshll.u32 %v1013_v21, 16 }
  0xe4   :  { %v933_v52 = vpack.c.b16 %v917_v1, %v917_v1  ;;  %v927_v1 = vunpack.c.l.b16 %v1815_v51 }
  0xe5   :  { %v1046_v7 = vrot.slane %v1044_v63, 1  ;;  %v1761_v63 = vld [vmem:[%s3106_s0 + $0x108] sm:$0xf] }
  0xe6   :  { %811 = vrot.lane.b32.xlu2 %v765_v43, %s1953_s27  ;;  %873 = vrot.lane.b32.xlu1 %v854_v50, %s1955_s9  ;;  %v864_v50 = vpack.c.b16 %v848_v24, %v848_v24 }
  0xe7   :  { %871 = vrot.lane.b32.xlu0 %v853_v2, %s1955_s9  ;;  %v1931_v2 = vld [vmem:[%s3107_s1] sm:$0xff] }
  0xe8   :  { %v2641_v11 = vpop.permute.xlu2 %869  ;;  %v538_v19 = vpop.permute.xlu1 %537  ;;  %1547 = vmatpush.bf16.msra.mxu0 %v1931_v2  ;;  %1939 = vmatpush.bf16.msra.mxu1 %v1931_v2 }
  0xe9   :  { %v536_v49 = vpop.permute.xlu0 %535  ;;  %v2648_v0 = vsel %vm1253_vm2, %v2531_v8, %v538_v19  ;;  %v1799_v8 = vld [vmem:[%s3106_s0 + $0x148] sm:$0xf]  ;;  %1940 = vmatpush.bf16.msra.mxu2 %v1931_v2  ;;  %1941 = vmatpush.bf16.msra.mxu3 %v1931_v2  ;;  %v1777_v19 = vld [vmem:[%s3106_s0 + $0xc4] sm:$0x1] }
  0xea   :  { %v2652_v58 = vsel %vm1253_vm2, %v2405_v34, %v536_v49  ;;  %v1042_v34 = vshrl.u32 %v1013_v21, 16  ;;  %v847_v39 = vunpack.c.l.b16 %v1799_v8  ;;  %v1024_v21 = vpack.c.b16 %v1008_v44, %v848_v24 }
  0xeb   :  { %v649_v17 = vunpack.c.l.b16 %v1777_v19 }
  0xec   :  { %v1047_v43 = vor.u32 %v1046_v7, %v1042_v34  ;;  %v863_v46 = vpack.c.b16 %v847_v39, %v847_v39  ;;  %v1023_v10 = vpack.c.b16 %v1007_v56, %v847_v39  ;;  %v569_v34 = vunpack.c.l.b16 %v1761_v63 }
  0xed   :  { %v1119_v7 = vshrl.u32 %v1024_v21, 16  ;;  %v665_v39 = vpack.c.b16 %v649_v17, %v2194_v47  ;;  %v725_v47 = vshrl.u32 %v666_v32, 16 }
  0xee   :  { %953 = vrot.lane.b32.xlu2 %v934_v29, %s1957_s21  ;;  %951 = vrot.lane.b32.xlu1 %v933_v52, %s1957_s21  ;;  %v943_v52 = vpack.c.b16 %v927_v1, %v927_v1  ;;  %v1114_v8 = vshll.u32 %v1023_v10, 16  ;;  %v1781_v1 = vld [vmem:[%s3106_s0 + $0x1c4] sm:$0x1] }
  0xef   :  { %813 = vrot.lane.b32.xlu0 %v772_v13, %s1953_s27  ;;  %v1121_v13 = vshll.u32 %v1024_v21, 16  ;;  %v720_v44 = vshll.u32 %v665_v39, 16  ;;  %v653_v63 = vunpack.c.l.b16 %v1781_v1  ;;  %v1825_v1 = vld [vmem:[%s3106_s0 + $0x3c] sm:$0x1] }
  0xf0   :  { %v2669_v31 = vpop.permute.xlu2 %1139  ;;  %v544_v27 = vpop.permute.xlu1 %543  ;;  %v1116_v33 = vrot.slane %v1114_v8, 1  ;;  %v1765_v8 = vld [vmem:[%s3106_s0 + $0x208] sm:$0xf] }
  0xf1   :  { %v542_v41 = vpop.permute.xlu0 %541  ;;  %v2676_v36 = vsel %vm1253_vm2, %v2558_v26, %v544_v27  ;;  %v1051_v26 = vshll.u32 %v1014_v45, 16  ;;  %v1123_v24 = vrot.slane %v1121_v13, 1  ;;  %v1112_v45 = vshrl.u32 %v1023_v10, 16 }
  0xf2   :  { %v2680_v57 = vsel %vm1253_vm2, %v2437_v12, %v542_v41  ;;  %v928_v12 = vunpack.c.l.b16 %v1816_v18  ;;  %v727_v18 = vshll.u32 %v666_v32, 16  ;;  %v722_v51 = vrot.slane %v720_v44, 1 }
  0xf3   :  { %v1053_v9 = vrot.slane %v1051_v26, 1  ;;  %v1117_v2 = vor.u32 %v1116_v33, %v1112_v45  ;;  %v718_v26 = vshrl.u32 %v665_v39, 16  ;;  %v1257_v13 = vsel %vm1253_vm2, %v2334_v6, %v2573_v40 }
  0xf4   :  { %v944_v48 = vpack.c.b16 %v928_v12, %v928_v12  ;;  %v729_v59 = vrot.slane %v727_v18, 1  ;;  %v1782_v12 = vld [vmem:[%s3106_s0 + $0x1cc] sm:$0x1] }
  0xf5   :  { %v1054_v23 = vor.u32 %v1053_v9, %v1049_v62  ;;  %v723_v19 = vor.u32 %v722_v51, %v718_v26 }
  0xf6   :  { %1143 = vrot.lane.b32.xlu2 %v1047_v43, %s1956_s20  ;;  %893 = vrot.lane.b32.xlu1 %v864_v50, %s1955_s9  ;;  %v585_v43 = vpack.c.b16 %v569_v34, %v569_v34  ;;  %v1124_v50 = vor.u32 %v1123_v24, %v1119_v7  ;;  %v730_v38 = vor.u32 %v729_v59, %v725_v47  ;;  %v573_v24 = vunpack.c.l.b16 %v1765_v8 }
  0xf7   :  { %891 = vrot.lane.b32.xlu0 %v863_v46, %s1955_s9  ;;  %v1762_v46 = vld [vmem:[%s3106_s0 + $0x110] sm:$0xf] }
  0xf8   :  { %v2700_v55 = vpop.permute.xlu2 %605  ;;  %v598_v49 = vpop.permute.xlu1 %597  ;;  %v570_v56 = vunpack.c.l.b16 %v1762_v46  ;;  %v589_v46 = vpack.c.b16 %v573_v24, %v573_v24 }
  0xf9   :  { %v596_v29 = vpop.permute.xlu0 %595  ;;  %v1290_v17 = vsel %vm1286_vm4, %v1257_v13, %v598_v49  ;;  %v669_v49 = vpack.c.b16 %v653_v63, %v2251_v5  ;;  %v1001_v63 = vunpack.c.l.b16 %v1825_v1 }
  0xfa   :  { %v1288_v21 = vsel %vm1286_vm4, %v2466_v22, %v596_v29  ;;  %v586_v29 = vpack.c.b16 %v570_v56, %v570_v56 }
  0xfb   :  { %v1321_v22 = vsel %vm1319_vm5, %v1288_v21, %v2619_v30  ;;  %v574_v30 = vunpack.c.l.b16 %v1766_v20  ;;  %v748_v18 = vshll.u32 %v669_v49, 16  ;;  %v746_v26 = vshrl.u32 %v669_v49, 16 }
  0xfd   :  { %v590_v5 = vpack.c.b16 %v574_v30, %v574_v30  ;;  %v750_v51 = vrot.slane %v748_v18, 1 }
  0xfe   :  { %973 = vrot.lane.b32.xlu2 %v944_v48, %s1957_s21  ;;  %971 = vrot.lane.b32.xlu1 %v943_v52, %s1957_s21  ;;  %v1793_v48 = vld [vmem:[%s3106_s0 + $0x38] sm:$0xf]  ;;  %v654_v52 = vunpack.c.l.b16 %v1782_v12  ;;  %v1826_v12 = vld [vmem:[%s3106_s0 + $0x44] sm:$0x1] }
  0xff   :  { %1145 = vrot.lane.b32.xlu0 %v1054_v23, %s1956_s20  ;;  %v841_v40 = vunpack.c.l.b16 %v1793_v48  ;;  %v1797_v48 = vld [vmem:[%s3106_s0 + $0x138] sm:$0xf] }
 0x100   :  { %v2710_v27 = vpop.permute.xlu2 %611  ;;  %v868_v28 = vpop.permute.xlu1 %867  ;;  %v670_v7 = vpack.c.b16 %v654_v52, %v2248_v4  ;;  %v1002_v52 = vunpack.c.l.b16 %v1826_v12  ;;  %v845_v20 = vunpack.c.l.b16 %v1797_v48  ;;  %v1814_v12 = vld [vmem:[%s3106_s0 + $0x188] sm:$0xf] }
 0x101   :  { %v790_v41 = vpop.permute.xlu0 %789  ;;  %v1354_v23 = vsel %vm1352_vm6, %v1321_v22, %v868_v28  ;;  %v1810_v22 = vld [vmem:[%s3106_s0 + $0x88] sm:$0xf]  ;;  %v1017_v8 = vpack.c.b16 %v1001_v63, %v841_v40  ;;  %v1786_v63 = vld [vmem:[%s3106_s0 + $0x1ec] sm:$0x1] }
 0x102   :  { %v1323_v34 = vsel %vm1319_vm5, %v1290_v17, %v790_v41  ;;  %v753_v47 = vshrl.u32 %v670_v7, 16  ;;  %v922_v17 = vunpack.c.l.b16 %v1810_v22  ;;  %v861_v24 = vpack.c.b16 %v845_v20, %v845_v20 }
 0x103   :  { %v1356_v39 = vsel %vm1352_vm6, %v1323_v34, %v2641_v11  ;;  %v1794_v11 = vld [vmem:[%s3106_s0 + $0x40] sm:$0xf] }
 0x104   :  { %v842_v56 = vunpack.c.l.b16 %v1794_v11 }
 0x106   :  { %607 = vrot.lane.b32.xlu2 %v585_v43, %s1954_s28  ;;  %1165 = vrot.lane.b32.xlu1 %v1124_v50, %s1956_s20  ;;  %v857_v43 = vpack.c.b16 %v841_v40, %v841_v40  ;;  %v755_v50 = vshll.u32 %v670_v7, 16  ;;  %v858_v13 = vpack.c.b16 %v842_v56, %v842_v56  ;;  %v1798_v40 = vld [vmem:[%s3106_s0 + $0x140] sm:$0xf] }
 0x107   :  { %1163 = vrot.lane.b32.xlu0 %v1117_v2, %s1956_s20 }
 0x108   :  { %v2726_v62 = vpop.permute.xlu2 %877  ;;  %v950_v9 = vpop.permute.xlu1 %949  ;;  %v757_v59 = vrot.slane %v755_v50, 1  ;;  %v1070_v50 = vshrl.u32 %v1017_v8, 16 }
 0x109   :  { %v948_v10 = vpop.permute.xlu0 %947  ;;  %v1389_v28 = vsel %vm1385_vm7, %v1356_v39, %v950_v9 }
 0x10a   :  { %v1387_v6 = vsel %vm1385_vm7, %v1354_v23, %v948_v10  ;;  %v1018_v23 = vpack.c.b16 %v1002_v52, %v842_v56  ;;  %v926_v52 = vunpack.c.l.b16 %v1814_v12 }
 0x10b   :  { %v1420_v32 = vsel %vm1418_vm8, %v1387_v6, %v2669_v31  ;;  %v1829_v6 = vld [vmem:[%s3106_s0 + $0x13c] sm:$0x1] }
 0x10c   :  { %v1472_v44 = vunpack.c.l.b16 %v1420_v32  ;;  %v938_v32 = vpack.c.b16 %v922_v17, %v922_v17  ;;  %v1079_v39 = vshll.u32 %v1018_v23, 16  ;;  %v1785_v17 = vld [vmem:[%s3106_s0 + $0x1e4] sm:$0x1] }
 0x10e   :  { %801 = vrot.lane.b32.xlu2 %v730_v38, %s1953_s27  ;;  %799 = vrot.lane.b32.xlu1 %v723_v19, %s1953_s27  ;;  %v758_v38 = vor.u32 %v757_v59, %v753_v47  ;;  %v751_v19 = vor.u32 %v750_v51, %v746_v26 }
 0x10f   :  { %609 = vrot.lane.b32.xlu0 %v586_v29, %s1954_s28  ;;  %v1809_v29 = vld [vmem:[%s3106_s0 + $0x80] sm:$0xf] }
 0x110   :  { %v2755_v45 = vpop.permute.xlu2 %955  ;;  %v2757_v33 = vpop.permute.xlu1 %603  ;;  %v921_v34 = vunpack.c.l.b16 %v1809_v29 }
 0x111   :  { %v1142_v41 = vpop.permute.xlu0 %1141 }
 0x112   :  { %v1422_v4 = vsel %vm1418_vm8, %v1389_v28, %v1142_v41  ;;  %v1072_v28 = vshll.u32 %v1017_v8, 16  ;;  %v1005_v41 = vunpack.c.l.b16 %v1829_v6  ;;  %v658_v8 = vunpack.c.l.b16 %v1786_v63 }
 0x113   :  { %v1473_v2 = vunpack.c.l.b16 %v1422_v4  ;;  %v1077_v4 = vshrl.u32 %v1018_v23, 16  ;;  %v942_v6 = vpack.c.b16 %v926_v52, %v926_v52 }
 0x114   :  { %v1074_v18 = vrot.slane %v1072_v28, 1  ;;  %v1770_v28 = vld [vmem:[%s3106_s0 + $0x230] sm:$0xf] }
 0x115   :  { %v1488_v31 = vpack.c.b16 %v1473_v2, %v1472_v44  ;;  %v1021_v44 = vpack.c.b16 %v1005_v41, %v845_v20  ;;  %v846_v2 = vunpack.c.l.b16 %v1798_v40  ;;  %v1769_v41 = vld [vmem:[%s3106_s0 + $0x228] sm:$0xf]  ;;  %v1296_v40 = vsel %vm1286_vm4, %v2604_v3, %v2757_v33 }
 0x116   :  { %879 = vrot.lane.b32.xlu2 %v857_v43, %s1955_s9  ;;  %617 = vrot.lane.b32.xlu1 %v590_v5, %s1954_s28  ;;  %v937_v43 = vpack.c.b16 %v921_v34, %v921_v34  ;;  %v1081_v5 = vrot.slane %v1079_v39, 1  ;;  %v1075_v26 = vor.u32 %v1074_v18, %v1070_v50  ;;  %v578_v50 = vunpack.c.l.b16 %v1770_v28 }
 0x117   :  { %615 = vrot.lane.b32.xlu0 %v589_v46, %s1954_s28  ;;  %1907 = vmatmul.msk.bf16.vlgmr.msra.gmra.mxu0 %vm1511_vm9, %v1488_v31  ;;  %v1830_v31 = vld [vmem:[%s3106_s0 + $0x144] sm:$0x1]  ;;  %v1100_v51 = vshll.u32 %v1021_v44, 16  ;;  %v862_v56 = vpack.c.b16 %v846_v2, %v846_v2  ;;  %v577_v18 = vunpack.c.l.b16 %v1769_v41 }
 0x118   :  { %v2774_v21 = vpop.permute.xlu2 %885  ;;  %v2776_v9 = vpop.permute.xlu1 %797  ;;  %v1082_v59 = vor.u32 %v1081_v5, %v1077_v4  ;;  %v1006_v1 = vunpack.c.l.b16 %v1830_v31 }
 0x119   :  { %v2778_v10 = vpop.permute.xlu0 %795  ;;  %v1102_v48 = vrot.slane %v1100_v51, 1  ;;  %v593_v12 = vpack.c.b16 %v577_v18, %v577_v18 }
 0x11a   :  { %v1022_v22 = vpack.c.b16 %v1006_v1, %v846_v2 }
 0x11c   :  { %v1107_v39 = vshll.u32 %v1022_v22, 16  ;;  %v1105_v3 = vshrl.u32 %v1022_v22, 16 }
 0x11e   :  { %809 = vrot.lane.b32.xlu2 %v758_v38, %s1953_s27  ;;  %807 = vrot.lane.b32.xlu1 %v751_v19, %s1953_s27  ;;  %v1813_v38 = vld [vmem:[%s3106_s0 + $0x180] sm:$0xf]  ;;  %v1098_v19 = vshrl.u32 %v1021_v44, 16  ;;  %v1109_v33 = vrot.slane %v1107_v39, 1 }
 0x11f   :  { %881 = vrot.lane.b32.xlu0 %v858_v13, %s1955_s9  ;;  %v925_v13 = vunpack.c.l.b16 %v1813_v38 }
 0x120   :  { %v2795_v30 = vpop.permute.xlu2 %963  ;;  %v876_v7 = vpop.permute.xlu1 %875  ;;  %v1103_v34 = vor.u32 %v1102_v48, %v1098_v19  ;;  %v1110_v38 = vor.u32 %v1109_v33, %v1105_v3 }
 0x121   :  { %v2797_v49 = vpop.permute.xlu0 %613 }
 0x126   :  { %887 = vrot.lane.b32.xlu2 %v861_v24, %s1955_s9  ;;  %961 = vrot.lane.b32.xlu1 %v938_v32, %s1957_s21  ;;  %v1298_v24 = vsel %vm1286_vm4, %v2600_v14, %v2700_v55  ;;  %v941_v32 = vpack.c.b16 %v925_v13, %v925_v13  ;;  %v1329_v14 = vsel %vm1319_vm5, %v1296_v40, %v2778_v10 }
 0x127   :  { %959 = vrot.lane.b32.xlu0 %v937_v43, %s1957_s21  ;;  %v657_v43 = vunpack.c.l.b16 %v1785_v17  ;;  %v1331_v4 = vsel %vm1319_vm5, %v1298_v24, %v2776_v9  ;;  %v674_v55 = vpack.c.b16 %v658_v8, %v2275_v15  ;;  %v1362_v5 = vsel %vm1352_vm6, %v1329_v14, %v876_v7  ;;  %v1801_v17 = vld [vmem:[%s3106_s0 + $0x158] sm:$0xf]  ;;  %v1818_v14 = vld [vmem:[%s3106_s0 + $0x1a8] sm:$0xf] }
 0x128   :  { %v2805_v46 = vpop.permute.xlu2 %1157  ;;  %v2807_v11 = vpop.permute.xlu1 %805  ;;  %v1364_v44 = vsel %vm1352_vm6, %v1331_v4, %v2726_v62  ;;  %v1395_v7 = vsel %vm1385_vm7, %v1362_v5, %v2755_v45  ;;  %v1306_v45 = vsel %vm1286_vm4, %v2554_v25, %v2797_v49  ;;  %v1834_v49 = vld [vmem:[%s3106_s0 + $0x164] sm:$0x1] }
 0x129   :  { %v804_v47 = vpop.permute.xlu0 %803  ;;  %v673_v9 = vpack.c.b16 %v657_v43, %v2277_v16  ;;  %v1304_v16 = vsel %vm1286_vm4, %v2623_v53, %v2710_v27  ;;  %v781_v13 = vshrl.u32 %v674_v55, 16  ;;  %v1339_v53 = vsel %vm1319_vm5, %v1306_v45, %v2807_v11  ;;  %v1833_v11 = vld [vmem:[%s3106_s0 + $0x15c] sm:$0x1] }
 0x12a   :  { %v1337_v48 = vsel %vm1319_vm5, %v1304_v16, %v804_v47  ;;  %v1010_v28 = vunpack.c.l.b16 %v1834_v49  ;;  %v1009_v4 = vunpack.c.l.b16 %v1833_v11 }
 0x12b   :  { %v776_v19 = vshll.u32 %v673_v9, 16  ;;  %v774_v25 = vshrl.u32 %v673_v9, 16 }
 0x12d   :  { %v778_v27 = vrot.slane %v776_v19, 1 }
 0x12e   :  { %1153 = vrot.lane.b32.xlu2 %v1082_v59, %s1956_s20  ;;  %1151 = vrot.lane.b32.xlu1 %v1075_v26, %s1956_s20  ;;  %v783_v59 = vshll.u32 %v674_v55, 16 }
 0x12f   :  { %889 = vrot.lane.b32.xlu0 %v862_v56, %s1955_s9  ;;  %v594_v56 = vpack.c.b16 %v578_v50, %v578_v50  ;;  %v779_v40 = vor.u32 %v778_v27, %v774_v25 }
 0x130   :  { %v2824_v29 = vpop.permute.xlu2 %791  ;;  %v884_v20 = vpop.permute.xlu1 %883  ;;  %v785_v22 = vrot.slane %v783_v59, 1 }
 0x131   :  { %v958_v23 = vpop.permute.xlu0 %957  ;;  %v1370_v52 = vsel %vm1352_vm6, %v1337_v48, %v884_v20 }
 0x132   :  { %v1397_v10 = vsel %vm1385_vm7, %v1364_v44, %v958_v23  ;;  %v1403_v47 = vsel %vm1385_vm7, %v1370_v52, %v2795_v30  ;;  %v849_v23 = vunpack.c.l.b16 %v1801_v17  ;;  %v786_v24 = vor.u32 %v785_v22, %v781_v13 }
 0x134   :  { %v865_v41 = vpack.c.b16 %v849_v23, %v849_v23  ;;  %v1025_v33 = vpack.c.b16 %v1009_v4, %v849_v23 }
 0x136   :  { %1159 = vrot.lane.b32.xlu2 %v1103_v34, %s1956_s20  ;;  %969 = vrot.lane.b32.xlu1 %v942_v6, %s1957_s21  ;;  %v1372_v34 = vsel %vm1352_vm6, %v1339_v53, %v2774_v21  ;;  %v1817_v21 = vld [vmem:[%s3106_s0 + $0x1a0] sm:$0xf]  ;;  %v1128_v59 = vshll.u32 %v1025_v33, 16 }
 0x137   :  { %967 = vrot.lane.b32.xlu0 %v941_v32, %s1957_s21  ;;  %v1802_v32 = vld [vmem:[%s3106_s0 + $0x160] sm:$0xf]  ;;  %v929_v44 = vunpack.c.l.b16 %v1817_v21 }
 0x138   :  { %v1150_v15 = vpop.permute.xlu1 %1149  ;;  %v2858_v51 = vpop.permute.xlu2 %621  ;;  %v850_v50 = vunpack.c.l.b16 %v1802_v32  ;;  %v1130_v16 = vrot.slane %v1128_v59, 1 }
 0x139   :  { %v1148_v2 = vpop.permute.xlu0 %1147  ;;  %v1430_v31 = vsel %vm1418_vm8, %v1397_v10, %v1150_v15  ;;  %v945_v15 = vpack.c.b16 %v929_v44, %v929_v44 }
 0x13a   :  { %v1428_v26 = vsel %vm1418_vm8, %v1395_v7, %v1148_v2  ;;  %v1477_v62 = vunpack.c.l.b16 %v1430_v31  ;;  %v1026_v3 = vpack.c.b16 %v1010_v28, %v850_v50  ;;  %v866_v31 = vpack.c.b16 %v850_v50, %v850_v50 }
 0x13b   :  { %v1476_v1 = vunpack.c.l.b16 %v1428_v26 }
 0x13c   :  { %v1135_v2 = vshll.u32 %v1026_v3, 16 }
 0x13d   :  { %v1490_v63 = vpack.c.b16 %v1477_v62, %v1476_v1  ;;  %v1133_v62 = vshrl.u32 %v1026_v3, 16 }
 0x13e   :  { %625 = vrot.lane.b32.xlu2 %v594_v56, %s1954_s28  ;;  %623 = vrot.lane.b32.xlu1 %v593_v12, %s1954_s28  ;;  %v1137_v56 = vrot.slane %v1135_v2, 1  ;;  %v1126_v12 = vshrl.u32 %v1025_v33, 16 }
 0x13f   :  { %1161 = vrot.lane.b32.xlu0 %v1110_v38, %s1956_s20  ;;  %1909 = vmatmul.msk.bf16.vlgmr.msra.gmra.mxu1 %vm1511_vm9, %v1490_v63 }
 0x140   :  { %v1156_v20 = vpop.permute.xlu1 %1155  ;;  %v812_v5 = vpop.permute.xlu2 %811  ;;  %v1138_v19 = vor.u32 %v1137_v56, %v1133_v62  ;;  %v1131_v45 = vor.u32 %v1130_v16, %v1126_v12 }
 0x141   :  { %v966_v8 = vpop.permute.xlu0 %965  ;;  %v1436_v6 = vsel %vm1418_vm8, %v1403_v47, %v1156_v20 }
 0x142   :  { %v1405_v39 = vsel %vm1385_vm7, %v1372_v34, %v966_v8  ;;  %v1480_v30 = vunpack.c.l.b16 %v1436_v6 }
 0x143   :  { %v1438_v43 = vsel %vm1418_vm8, %v1405_v39, %v2805_v46  ;;  %v930_v46 = vunpack.c.l.b16 %v1818_v14 }
 0x144   :  { %v1481_v55 = vunpack.c.l.b16 %v1438_v43 }
 0x145   :  { %v946_v7 = vpack.c.b16 %v930_v46, %v930_v46 }
 0x146   :  { %817 = vrot.lane.b32.xlu1 %v786_v24, %s1953_s27  ;;  %v1492_v18 = vpack.c.b16 %v1481_v55, %v1480_v30  ;;  %895 = vrot.lane.b32.xlu2 %v865_v41, %s1955_s9 }
 0x147   :  { %815 = vrot.lane.b32.xlu0 %v779_v40, %s1953_s27 }
 0x148   :  { %1911 = vmatmul.msk.bf16.vlgmr.msra.gmra.mxu2 %vm1511_vm9, %v1492_v18  ;;  %v602_v9 = vpop.permute.xlu1 %601  ;;  %v954_v26 = vpop.permute.xlu2 %953 }
 0x149   :  { %v600_v10 = vpop.permute.xlu0 %599  ;;  %v1294_v47 = vsel %vm1286_vm4, %v2501_v61, %v602_v9  ;;  %v1314_v61 = vsel %vm1286_vm4, %v2680_v57, %v2858_v51 }
 0x14a   :  { %v1292_v53 = vsel %vm1286_vm4, %v2580_v54, %v600_v10 }
 0x14b   :  { %v1325_v49 = vsel %vm1319_vm5, %v1292_v53, %v2824_v29 }
 0x14e   :  { %975 = vrot.lane.b32.xlu1 %v945_v15, %s1957_s21  ;;  %977 = vrot.lane.b32.xlu2 %v946_v7, %s1957_s21 }
 0x14f   :  { %897 = vrot.lane.b32.xlu0 %v866_v31, %s1955_s9 }
 0x150   :  { %v620_v1 = vpop.permute.xlu1 %619  ;;  %v1144_v48 = vpop.permute.xlu2 %1143 }
 0x151   :  { %v794_v38 = vpop.permute.xlu0 %793  ;;  %v1312_v28 = vsel %vm1286_vm4, %v2576_v60, %v620_v1 }
 0x152   :  { %v1327_v23 = vsel %vm1319_vm5, %v1294_v47, %v794_v38  ;;  %v1345_v4 = vsel %vm1319_vm5, %v1312_v28, %v812_v5 }
 0x156   :  { %1169 = vrot.lane.b32.xlu1 %v1138_v19, %s1956_s20 }
 0x157   :  { %1167 = vrot.lane.b32.xlu0 %v1131_v45, %s1956_s20 }
 0x158   :  { %v874_v52 = vpop.permute.xlu1 %873  ;;  %v974_v17 = vpop.permute.xlu2 %973 }
 0x159   :  { %v872_v63 = vpop.permute.xlu0 %871  ;;  %v1360_v34 = vsel %vm1352_vm6, %v1327_v23, %v874_v52 }
 0x15a   :  { %v1358_v20 = vsel %vm1352_vm6, %v1325_v49, %v872_v63  ;;  %v1393_v32 = vsel %vm1385_vm7, %v1360_v34, %v954_v26 }
 0x160   :  { %v952_v13 = vpop.permute.xlu1 %951  ;;  %v608_v11 = vpop.permute.xlu2 %607 }
 0x161   :  { %v814_v22 = vpop.permute.xlu0 %813  ;;  %v1391_v8 = vsel %vm1385_vm7, %v1358_v20, %v952_v13  ;;  %v1300_v38 = vsel %vm1286_vm4, %v2527_v35, %v608_v11 }
 0x162   :  { %v1424_v6 = vsel %vm1418_vm8, %v1391_v8, %v1144_v48  ;;  %v1347_v41 = vsel %vm1319_vm5, %v1314_v61, %v814_v22 }
 0x163   :  { %v1474_v39 = vunpack.c.l.b16 %v1424_v6 }
 0x168   :  { %v894_v25 = vpop.permute.xlu1 %893  ;;  %v802_v21 = vpop.permute.xlu2 %801 }
 0x169   :  { %v892_v27 = vpop.permute.xlu0 %891  ;;  %v1380_v43 = vsel %vm1352_vm6, %v1347_v41, %v894_v25 }
 0x16a   :  { %v1378_v14 = vsel %vm1352_vm6, %v1345_v4, %v892_v27  ;;  %v1413_v55 = vsel %vm1385_vm7, %v1380_v43, %v974_v17 }
 0x170   :  { %v972_v54 = vpop.permute.xlu1 %971  ;;  %v880_v5 = vpop.permute.xlu2 %879 }
 0x171   :  { %v1146_v24 = vpop.permute.xlu0 %1145  ;;  %v1411_v51 = vsel %vm1385_vm7, %v1378_v14, %v972_v54 }
 0x172   :  { %v1426_v29 = vsel %vm1418_vm8, %v1393_v32, %v1146_v24 }
 0x173   :  { %v1475_v30 = vunpack.c.l.b16 %v1426_v29 }
 0x175   :  { %v1489_v40 = vpack.c.b16 %v1475_v30, %v1474_v39 }
 0x177   :  { %1908 = vmatmul.msk.bf16.gmra.mxu0 %vm1511_vm9, %v1489_v40 }
 0x178   :  { %v1166_v57 = vpop.permute.xlu1 %1165  ;;  %v810_v2 = vpop.permute.xlu2 %809 }
 0x179   :  { %v1164_v50 = vpop.permute.xlu0 %1163  ;;  %v1446_v60 = vsel %vm1418_vm8, %v1413_v55, %v1166_v57 }
 0x17a   :  { %v1444_v18 = vsel %vm1418_vm8, %v1411_v51, %v1164_v50  ;;  %v1485_v44 = vunpack.c.l.b16 %v1446_v60 }
 0x17b   :  { %v1484_v3 = vunpack.c.l.b16 %v1444_v18 }
 0x17d   :  { %v1494_v46 = vpack.c.b16 %v1485_v44, %v1484_v3 }
 0x17f   :  { %1913 = vmatmul.msk.bf16.vlgmr.msra.gmra.mxu3 %vm1511_vm9, %v1494_v46 }
 0x180   :  { %v800_v33 = vpop.permute.xlu1 %799  ;;  %v888_v59 = vpop.permute.xlu2 %887 }
 0x181   :  { %v610_v9 = vpop.permute.xlu0 %609  ;;  %v1333_v45 = vsel %vm1319_vm5, %v1300_v38, %v800_v33 }
 0x182   :  { %v1302_v56 = vsel %vm1286_vm4, %v2627_v42, %v610_v9  ;;  %v1366_v13 = vsel %vm1352_vm6, %v1333_v45, %v880_v5 }
 0x183   :  { %v1335_v1 = vsel %vm1319_vm5, %v1302_v56, %v802_v21 }
 0x188   :  { %v618_v10 = vpop.permute.xlu1 %617  ;;  %v1154_v63 = vpop.permute.xlu2 %1153 }
 0x189   :  { %v616_v15 = vpop.permute.xlu0 %615  ;;  %v1310_v6 = vsel %vm1286_vm4, %v2648_v0, %v618_v10 }
 0x18a   :  { %v1308_v20 = vsel %vm1286_vm4, %v2652_v58, %v616_v15  ;;  %v1343_v32 = vsel %vm1319_vm5, %v1310_v6, %v810_v2 }
 0x190   :  { %v808_v7 = vpop.permute.xlu1 %807  ;;  %v1160_v23 = vpop.permute.xlu2 %1159 }
 0x191   :  { %v882_v31 = vpop.permute.xlu0 %881  ;;  %v1341_v8 = vsel %vm1319_vm5, %v1308_v20, %v808_v7 }
 0x192   :  { %v1368_v19 = vsel %vm1352_vm6, %v1335_v1, %v882_v31  ;;  %v1374_v54 = vsel %vm1352_vm6, %v1341_v8, %v888_v59 }
 0x194   :  { %v2937_v26 = vpop.f32.mrf.mxu0 }
 0x195   :  { %v1589_v62 = vpack.c.bf16 %v2937_v26, %v2937_v26  ;;  %v1661_v45 = vmul.f32 %v2937_v26, %v2937_v26 }
 0x197   :  { %1606 = vst.msk [vmem:[%s3108_s2] sm:$0xf] %vm1605_vm10, %v1589_v62 }
 0x198   :  { %v962_v12 = vpop.permute.xlu1 %961  ;;  %v626_v41 = vpop.permute.xlu2 %625 }
 0x199   :  { %v960_v16 = vpop.permute.xlu0 %959  ;;  %v1401_v48 = vsel %vm1385_vm7, %v1368_v19, %v962_v12  ;;  %v1318_v60 = vsel %vm1286_vm4, %v2596_v37, %v626_v41 }
 0x19a   :  { %v1434_v22 = vsel %vm1418_vm8, %v1401_v48, %v1154_v63  ;;  %v1399_v35 = vsel %vm1385_vm7, %v1366_v13, %v960_v16 }
 0x19b   :  { %v1479_v27 = vunpack.c.l.b16 %v1434_v22 }
 0x19c   :  { %v2953_v52 = vpop.f32.mrf.mxu0 }
 0x19d   :  { %v1590_v42 = vpack.c.bf16 %v2953_v52, %v2953_v52  ;;  %v1662_v19 = vmul.f32 %v2953_v52, %v2953_v52  ;;  %v1623_v48 = vsel %vm1220_vm0, %v2953_v52, 0.0 }
 0x19f   :  { %1607 = vst.msk [vmem:[%s3108_s2 + $0x4] sm:$0xf] %vm1605_vm10, %v1590_v42  ;;  %v1622_v42 = vsel %vm1220_vm0, %v2937_v26, 0.0  ;;  %v1678_v63 = vsel %vm1220_vm0, %v1662_v19, 0.0 }
 0x1a0   :  { %v1152_v17 = vpop.permute.xlu1 %1151  ;;  %v896_v14 = vpop.permute.xlu2 %895  ;;  %v1624_v13 = vadd.f32 %v1623_v48, %v1622_v42 }
 0x1a1   :  { %v890_v53 = vpop.permute.xlu0 %889  ;;  %v1432_v25 = vsel %vm1418_vm8, %v1399_v35, %v1152_v17  ;;  %v1677_v35 = vsel %vm1220_vm0, %v1661_v45, 0.0 }
 0x1a2   :  { %v1478_v49 = vunpack.c.l.b16 %v1432_v25  ;;  %v1376_v29 = vsel %vm1352_vm6, %v1343_v32, %v890_v53 }
 0x1a4   :  { %v1491_v47 = vpack.c.b16 %v1479_v27, %v1478_v49  ;;  %v1679_v27 = vadd.f32 %v1678_v63, %v1677_v35 }
 0x1a6   :  { %1910 = vmatmul.msk.bf16.gmra.mxu1 %vm1511_vm9, %v1491_v47 }
 0x1a8   :  { %v970_v11 = vpop.permute.xlu1 %969  ;;  %v978_v33 = vpop.permute.xlu2 %977 }
 0x1a9   :  { %v968_v34 = vpop.permute.xlu0 %967  ;;  %v1409_v58 = vsel %vm1385_vm7, %v1376_v29, %v970_v11 }
 0x1aa   :  { %v1407_v24 = vsel %vm1385_vm7, %v1374_v54, %v968_v34 }
 0x1ab   :  { %v1440_v61 = vsel %vm1418_vm8, %v1407_v24, %v1160_v23 }
 0x1ac   :  { %v1482_v43 = vunpack.c.l.b16 %v1440_v61 }
 0x1b0   :  { %v624_v39 = vpop.permute.xlu1 %623 }
 0x1b1   :  { %v1162_v30 = vpop.permute.xlu0 %1161  ;;  %v1316_v18 = vsel %vm1286_vm4, %v2676_v36, %v624_v39 }
 0x1b2   :  { %v1442_v28 = vsel %vm1418_vm8, %v1409_v58, %v1162_v30 }
 0x1b3   :  { %v1483_v40 = vunpack.c.l.b16 %v1442_v28 }
 0x1b5   :  { %v1493_v0 = vpack.c.b16 %v1483_v40, %v1482_v43 }
 0x1b7   :  { %1912 = vmatmul.msk.bf16.gmra.mxu2 %vm1511_vm9, %v1493_v0 }
 0x1b8   :  { %v818_v21 = vpop.permute.xlu1 %817 }
 0x1b9   :  { %v816_v4 = vpop.permute.xlu0 %815  ;;  %v1351_v44 = vsel %vm1319_vm5, %v1318_v60, %v818_v21 }
 0x1ba   :  { %v1349_v46 = vsel %vm1319_vm5, %v1316_v18, %v816_v4 }
 0x1bb   :  { %v1382_v37 = vsel %vm1352_vm6, %v1349_v46, %v896_v14 }
 0x1bc   :  { %v1559_v55 = vpop.f32.mrf.mxu1 }
 0x1bd   :  { %v1593_v57 = vpack.c.bf16 %v1559_v55, %v1559_v55  ;;  %v1665_v20 = vmul.f32 %v1559_v55, %v1559_v55  ;;  %v1629_v6 = vsel %vm1220_vm0, %v1559_v55, 0.0 }
 0x1bf   :  { %1610 = vst.msk [vmem:[%s3108_s2 + $0x10] sm:$0xf] %vm1605_vm10, %v1593_v57  ;;  %v1684_v29 = vsel %vm1220_vm0, %v1665_v20, 0.0 }
 0x1c0   :  { %v976_v51 = vpop.permute.xlu1 %975 }
 0x1c1   :  { %v898_v50 = vpop.permute.xlu0 %897  ;;  %v1415_v15 = vsel %vm1385_vm7, %v1382_v37, %v976_v51 }
 0x1c2   :  { %v1384_v5 = vsel %vm1352_vm6, %v1351_v44, %v898_v50 }
 0x1c3   :  { %v1417_v36 = vsel %vm1385_vm7, %v1384_v5, %v978_v33 }
 0x1c4   :  { %v2988_v3 = vpop.f32.mrf.mxu1 }
 0x1c5   :  { %v1594_v9 = vpack.c.bf16 %v2988_v3, %v2988_v3  ;;  %v1666_v40 = vmul.f32 %v2988_v3, %v2988_v3  ;;  %v1631_v21 = vsel %vm1220_vm0, %v2988_v3, 0.0 }
 0x1c7   :  { %1611 = vst.msk [vmem:[%s3108_s2 + $0x14] sm:$0xf] %vm1605_vm10, %v1594_v9  ;;  %v1686_v55 = vsel %vm1220_vm0, %v1666_v40, 0.0 }
 0x1c8   :  { %v1170_v10 = vpop.permute.xlu1 %1169 }
 0x1c9   :  { %v1168_v2 = vpop.permute.xlu0 %1167  ;;  %v1450_v7 = vsel %vm1418_vm8, %v1417_v36, %v1170_v10 }
 0x1ca   :  { %v1448_v31 = vsel %vm1418_vm8, %v1415_v15, %v1168_v2  ;;  %v1487_v59 = vunpack.c.l.b16 %v1450_v7 }
 0x1cb   :  { %v1486_v62 = vunpack.c.l.b16 %v1448_v31  ;;  %v1569_v56 = vpop.f32.mrf.mxu2 }
 0x1cc   :  { %v1597_v12 = vpack.c.bf16 %v1569_v56, %v1569_v56  ;;  %v1669_v18 = vmul.f32 %v1569_v56, %v1569_v56  ;;  %v1637_v37 = vsel %vm1220_vm0, %v1569_v56, 0.0 }
 0x1cd   :  { %v1495_v16 = vpack.c.b16 %v1487_v59, %v1486_v62 }
 0x1ce   :  { %1614 = vst.msk [vmem:[%s3108_s2 + $0x20] sm:$0xf] %vm1605_vm10, %v1597_v12  ;;  %v1692_v15 = vsel %vm1220_vm0, %v1669_v18, 0.0 }
 0x1cf   :  { %1914 = vmatmul.msk.bf16.gmra.mxu3 %vm1511_vm9, %v1495_v16 }
 0x1d3   :  { %v3008_v1 = vpop.f32.mrf.mxu2 }
 0x1d4   :  { %v1598_v38 = vpack.c.bf16 %v3008_v1, %v3008_v1  ;;  %v1670_v59 = vmul.f32 %v3008_v1, %v3008_v1  ;;  %v1639_v56 = vsel %vm1220_vm0, %v3008_v1, 0.0 }
 0x1d6   :  { %1615 = vst.msk [vmem:[%s3108_s2 + $0x24] sm:$0xf] %vm1605_vm10, %v1598_v38  ;;  %v1694_v38 = vsel %vm1220_vm0, %v1670_v59, 0.0 }
 0x1f4   :  { %v1554_v22 = vpop.f32.mrf.mxu0 }
 0x1f5   :  { %v1591_v17 = vpack.c.bf16 %v1554_v22, %v1554_v22  ;;  %v1625_v53 = vsel %vm1220_vm0, %v1554_v22, 0.0  ;;  %v1663_v25 = vmul.f32 %v1554_v22, %v1554_v22 }
 0x1f6   :  { %v1626_v49 = vadd.f32 %v1625_v53, %v1624_v13 }
 0x1f7   :  { %1608 = vst.msk [vmem:[%s3108_s2 + $0x8] sm:$0xf] %vm1605_vm10, %v1591_v17  ;;  %v1680_v52 = vsel %vm1220_vm0, %v1663_v25, 0.0 }
 0x1f8   :  { %v1681_v26 = vadd.f32 %v1680_v52, %v1679_v27 }
 0x1fc   :  { %v1556_v47 = vpop.f32.mrf.mxu0 }
 0x1fd   :  { %v1592_v11 = vpack.c.bf16 %v1556_v47, %v1556_v47  ;;  %v1627_v23 = vsel %vm1220_vm0, %v1556_v47, 0.0  ;;  %v1664_v8 = vmul.f32 %v1556_v47, %v1556_v47 }
 0x1fe   :  { %v1628_v34 = vadd.f32 %v1627_v23, %v1626_v49 }
 0x1ff   :  { %1609 = vst.msk [vmem:[%s3108_s2 + $0xc] sm:$0xf] %vm1605_vm10, %v1592_v11  ;;  %v1682_v54 = vsel %vm1220_vm0, %v1664_v8, 0.0 }
 0x200   :  { %v1630_v24 = vadd.f32 %v1629_v6, %v1628_v34  ;;  %v1683_v32 = vadd.f32 %v1682_v54, %v1681_v26 }
 0x202   :  { %v1685_v61 = vadd.f32 %v1684_v29, %v1683_v32  ;;  %v1579_v39 = vpop.f32.mrf.mxu3  ;;  %v1632_v14 = vadd.f32 %v1631_v21, %v1630_v24 }
 0x203   :  { %v1601_v58 = vpack.c.bf16 %v1579_v39, %v1579_v39  ;;  %v1673_v63 = vmul.f32 %v1579_v39, %v1579_v39  ;;  %v1645_v25 = vsel %vm1220_vm0, %v1579_v39, 0.0 }
 0x204   :  { %v1687_v50 = vadd.f32 %v1686_v55, %v1685_v61 }
 0x205   :  { %1618 = vst.msk [vmem:[%s3108_s2 + $0x30] sm:$0xf] %vm1605_vm10, %v1601_v58  ;;  %v1700_v52 = vsel %vm1220_vm0, %v1673_v63, 0.0 }
 0x20a   :  { %v1581_v30 = vpop.f32.mrf.mxu3 }
 0x20b   :  { %v1602_v28 = vpack.c.bf16 %v1581_v30, %v1581_v30  ;;  %v1674_v11 = vmul.f32 %v1581_v30, %v1581_v30  ;;  %v1647_v8 = vsel %vm1220_vm0, %v1581_v30, 0.0 }
 0x20d   :  { %1619 = vst.msk [vmem:[%s3108_s2 + $0x34] sm:$0xf] %vm1605_vm10, %v1602_v28  ;;  %v1702_v54 = vsel %vm1220_vm0, %v1674_v11, 0.0 }
 0x223   :  { %v1564_v41 = vpop.f32.mrf.mxu1 }
 0x224   :  { %v1595_v43 = vpack.c.bf16 %v1564_v41, %v1564_v41  ;;  %v1667_v0 = vmul.f32 %v1564_v41, %v1564_v41  ;;  %v1633_v4 = vsel %vm1220_vm0, %v1564_v41, 0.0 }
 0x225   :  { %v1634_v51 = vadd.f32 %v1633_v4, %v1632_v14 }
 0x226   :  { %1612 = vst.msk [vmem:[%s3108_s2 + $0x18] sm:$0xf] %vm1605_vm10, %v1595_v43  ;;  %v1688_v57 = vsel %vm1220_vm0, %v1667_v0, 0.0 }
 0x227   :  { %v1689_v33 = vadd.f32 %v1688_v57, %v1687_v50 }
 0x22b   :  { %v1566_v60 = vpop.f32.mrf.mxu1 }
 0x22c   :  { %v1596_v44 = vpack.c.bf16 %v1566_v60, %v1566_v60  ;;  %v1635_v46 = vsel %vm1220_vm0, %v1566_v60, 0.0  ;;  %v1668_v5 = vmul.f32 %v1566_v60, %v1566_v60 }
 0x22d   :  { %v1636_v9 = vadd.f32 %v1635_v46, %v1634_v51 }
 0x22e   :  { %1613 = vst.msk [vmem:[%s3108_s2 + $0x1c] sm:$0xf] %vm1605_vm10, %v1596_v44  ;;  %v1690_v3 = vsel %vm1220_vm0, %v1668_v5, 0.0 }
 0x22f   :  { %v1638_v36 = vadd.f32 %v1637_v37, %v1636_v9  ;;  %v1691_v10 = vadd.f32 %v1690_v3, %v1689_v33 }
 0x231   :  { %v1693_v2 = vadd.f32 %v1692_v15, %v1691_v10  ;;  %v1640_v16 = vadd.f32 %v1639_v56, %v1638_v36 }
 0x233   :  { %v1695_v48 = vadd.f32 %v1694_v38, %v1693_v2 }
 0x23a   :  { %v1574_v7 = vpop.f32.mrf.mxu2 }
 0x23b   :  { %v1599_v31 = vpack.c.bf16 %v1574_v7, %v1574_v7  ;;  %v1671_v62 = vmul.f32 %v1574_v7, %v1574_v7  ;;  %v1641_v12 = vsel %vm1220_vm0, %v1574_v7, 0.0 }
 0x23c   :  { %v1642_v45 = vadd.f32 %v1641_v12, %v1640_v16 }
 0x23d   :  { %1616 = vst.msk [vmem:[%s3108_s2 + $0x28] sm:$0xf] %vm1605_vm10, %v1599_v31  ;;  %v1696_v19 = vsel %vm1220_vm0, %v1671_v62, 0.0 }
 0x23e   :  { %v1697_v17 = vadd.f32 %v1696_v19, %v1695_v48 }
 0x242   :  { %v1576_v42 = vpop.f32.mrf.mxu2 }
 0x243   :  { %v1600_v13 = vpack.c.bf16 %v1576_v42, %v1576_v42  ;;  %v1643_v22 = vsel %vm1220_vm0, %v1576_v42, 0.0  ;;  %v1672_v35 = vmul.f32 %v1576_v42, %v1576_v42 }
 0x244   :  { %v1644_v53 = vadd.f32 %v1643_v22, %v1642_v45 }
 0x245   :  { %1617 = vst.msk [vmem:[%s3108_s2 + $0x2c] sm:$0xf] %vm1605_vm10, %v1600_v13  ;;  %v1698_v1 = vsel %vm1220_vm0, %v1672_v35, 0.0 }
 0x246   :  { %v1646_v27 = vadd.f32 %v1645_v25, %v1644_v53  ;;  %v1699_v49 = vadd.f32 %v1698_v1, %v1697_v17 }
 0x248   :  { %v1701_v26 = vadd.f32 %v1700_v52, %v1699_v49  ;;  %v1648_v6 = vadd.f32 %v1647_v8, %v1646_v27 }
 0x24a   :  { %v1703_v29 = vadd.f32 %v1702_v54, %v1701_v26 }
 0x252   :  { %v1584_v47 = vpop.f32.mrf.mxu3 }
 0x253   :  { %v1603_v20 = vpack.c.bf16 %v1584_v47, %v1584_v47  ;;  %v1675_v23 = vmul.f32 %v1584_v47, %v1584_v47  ;;  %v1649_v34 = vsel %vm1220_vm0, %v1584_v47, 0.0 }
 0x254   :  { %v1650_v32 = vadd.f32 %v1649_v34, %v1648_v6 }
 0x255   :  { %1620 = vst.msk [vmem:[%s3108_s2 + $0x38] sm:$0xf] %vm1605_vm10, %v1603_v20  ;;  %v1704_v24 = vsel %vm1220_vm0, %v1675_v23, 0.0 }
 0x256   :  { %v1705_v41 = vadd.f32 %v1704_v24, %v1703_v29 }
 0x25a   :  { %v1586_v61 = vpop.f32.mrf.mxu3 }
 0x25b   :  { %v1604_v39 = vpack.c.bf16 %v1586_v61, %v1586_v61  ;;  %v1651_v58 = vsel %vm1220_vm0, %v1586_v61, 0.0  ;;  %v1676_v28 = vmul.f32 %v1586_v61, %v1586_v61 }
 0x25c   :  { %v1652_v43 = vadd.f32 %v1651_v58, %v1650_v32 }
 0x25d   :  { %1621 = vst.msk [vmem:[%s3108_s2 + $0x3c] sm:$0xf] %vm1605_vm10, %v1604_v39  ;;  %v1706_v30 = vsel %vm1220_vm0, %v1676_v28, 0.0 }
 0x25e   :  { %v1653_v40 = vrot.slane %v1652_v43, 4  ;;  %v1707_v0 = vadd.f32 %v1706_v30, %v1705_v41 }
 0x260   :  { %v1654_v21 = vadd.f32 %v1653_v40, %v1652_v43  ;;  %v1708_v4 = vrot.slane %v1707_v0, 4 }
 0x262   :  { %v1655_v14 = vrot.slane %v1654_v21, 2  ;;  %v1709_v55 = vadd.f32 %v1708_v4, %v1707_v0 }
 0x264   :  { %v1656_v57 = vadd.f32 %v1655_v14, %v1654_v21  ;;  %v1710_v51 = vrot.slane %v1709_v55, 2 }
 0x266   :  { %v1657_v50 = vrot.slane %v1656_v57, 1  ;;  %v1711_v60 = vadd.f32 %v1710_v51, %v1709_v55 }
 0x268   :  { %v1658_v18 = vadd.f32 %v1657_v50, %v1656_v57  ;;  %v1712_v44 = vrot.slane %v1711_v60, 1 }
 0x26a   :  { %1660 = vst.msk [vmem:[%s3109_s3] sm:$0x1] %vm1659_vm11, %v1658_v18  ;;  %v1713_v46 = vadd.f32 %v1712_v44, %v1711_v60 }
 0x26c   :  { %1714 = vst.msk [vmem:[%s3109_s3 + $0x1] sm:$0x1] %vm1659_vm11, %v1713_v46 }

// kernel: _lambda_.5
= control target key start
LH: loop header
LB: loop body
LE: loop exit
PB: predicated region body
PF: predicated region fallthrough
CT: control target
= control target key end

     0   :  { %vm124_vm0 = vcmask 60416   ;;  %vm126_vm1 = vcmask 57344   ;;  %vm137_vm2 = vsmask.f32 256  ;;  %v2367_v0 = vmov 0   ;;  %s2368_s28 = smov 8   ;;  %s3648_s0 = inlined_call_operand.vmem [shape: bf16[2,8,8,8], index: 0, kind: input, shape index: {}]   ;;  %s3649_s1 = inlined_call_operand.vmem [shape: f32[1,8], index: 1, kind: input, shape index: {}]   ;;  %s3650_s2 = inlined_call_operand.vmem [shape: f32[1,8], index: 2, kind: input, shape index: {}]   ;;  %s3651_s3 = inlined_call_operand.vmem [shape: bf16[72,8], index: 3, kind: input, shape index: {}]   ;;  %s3652_s4 = inlined_call_operand.vmem [shape: bf16[2,8,8,8], index: 4, kind: output, shape index: {0}]   ;;  %s3653_s5 = inlined_call_operand.vmem [shape: f32[1,2,8], index: 5, kind: output, shape index: {1}]  }
   0x1   :  { %128 = vst.msk [vmem:[#allocation2 + $0x50] sm:$0xf] %vm124_vm0, %v2367_v0  ;;  %vm2408_vm3 = vmand %vm126_vm1, %vm137_vm2  ;;  %vm187_vm4 = vsmask.f32 7938  ;;  %v2322_v3 = vld [vmem:[%s3648_s0 + $0x8] sm:$0xff]   ;;  %v2291_v13 = vld [vmem:[%s3648_s0] sm:$0xff]  }
   0x2   :  { %129 = vst.msk [vmem:[#allocation2 + $0x54] sm:$0x1] %vm126_vm1, %v2367_v0  ;;  %vm2415_vm5 = vmand %vm126_vm1, %vm187_vm4  ;;  %v2297_v4 = vunpack.c.h.bf16 %v2322_v3  ;;  %v2426_v5 = vld [vmem:[%s3649_s1] ss:$0 sm:$0xff]  ;;  %v2296_v7 = vunpack.c.l.bf16 %v2322_v3  ;;  %v198_v9 = vld [vmem:[#allocation2 + $0x24] sm:$0x1]  ;;  %v2293_v16 = vunpack.c.h.bf16 %v2291_v13  ;;  %v2292_v19 = vunpack.c.l.bf16 %v2291_v13 }
   0x3   :  { %125 = vst.msk [vmem:[#allocation2] sm:$0xf] %vm124_vm0, %v2367_v0  ;;  %v2431_v6 = vld [vmem:[%s3650_s2] ss:$0 sm:$0xff]  ;;  %v199_v12 = vsel %vm2415_vm5, 0, %v198_v9  ;;  %v2323_v14 = vld [vmem:[%s3648_s0 + $0x10] sm:$0xff]   ;;  %vm2487_vm6 = vmand %vm124_vm0, %vm187_vm4 }
   0x4   :  { %127 = vst.msk [vmem:[#allocation2 + $0x4] sm:$0x1] %vm126_vm1, %v2367_v0  ;;  %v148_v8 = vld [vmem:[#allocation2 + $0x20] sm:$0x1]  ;;  %v60_v10 = vmul.f32 %v2426_v5, %v2297_v4  ;;  %v59_v15 = vmul.f32 %v2426_v5, %v2296_v7  ;;  %v142_v17 = vld [vmem:[#allocation2 + $0x10] sm:$0x1]  ;;  %v2300_v20 = vunpack.c.l.bf16 %v2323_v14  ;;  %v2301_v21 = vunpack.c.h.bf16 %v2323_v14 }
   0x5   :  { %131 = vst.msk [vmem:[#allocation2 + $0x48] sm:$0xf] %vm124_vm0, %v2367_v0  ;;  %v149_v11 = vsel %vm2408_vm3, 0, %v148_v8  ;;  %v192_v18 = vld [vmem:[#allocation2 + $0x14] sm:$0x1]  ;;  %v143_v23 = vsel %vm2408_vm3, 0, %v142_v17  ;;  %v58_v28 = vmul.f32 %v2426_v5, %v2293_v16  ;;  %v57_v29 = vmul.f32 %v2426_v5, %v2292_v19 }
   0x6   :  { %132 = vst.msk [vmem:[#allocation2 + $0x4c] sm:$0x1] %vm126_vm1, %v2367_v0  ;;  %v79_v22 = vadd.f32 %v2431_v6, %v60_v10  ;;  %v193_v24 = vsel %vm2415_vm5, 0, %v192_v18  ;;  %v139_v25 = vld [vmem:[#allocation2 + $0x8] sm:$0x1]  ;;  %v78_v26 = vadd.f32 %v2431_v6, %v59_v15  ;;  %v61_v31 = vmul.f32 %v2426_v5, %v2300_v20  ;;  %s2372_s18 = smov 48  }
   0x7   :  { %133 = vst.msk [vmem:[#allocation2 + $0x98] sm:$0xf] %vm124_vm0, %v2367_v0  ;;  %v140_v30 = vsel %vm2408_vm3, 0, %v139_v25  ;;  %v2464_v36 = vmul.f32 %v2426_v5, %v2301_v21  ;;  %v77_v39 = vadd.f32 %v2431_v6, %v58_v28  ;;  %v76_v40 = vadd.f32 %v2431_v6, %v57_v29  ;;  %v189_v41 = vld [vmem:[#allocation2 + $0xc] sm:$0x1]  ;;  %s2373_s19 = smov 64  }
   0x8   :  { %v503_v27 = vld [vmem:[#allocation2 + $0x50] sm:$0xf]  ;;  %134 = vst.msk [vmem:[#allocation2 + $0x9c] sm:$0x1] %vm126_vm1, %v2367_v0  ;;  %v95_v34 = vmax.f32 %v79_v22, 0.0  ;;  %v94_v35 = vmax.f32 %v78_v26, 0.0  ;;  %v80_v42 = vadd.f32 %v2431_v6, %v61_v31 }
   0x9   :  { %v2461_v32 = vld [vmem:[#allocation2 + $0x54] sm:$0x1]  ;;  %v688_v33 = vunpack.c.l.b16 %v503_v27  ;;  %150 = vst [vmem:[#allocation2 + $0x20] sm:$0x1] %v149_v11  ;;  %v190_v46 = vsel %vm2415_vm5, 0, %v189_v41  ;;  %v93_v50 = vmax.f32 %v77_v39, 0.0 }
   0xa   :  { %v689_v37 = vunpack.c.l.b16 %v2461_v32  ;;  %v495_v38 = vld [vmem:[#allocation2] sm:$0xf]  ;;  %200 = vst [vmem:[#allocation2 + $0x24] sm:$0x1] %v199_v12  ;;  %v111_v45 = vpack.c.bf16 %v95_v34, %v95_v34  ;;  %v2474_v47 = vpack.c.bf16 %v94_v35, %v94_v35  ;;  %v92_v51 = vmax.f32 %v76_v40, 0.0  ;;  %v2501_v34 = vld [vmem:[%s3648_s0 + $0x28] sm:$0xff]  }
   0xb   :  { %v2470_v43 = vld [vmem:[#allocation2 + $0x4] sm:$0x1]  ;;  %v672_v44 = vunpack.c.l.b16 %v495_v38  ;;  %144 = vst [vmem:[#allocation2 + $0x10] sm:$0x1] %v143_v23  ;;  %v151_v52 = vld [vmem:[#allocation2 + $0x28] sm:$0x1]  ;;  %v109_v60 = vpack.c.bf16 %v93_v50, %v93_v50 }
   0xc   :  { %v712_v48 = vpack.c.b16 %v689_v37, %v688_v33  ;;  %v673_v49 = vunpack.c.l.b16 %v2470_v43  ;;  %194 = vst [vmem:[#allocation2 + $0x14] sm:$0x1] %v193_v24  ;;  %v262_v53 = vshrl.u32 %v111_v45, 16  ;;  %v265_v54 = vshll.u32 %v111_v45, 16  ;;  %v201_v61 = vld [vmem:[#allocation2 + $0x2c] sm:$0x1] }
   0xd   :  { %141 = vst [vmem:[#allocation2 + $0x8] sm:$0x1] %v140_v30  ;;  %v96_v55 = vmax.f32 %v80_v42, 0.0  ;;  %v152_v56 = vsel %vm2408_vm3, 0, %v151_v52  ;;  %v108_v63 = vpack.c.bf16 %v92_v51, %v92_v51  ;;  %v202_v3 = vsel %vm2415_vm5, 0, %v201_v61  ;;  %v2506_v35 = vld [vmem:[%s3648_s0 + $0x18] sm:$0xff]  }
   0xe   :  { %v777_v57 = vshrl.u32 %v712_v48, 16  ;;  %v779_v58 = vshll.u32 %v712_v48, 16  ;;  %v704_v59 = vpack.c.b16 %v673_v49, %v672_v44  ;;  %191 = vst [vmem:[#allocation2 + $0xc] sm:$0x1] %v190_v46  ;;  %v264_v62 = vrot.slane %v262_v53, 7  ;;  %s2374_s20 = smov 32  }
   0xf   :  { %v112_v0 = vpack.c.bf16 %v96_v55, %v96_v55  ;;  %153 = vst [vmem:[#allocation2 + $0x28] sm:$0x1] %v152_v56  ;;  %v246_v11 = vshrl.u32 %v109_v60, 16  ;;  %v249_v15 = vshll.u32 %v109_v60, 16  ;;  %v238_v16 = vshrl.u32 %v108_v63, 16  ;;  %v2526_v56 = vld [vmem:[%s3648_s0 + $0x20] sm:$0xff]  }
  0x10   :  { %v781_v7 = vrot.slane %v779_v58, 1  ;;  %v721_v8 = vshrl.u32 %v704_v59, 16  ;;  %v723_v9 = vshll.u32 %v704_v59, 16  ;;  %v417_v10 = vld [vmem:[#allocation2 + $0x20] sm:$0xf]  ;;  %v267_v12 = vor.u32 %v265_v54, %v264_v62  ;;  %s2375_s21 = smov 56  }
  0x11   :  { %v268_v13 = vrot.slane %v264_v62, 4  ;;  %v420_v14 = vld [vmem:[#allocation2 + $0x24] sm:$0x1]  ;;  %v2491_v17 = vld [vmem:[#allocation2 + $0x18] sm:$0x1]  ;;  %v248_v20 = vrot.slane %v246_v11, 7  ;;  %v81_v42 = vadd.f32 %v2431_v6, %v2464_v36 }
  0x12   :  { %v782_v18 = vor.u32 %v781_v7, %v777_v57  ;;  %v725_v19 = vrot.slane %v723_v9, 1  ;;  %v405_v21 = vld [vmem:[#allocation2 + $0x10] sm:$0xf]  ;;  %v241_v22 = vshll.u32 %v108_v63, 16  ;;  %v418_v23 = vsel %vm2487_vm6, %v267_v12, %v417_v10  ;;  %203 = vst [vmem:[#allocation2 + $0x2c] sm:$0x1] %v202_v3 }
  0x13   :  { %v421_v24 = vsel %vm2408_vm3, %v268_v13, %v420_v14  ;;  %v408_v25 = vld [vmem:[#allocation2 + $0x14] sm:$0x1]  ;;  %v240_v26 = vrot.slane %v238_v16, 7  ;;  %v270_v27 = vshrl.u32 %v112_v0, 16  ;;  %419 = vst [vmem:[#allocation2 + $0x20] sm:$0xf] %v418_v23  ;;  %v251_v29 = vor.u32 %v249_v15, %v248_v20 }
  0x14   :  { %848 = vrot.lane.b32.xlu2 %v782_v18, %s2368_s28  ;;  %v726_v28 = vor.u32 %v725_v19, %v721_v8  ;;  %v252_v30 = vrot.slane %v248_v20, 4  ;;  %v399_v31 = vld [vmem:[#allocation2 + $0x8] sm:$0xf]  ;;  %v273_v33 = vshll.u32 %v112_v0, 16  ;;  %422 = vst [vmem:[#allocation2 + $0x24] sm:$0x1] %v421_v24  ;;  %v2312_v0 = vunpack.c.l.bf16 %v2501_v34 }
  0x15   :  { %v243_v38 = vor.u32 %v241_v22, %v240_v26  ;;  %v244_v39 = vrot.slane %v240_v26, 4  ;;  %v402_v40 = vld [vmem:[#allocation2 + $0xc] sm:$0x1]  ;;  %v272_v41 = vrot.slane %v270_v27, 7  ;;  %v406_v44 = vsel %vm2487_vm6, %v251_v29, %v405_v21  ;;  %v195_v50 = vld [vmem:[#allocation2 + $0x1c] sm:$0x1] }
  0x16   :  { %832 = vrot.lane.b32.xlu0 %v726_v28, %s2368_s28  ;;  %v409_v45 = vsel %vm2408_vm3, %v252_v30, %v408_v25  ;;  %v423_v46 = vld [vmem:[#allocation2 + $0x28] sm:$0xf]  ;;  %v146_v48 = vsel %vm2408_vm3, 0, %v2491_v17  ;;  %v254_v51 = vshrl.u32 %v2474_v47, 16  ;;  %407 = vst [vmem:[#allocation2 + $0x10] sm:$0xf] %v406_v44  ;;  %v2304_v3 = vunpack.c.l.bf16 %v2506_v35 }
  0x17   :  { %v400_v36 = vsel %vm2487_vm6, %v243_v38, %v399_v31  ;;  %v403_v52 = vsel %vm2408_vm3, %v244_v39, %v402_v40  ;;  %v275_v53 = vor.u32 %v273_v33, %v272_v41  ;;  %v276_v54 = vrot.slane %v272_v41, 4  ;;  %v154_v55 = vld [vmem:[#allocation2 + $0x30] sm:$0x1]  ;;  %410 = vst [vmem:[#allocation2 + $0x14] sm:$0x1] %v409_v45 }
  0x18   :  { %v196_v57 = vsel %vm2415_vm5, 0, %v195_v50  ;;  %v2530_v58 = vrot.slane %v254_v51, 7  ;;  %v257_v59 = vshll.u32 %v2474_v47, 16  ;;  %v97_v60 = vmax.f32 %v81_v42, 0.0  ;;  %401 = vst [vmem:[#allocation2 + $0x8] sm:$0xf] %v400_v36 }
  0x19   :  { %v424_v61 = vsel %vm2487_vm6, %v275_v53, %v423_v46  ;;  %v155_v62 = vsel %vm2408_vm3, 0, %v154_v55  ;;  %v204_v63 = vld [vmem:[#allocation2 + $0x34] sm:$0x1]  ;;  %404 = vst [vmem:[#allocation2 + $0xc] sm:$0x1] %v403_v52  ;;  %v67_v14 = vmul.f32 %v2426_v5, %v2312_v0  ;;  %v63_v16 = vmul.f32 %v2426_v5, %v2304_v3 }
  0x1a   :  { %v2542_v7 = vld [vmem:[%s3648_s0 + $0x30] sm:$0xff]   ;;  %v426_v47 = vld [vmem:[#allocation2 + $0x2c] sm:$0x1]  ;;  %v2545_v8 = vor.u32 %v257_v59, %v2530_v58  ;;  %v260_v9 = vrot.slane %v2530_v58, 4  ;;  %v113_v10 = vpack.c.bf16 %v97_v60, %v97_v60  ;;  %v205_v11 = vsel %vm2415_vm5, 0, %v204_v63 }
  0x1b   :  { %v499_v12 = vld [vmem:[#allocation2 + $0x20] sm:$0xf]  ;;  %425 = vst [vmem:[#allocation2 + $0x28] sm:$0xf] %v424_v61  ;;  %v427_v13 = vsel %vm2408_vm3, %v276_v54, %v426_v47  ;;  %v169_v15 = vld [vmem:[#allocation2 + $0x68] sm:$0x1]  ;;  %v2308_v17 = vunpack.c.l.bf16 %v2526_v56  ;;  %v2317_v22 = vunpack.c.h.bf16 %v2542_v7  ;;  %v86_v24 = vadd.f32 %v2431_v6, %v67_v14 }
  0x1c   :  { %v2555_v18 = vld [vmem:[#allocation2 + $0x24] sm:$0x1]  ;;  %v680_v19 = vunpack.c.l.b16 %v499_v12  ;;  %428 = vst [vmem:[#allocation2 + $0x2c] sm:$0x1] %v427_v13  ;;  %v278_v20 = vshrl.u32 %v113_v10, 16  ;;  %v281_v21 = vshll.u32 %v113_v10, 16  ;;  %v82_v27 = vadd.f32 %v2431_v6, %v63_v16 }
  0x1d   :  { %v681_v23 = vunpack.c.l.b16 %v2555_v18  ;;  %147 = vst [vmem:[#allocation2 + $0x18] sm:$0x1] %v146_v48  ;;  %v170_v25 = vsel %vm2408_vm3, 0, %v169_v15  ;;  %v219_v26 = vld [vmem:[#allocation2 + $0x6c] sm:$0x1]  ;;  %v65_v31 = vmul.f32 %v2426_v5, %v2308_v17  ;;  %v70_v33 = vmul.f32 %v2426_v5, %v2317_v22 }
  0x1e   :  { %v497_v28 = vld [vmem:[#allocation2 + $0x10] sm:$0xf]  ;;  %197 = vst [vmem:[#allocation2 + $0x1c] sm:$0x1] %v196_v57  ;;  %v2563_v29 = vrot.slane %v278_v20, 7  ;;  %v220_v30 = vsel %vm2415_vm5, 0, %v219_v26 }
  0x1f   :  { %v708_v38 = vpack.c.b16 %v681_v23, %v680_v19  ;;  %v2571_v39 = vld [vmem:[#allocation2 + $0x14] sm:$0x1]  ;;  %v676_v40 = vunpack.c.l.b16 %v497_v28  ;;  %156 = vst [vmem:[#allocation2 + $0x30] sm:$0x1] %v155_v62  ;;  %v102_v41 = vmax.f32 %v86_v24, 0.0  ;;  %v98_v42 = vmax.f32 %v82_v27, 0.0 }
  0x20   :  { %v677_v44 = vunpack.c.l.b16 %v2571_v39  ;;  %v2574_v45 = vld [vmem:[#allocation2 + $0x8] sm:$0xf]  ;;  %206 = vst [vmem:[#allocation2 + $0x34] sm:$0x1] %v205_v11  ;;  %v283_v46 = vor.u32 %v281_v21, %v2563_v29  ;;  %v284_v48 = vrot.slane %v2563_v29, 4  ;;  %v2579_v50 = vadd.f32 %v2431_v6, %v65_v31 }
  0x21   :  { %v749_v51 = vshrl.u32 %v708_v38, 16  ;;  %v751_v36 = vshll.u32 %v708_v38, 16  ;;  %v2581_v52 = vld [vmem:[#allocation2 + $0xc] sm:$0x1]  ;;  %v674_v53 = vunpack.c.l.b16 %v2574_v45  ;;  %v118_v54 = vpack.c.bf16 %v102_v41, %v102_v41  ;;  %171 = vst [vmem:[#allocation2 + $0x68] sm:$0x1] %v170_v25 }
  0x22   :  { %v706_v55 = vpack.c.b16 %v677_v44, %v676_v40  ;;  %v675_v57 = vunpack.c.l.b16 %v2581_v52  ;;  %v500_v59 = vld [vmem:[#allocation2 + $0x28] sm:$0xf]  ;;  %221 = vst [vmem:[#allocation2 + $0x6c] sm:$0x1] %v220_v30  ;;  %v2587_v60 = vpack.c.bf16 %v98_v42, %v98_v42  ;;  %v157_v61 = vld [vmem:[#allocation2 + $0x38] sm:$0x1]  ;;  %v2590_v62 = vadd.f32 %v2431_v6, %v70_v33 }
  0x23   :  { %v753_v63 = vrot.slane %v751_v36, 1  ;;  %v2592_v0 = vld [vmem:[#allocation2 + $0x2c] sm:$0x1]  ;;  %v682_v3 = vunpack.c.l.b16 %v500_v59  ;;  %v318_v47 = vshrl.u32 %v118_v54, 16  ;;  %v321_v10 = vshll.u32 %v118_v54, 16 }
  0x24   :  { %v735_v11 = vshrl.u32 %v706_v55, 16  ;;  %v737_v12 = vshll.u32 %v706_v55, 16  ;;  %v705_v13 = vpack.c.b16 %v675_v57, %v674_v53  ;;  %v683_v14 = vunpack.c.l.b16 %v2592_v0  ;;  %v411_v15 = vld [vmem:[#allocation2 + $0x18] sm:$0xf]  ;;  %v207_v16 = vld [vmem:[#allocation2 + $0x3c] sm:$0x1] }
  0x25   :  { %v754_v17 = vor.u32 %v753_v63, %v749_v51  ;;  %v412_v19 = vsel %vm2487_vm6, %v2545_v8, %v411_v15  ;;  %v414_v20 = vld [vmem:[#allocation2 + $0x1c] sm:$0x1]  ;;  %v320_v21 = vrot.slane %v318_v47, 7  ;;  %v158_v22 = vsel %vm2408_vm3, 0, %v157_v61  ;;  %v163_v28 = vld [vmem:[#allocation2 + $0x58] sm:$0x1] }
  0x26   :  { %v739_v24 = vrot.slane %v737_v12, 1  ;;  %v728_v25 = vshrl.u32 %v705_v13, 16  ;;  %v730_v26 = vshll.u32 %v705_v13, 16  ;;  %v709_v27 = vpack.c.b16 %v683_v14, %v682_v3  ;;  %413 = vst [vmem:[#allocation2 + $0x18] sm:$0xf] %v412_v19 }
  0x27   :  { %840 = vrot.lane.b32.xlu2 %v754_v17, %s2368_s28  ;;  %v415_v8 = vsel %vm2408_vm3, %v260_v9, %v414_v20  ;;  %v429_v29 = vld [vmem:[#allocation2 + $0x30] sm:$0xf]  ;;  %v432_v30 = vld [vmem:[#allocation2 + $0x34] sm:$0x1]  ;;  %v323_v31 = vor.u32 %v321_v10, %v320_v21  ;;  %v324_v33 = vrot.slane %v320_v21, 4  ;;  %v208_v38 = vsel %vm2415_vm5, 0, %v207_v16 }
  0x28   :  { %v740_v40 = vor.u32 %v739_v24, %v735_v11  ;;  %v732_v41 = vrot.slane %v730_v26, 1  ;;  %v756_v42 = vshrl.u32 %v709_v27, 16  ;;  %v758_v51 = vshll.u32 %v709_v27, 16  ;;  %416 = vst [vmem:[#allocation2 + $0x1c] sm:$0x1] %v415_v8 }
  0x29   :  { %v430_v36 = vsel %vm2487_vm6, %v283_v46, %v429_v29  ;;  %v433_v58 = vsel %vm2408_vm3, %v284_v48, %v432_v30  ;;  %v459_v53 = vld [vmem:[#allocation2 + $0x68] sm:$0xf]  ;;  %v462_v9 = vld [vmem:[#allocation2 + $0x6c] sm:$0x1]  ;;  %159 = vst [vmem:[#allocation2 + $0x38] sm:$0x1] %v158_v22  ;;  %v2309_v54 = vunpack.c.h.bf16 %v2526_v56  ;;  %v2313_v55 = vunpack.c.h.bf16 %v2501_v34 }
  0x2a   :  { %836 = vrot.lane.b32.xlu1 %v740_v40, %s2368_s28  ;;  %v733_v59 = vor.u32 %v732_v41, %v728_v25  ;;  %v760_v61 = vrot.slane %v758_v51, 1  ;;  %431 = vst [vmem:[#allocation2 + $0x30] sm:$0xf] %v430_v36  ;;  %v460_v63 = vsel %vm2487_vm6, %v323_v31, %v459_v53  ;;  %v463_v46 = vsel %vm2408_vm3, %v324_v33, %v462_v9  ;;  %v213_v3 = vld [vmem:[#allocation2 + $0x5c] sm:$0x1] }
  0x2b   :  { %434 = vst [vmem:[#allocation2 + $0x34] sm:$0x1] %v433_v58  ;;  %v286_v48 = vshrl.u32 %v2587_v60, 16  ;;  %v289_v47 = vshll.u32 %v2587_v60, 16  ;;  %v100_v56 = vmax.f32 %v2579_v50, 0.0  ;;  %v164_v34 = vsel %vm2408_vm3, 0, %v163_v28 }
  0x2c   :  { %834 = vrot.lane.b32.xlu0 %v733_v59, %s2368_s28  ;;  %v761_v10 = vor.u32 %v760_v61, %v756_v42  ;;  %461 = vst [vmem:[#allocation2 + $0x68] sm:$0xf] %v460_v63  ;;  %v214_v11 = vsel %vm2415_vm5, 0, %v213_v3  ;;  %v105_v12 = vmax.f32 %v2590_v62, 0.0  ;;  %v178_v13 = vld [vmem:[#allocation2 + $0x80] sm:$0x1]  ;;  %v66_v15 = vmul.f32 %v2426_v5, %v2309_v54 }
  0x2d   :  { %v498_v16 = vld [vmem:[#allocation2 + $0x18] sm:$0xf]  ;;  %464 = vst [vmem:[#allocation2 + $0x6c] sm:$0x1] %v463_v46  ;;  %v288_v60 = vrot.slane %v286_v48, 7  ;;  %v116_v17 = vpack.c.bf16 %v100_v56, %v100_v56  ;;  %v179_v50 = vsel %vm2408_vm3, 0, %v178_v13  ;;  %v68_v19 = vmul.f32 %v2426_v5, %v2313_v55 }
  0x2e   :  { %v678_v20 = vunpack.c.l.b16 %v498_v16  ;;  %209 = vst [vmem:[#allocation2 + $0x3c] sm:$0x1] %v208_v38  ;;  %v121_v21 = vpack.c.bf16 %v105_v12, %v105_v12  ;;  %v228_v22 = vld [vmem:[#allocation2 + $0x84] sm:$0x1]  ;;  %v85_v24 = vadd.f32 %v2431_v6, %v66_v15  ;;  %v2316_v62 = vunpack.c.l.bf16 %v2542_v7  ;;  %v2649_v7 = vld [vmem:[%s3648_s0 + $0x38] sm:$0xff]   ;;  %s2369_s0 = smov 16  }
  0x2f   :  { %842 = vrot.lane.b32.xlu2 %v761_v10, %s2368_s28  ;;  %v2638_v25 = vld [vmem:[#allocation2 + $0x1c] sm:$0x1]  ;;  %v291_v26 = vor.u32 %v289_v47, %v288_v60  ;;  %v292_v27 = vrot.slane %v288_v60, 4  ;;  %165 = vst [vmem:[#allocation2 + $0x58] sm:$0x1] %v164_v34  ;;  %v302_v28 = vshrl.u32 %v116_v17, 16  ;;  %v2644_v33 = vadd.f32 %v2431_v6, %v68_v19 }
  0x30   :  { %v679_v8 = vunpack.c.l.b16 %v2638_v25  ;;  %v435_v29 = vld [vmem:[#allocation2 + $0x38] sm:$0xf]  ;;  %215 = vst [vmem:[#allocation2 + $0x5c] sm:$0x1] %v214_v11  ;;  %v305_v30 = vshll.u32 %v116_v17, 16  ;;  %v229_v31 = vsel %vm2415_vm5, 0, %v228_v22  ;;  %v69_v36 = vmul.f32 %v2426_v5, %v2316_v62 }
  0x31   :  { %v501_v38 = vld [vmem:[#allocation2 + $0x30] sm:$0xf]  ;;  %v436_v40 = vsel %vm2487_vm6, %v291_v26, %v435_v29  ;;  %v304_v41 = vrot.slane %v302_v28, 7  ;;  %180 = vst [vmem:[#allocation2 + $0x80] sm:$0x1] %v179_v50  ;;  %v342_v42 = vshrl.u32 %v121_v21, 16  ;;  %v2320_v60 = vunpack.c.l.bf16 %v2649_v7 }
  0x32   :  { %v2653_v51 = vld [vmem:[#allocation2 + $0x60] sm:$0x1]  ;;  %v707_v58 = vpack.c.b16 %v679_v8, %v678_v20  ;;  %v2658_v53 = vld [vmem:[#allocation2 + $0x34] sm:$0x1]  ;;  %v684_v9 = vunpack.c.l.b16 %v501_v38  ;;  %437 = vst [vmem:[#allocation2 + $0x38] sm:$0xf] %v436_v40 }
  0x33   :  { %v345_v54 = vshll.u32 %v121_v21, 16  ;;  %v101_v55 = vmax.f32 %v85_v24, 0.0  ;;  %v685_v59 = vunpack.c.l.b16 %v2658_v53  ;;  %v506_v61 = vld [vmem:[#allocation2 + $0x68] sm:$0xf]  ;;  %v307_v63 = vor.u32 %v305_v30, %v304_v41  ;;  %230 = vst [vmem:[#allocation2 + $0x84] sm:$0x1] %v229_v31 }
  0x34   :  { %v308_v46 = vrot.slane %v304_v41, 4  ;;  %v344_v3 = vrot.slane %v342_v42, 7  ;;  %v742_v48 = vshrl.u32 %v707_v58, 16  ;;  %v744_v47 = vshll.u32 %v707_v58, 16  ;;  %v2661_v56 = vld [vmem:[#allocation2 + $0x6c] sm:$0x1] }
  0x35   :  { %v694_v34 = vunpack.c.l.b16 %v506_v61  ;;  %v2663_v10 = vpack.c.bf16 %v101_v55, %v101_v55  ;;  %v710_v11 = vpack.c.b16 %v685_v59, %v684_v9  ;;  %v695_v12 = vunpack.c.l.b16 %v2661_v56  ;;  %v438_v13 = vld [vmem:[#allocation2 + $0x3c] sm:$0x1]  ;;  %v216_v16 = vld [vmem:[#allocation2 + $0x64] sm:$0x1]  ;;  %v172_v29 = vld [vmem:[#allocation2 + $0x70] sm:$0x1] }
  0x36   :  { %v347_v15 = vor.u32 %v345_v54, %v344_v3  ;;  %v746_v17 = vrot.slane %v744_v47, 1  ;;  %v439_v50 = vsel %vm2408_vm3, %v292_v27, %v438_v13  ;;  %v447_v19 = vld [vmem:[#allocation2 + $0x58] sm:$0xf]  ;;  %v348_v20 = vrot.slane %v344_v3, 4  ;;  %v2355_v39 = vld [vmem:[%s3649_s1] ss:$0 sm:$0xff] }
  0x37   :  { %v167_v21 = vsel %vm2408_vm3, 0, %v2653_v51  ;;  %v763_v22 = vshrl.u32 %v710_v11, 16  ;;  %v765_v24 = vshll.u32 %v710_v11, 16  ;;  %v715_v62 = vpack.c.b16 %v695_v12, %v694_v34  ;;  %440 = vst [vmem:[#allocation2 + $0x3c] sm:$0x1] %v439_v50  ;;  %s2370_s1 = smov 24  }
  0x38   :  { %v448_v26 = vsel %vm2487_vm6, %v307_v63, %v447_v19  ;;  %v450_v28 = vld [vmem:[#allocation2 + $0x5c] sm:$0x1]  ;;  %v747_v30 = vor.u32 %v746_v17, %v742_v48  ;;  %v477_v31 = vld [vmem:[#allocation2 + $0x80] sm:$0xf]  ;;  %v217_v38 = vsel %vm2415_vm5, 0, %v216_v16  ;;  %v310_v40 = vshrl.u32 %v2663_v10, 16 }
  0x39   :  { %449 = vst [vmem:[#allocation2 + $0x58] sm:$0xf] %v448_v26  ;;  %v451_v27 = vsel %vm2408_vm3, %v308_v46, %v450_v28  ;;  %v767_v41 = vrot.slane %v765_v24, 1  ;;  %v798_v42 = vshrl.u32 %v715_v62, 16  ;;  %v800_v51 = vshll.u32 %v715_v62, 16 }
  0x3a   :  { %v2683_v58 = vld [vmem:[#allocation2 + $0x38] sm:$0xf]  ;;  %v478_v9 = vsel %vm2487_vm6, %v347_v15, %v477_v31  ;;  %838 = vrot.lane.b32.xlu1 %v747_v30, %s2368_s28  ;;  %452 = vst [vmem:[#allocation2 + $0x5c] sm:$0x1] %v451_v27  ;;  %v480_v54 = vld [vmem:[#allocation2 + $0x84] sm:$0x1]  ;;  %v88_v63 = vadd.f32 %v2431_v6, %v69_v36  ;;  %v71_v19 = vmul.f32 %v2426_v5, %v2320_v60 }
  0x3b   :  { %v313_v55 = vshll.u32 %v2663_v10, 16  ;;  %v103_v61 = vmax.f32 %v2644_v33, 0.0  ;;  %v768_v46 = vor.u32 %v767_v41, %v763_v22  ;;  %v802_v3 = vrot.slane %v800_v51, 1  ;;  %479 = vst [vmem:[#allocation2 + $0x80] sm:$0xf] %v478_v9 }
  0x3c   :  { %v481_v48 = vsel %vm2408_vm3, %v348_v20, %v480_v54  ;;  %v2693_v47 = vrot.slane %v310_v40, 7  ;;  %v222_v34 = vld [vmem:[#allocation2 + $0x74] sm:$0x1]  ;;  %v686_v11 = vunpack.c.l.b16 %v2683_v58  ;;  %v173_v10 = vsel %vm2408_vm3, 0, %v172_v29  ;;  %v175_v36 = vld [vmem:[#allocation2 + $0x78] sm:$0x1] }
  0x3d   :  { %482 = vst [vmem:[#allocation2 + $0x84] sm:$0x1] %v481_v48  ;;  %v119_v13 = vpack.c.bf16 %v103_v61, %v103_v61  ;;  %v223_v33 = vsel %vm2415_vm5, 0, %v222_v34  ;;  %844 = vrot.lane.b32.xlu0 %v768_v46, %s2368_s28  ;;  %v803_v15 = vor.u32 %v802_v3, %v798_v42  ;;  %v104_v16 = vmax.f32 %v88_v63, 0.0  ;;  %v225_v50 = vld [vmem:[#allocation2 + $0x7c] sm:$0x1] }
  0x3e   :  { %168 = vst [vmem:[#allocation2 + $0x60] sm:$0x1] %v167_v21  ;;  %v176_v17 = vsel %vm2408_vm3, 0, %v175_v36  ;;  %v2704_v20 = vld [vmem:[#allocation2 + $0x3c] sm:$0x1]  ;;  %v226_v21 = vsel %vm2415_vm5, 0, %v225_v50  ;;  %v90_v29 = vadd.f32 %v2431_v6, %v71_v19  ;;  %v315_v31 = vor.u32 %v313_v55, %v2693_v47 }
  0x3f   :  { %218 = vst [vmem:[#allocation2 + $0x64] sm:$0x1] %v217_v38  ;;  %v326_v22 = vshrl.u32 %v119_v13, 16  ;;  %v329_v24 = vshll.u32 %v119_v13, 16  ;;  %854 = vrot.lane.b32.xlu2 %v803_v15, %s2368_s28  ;;  %v687_v62 = vunpack.c.l.b16 %v2704_v20  ;;  %v120_v28 = vpack.c.bf16 %v104_v16, %v104_v16  ;;  %v181_v13 = vld [vmem:[#allocation2 + $0x88] sm:$0x1] }
  0x40   :  { %v504_v26 = vld [vmem:[#allocation2 + $0x58] sm:$0xf]  ;;  %174 = vst [vmem:[#allocation2 + $0x70] sm:$0x1] %v173_v10  ;;  %v316_v51 = vrot.slane %v2693_v47, 4  ;;  %v106_v6 = vmax.f32 %v90_v29, 0.0 }
  0x41   :  { %v690_v30 = vunpack.c.l.b16 %v504_v26  ;;  %224 = vst [vmem:[#allocation2 + $0x74] sm:$0x1] %v223_v33  ;;  %v328_v5 = vrot.slane %v326_v22, 7  ;;  %v711_v60 = vpack.c.b16 %v687_v62, %v686_v11  ;;  %v2713_v27 = vld [vmem:[#allocation2 + $0x5c] sm:$0x1]  ;;  %v334_v38 = vshrl.u32 %v120_v28, 16 }
  0x42   :  { %177 = vst [vmem:[#allocation2 + $0x78] sm:$0x1] %v176_v17  ;;  %v337_v40 = vshll.u32 %v120_v28, 16  ;;  %v691_v41 = vunpack.c.l.b16 %v2713_v27  ;;  %v509_v42 = vld [vmem:[#allocation2 + $0x80] sm:$0xf]  ;;  %vm1696_vm7 = vcmask 64512  }
  0x43   :  { %v331_v9 = vor.u32 %v329_v24, %v328_v5  ;;  %227 = vst [vmem:[#allocation2 + $0x7c] sm:$0x1] %v226_v21  ;;  %v770_v54 = vshrl.u32 %v711_v60, 16  ;;  %v772_v61 = vshll.u32 %v711_v60, 16  ;;  %v700_v46 = vunpack.c.l.b16 %v509_v42  ;;  %v528_v16 = vld [vmem:[#allocation2 + $0x8] sm:$0xe] }
  0x44   :  { %v2718_v63 = vld [vmem:[#allocation2 + $0x84] sm:$0x1]  ;;  %v336_v3 = vrot.slane %v334_v38, 7  ;;  %v713_v55 = vpack.c.b16 %v691_v41, %v690_v30  ;;  %v332_v11 = vrot.slane %v328_v5, 4  ;;  %v231_v26 = vld [vmem:[#allocation2 + $0x8c] sm:$0x1]  ;;  %v122_v30 = vpack.c.bf16 %v106_v6, %v106_v6 }
  0x45   :  { %v701_v48 = vunpack.c.l.b16 %v2718_v63  ;;  %v453_v34 = vld [vmem:[#allocation2 + $0x60] sm:$0xf]  ;;  %v774_v10 = vrot.slane %v772_v61, 1  ;;  %v182_v5 = vsel %vm2408_vm3, 0, %v181_v13  ;;  %vm1745_vm8 = vcmask 130048  }
  0x46   :  { %v454_v47 = vsel %vm2487_vm6, %v315_v31, %v453_v34  ;;  %v456_v33 = vld [vmem:[#allocation2 + $0x64] sm:$0x1]  ;;  %v339_v36 = vor.u32 %v337_v40, %v336_v3  ;;  %v340_v15 = vrot.slane %v336_v3, 4  ;;  %v784_v17 = vshrl.u32 %v713_v55, 16  ;;  %183 = vst [vmem:[#allocation2 + $0x88] sm:$0x1] %v182_v5 }
  0x47   :  { %v786_v50 = vshll.u32 %v713_v55, 16  ;;  %v718_v19 = vpack.c.b16 %v701_v48, %v700_v46  ;;  %455 = vst [vmem:[#allocation2 + $0x60] sm:$0xf] %v454_v47  ;;  %v457_v22 = vsel %vm2408_vm3, %v316_v51, %v456_v33  ;;  %v465_v24 = vld [vmem:[#allocation2 + $0x70] sm:$0xf]  ;;  %v775_v28 = vor.u32 %v774_v10, %v770_v54 }
  0x48   :  { %458 = vst [vmem:[#allocation2 + $0x64] sm:$0x1] %v457_v22  ;;  %v466_v21 = vsel %vm2487_vm6, %v331_v9, %v465_v24  ;;  %v468_v29 = vld [vmem:[#allocation2 + $0x74] sm:$0x1]  ;;  %v881_v54 = vunpack.c.l.b16 %v528_v16  ;;  %v232_v3 = vsel %vm2415_vm5, 0, %v231_v26  ;;  %v350_v55 = vshrl.u32 %v122_v30, 16 }
  0x49   :  { %v788_v60 = vrot.slane %v786_v50, 1  ;;  %v819_v31 = vshrl.u32 %v718_v19, 16  ;;  %v821_v38 = vshll.u32 %v718_v19, 16  ;;  %467 = vst [vmem:[#allocation2 + $0x70] sm:$0xf] %v466_v21  ;;  %v469_v40 = vsel %vm2408_vm3, %v332_v11, %v468_v29  ;;  %846 = vrot.lane.b32.xlu1 %v775_v28, %s2368_s28 }
  0x4a   :  { %470 = vst [vmem:[#allocation2 + $0x74] sm:$0x1] %v469_v40  ;;  %v471_v42 = vld [vmem:[#allocation2 + $0x78] sm:$0xf]  ;;  %v474_v51 = vld [vmem:[#allocation2 + $0x7c] sm:$0x1] }
  0x4b   :  { %v789_v61 = vor.u32 %v788_v60, %v784_v17  ;;  %v823_v9 = vrot.slane %v821_v38, 1  ;;  %v472_v6 = vsel %vm2487_vm6, %v339_v36, %v471_v42  ;;  %v475_v46 = vsel %vm2408_vm3, %v340_v15, %v474_v51  ;;  %233 = vst [vmem:[#allocation2 + $0x8c] sm:$0x1] %v232_v3  ;;  %v531_v50 = vld [vmem:[#allocation2 + $0x20] sm:$0xe] }
  0x4c   :  { %473 = vst [vmem:[#allocation2 + $0x78] sm:$0xf] %v472_v6  ;;  %v353_v34 = vshll.u32 %v122_v30, 16  ;;  %v352_v10 = vrot.slane %v350_v55, 7  ;;  %v897_v36 = vpack.c.b16 %v675_v57, %v881_v54  ;;  %v884_v30 = vunpack.c.l.b16 %v531_v50 }
  0x4d   :  { %850 = vrot.lane.b32.xlu0 %v789_v61, %s2368_s28  ;;  %v824_v11 = vor.u32 %v823_v9, %v819_v31  ;;  %476 = vst [vmem:[#allocation2 + $0x7c] sm:$0x1] %v475_v46  ;;  %v483_v21 = vld [vmem:[#allocation2 + $0x88] sm:$0xf]  ;;  %vm1778_vm9 = vcmask 195584   ;;  %vm2077_vm10 = vcmask 1043456  }
  0x4e   :  { %v2743_v13 = vld [vmem:[#allocation2 + $0x60] sm:$0xf]  ;;  %v355_v17 = vor.u32 %v353_v34, %v352_v10  ;;  %v356_v28 = vrot.slane %v352_v10, 4  ;;  %v913_v52 = vrot.slane %v897_v36, 1  ;;  %v900_v3 = vpack.c.b16 %v681_v23, %v884_v30 }
  0x4f   :  { %860 = vrot.lane.b32.xlu2 %v824_v11, %s2368_s28  ;;  %v2746_v47 = vld [vmem:[#allocation2 + $0x64] sm:$0x1]  ;;  %v692_v33 = vunpack.c.l.b16 %v2743_v13  ;;  %v534_v11 = vld [vmem:[#allocation2 + $0x38] sm:$0xe]  ;;  %vm1811_vm11 = vcmask 261120   ;;  %vm1844_vm12 = vcmask 326656  }
  0x50   :  { %v693_v15 = vunpack.c.l.b16 %v2746_v47  ;;  %v2752_v16 = vld [vmem:[#allocation2 + $0x70] sm:$0xf]  ;;  %v484_v57 = vsel %vm2487_vm6, %v355_v17, %v483_v21  ;;  %vm1877_vm13 = vcmask 392192   ;;  %vm1910_vm14 = vcmask 457728  }
  0x51   :  { %v2754_v19 = vld [vmem:[#allocation2 + $0x74] sm:$0x1]  ;;  %v696_v22 = vunpack.c.l.b16 %v2752_v16  ;;  %485 = vst [vmem:[#allocation2 + $0x88] sm:$0xf] %v484_v57  ;;  %vm1943_vm15 = vcmask 523264   ;;  %vm2052_vm2 = vcmask 588800  }
  0x52   :  { %v714_v24 = vpack.c.b16 %v693_v15, %v692_v33  ;;  %v697_v26 = vunpack.c.l.b16 %v2754_v19  ;;  %v486_v51 = vld [vmem:[#allocation2 + $0x8c] sm:$0x1] }
  0x53   :  { %v2760_v29 = vld [vmem:[#allocation2 + $0x78] sm:$0xf]  ;;  %v487_v6 = vsel %vm2408_vm3, %v356_v28, %v486_v51  ;;  %v887_v28 = vunpack.c.l.b16 %v534_v11 }
  0x54   :  { %v791_v5 = vshrl.u32 %v714_v24, 16  ;;  %v793_v60 = vshll.u32 %v714_v24, 16  ;;  %v716_v31 = vpack.c.b16 %v697_v26, %v696_v22  ;;  %v2766_v38 = vld [vmem:[#allocation2 + $0x7c] sm:$0x1]  ;;  %v698_v40 = vunpack.c.l.b16 %v2760_v29  ;;  %488 = vst [vmem:[#allocation2 + $0x8c] sm:$0x1] %v487_v6 }
  0x55   :  { %v699_v42 = vunpack.c.l.b16 %v2766_v38  ;;  %v527_v22 = vld [vmem:[#allocation2] sm:$0xe]  ;;  %v916_v24 = vrot.slane %v900_v3, 1  ;;  %v903_v30 = vpack.c.b16 %v687_v62, %v887_v28  ;;  %v540_v11 = vld [vmem:[#allocation2 + $0x78] sm:$0xe] }
  0x56   :  { %v795_v54 = vrot.slane %v793_v60, 1  ;;  %v805_v61 = vshrl.u32 %v716_v31, 16  ;;  %v807_v9 = vshll.u32 %v716_v31, 16 }
  0x57   :  { %v717_v46 = vpack.c.b16 %v699_v42, %v698_v40  ;;  %930 = vrot.lane.b32.xlu2 %v913_v52, %s2369_s0  ;;  %v880_v52 = vunpack.c.l.b16 %v527_v22  ;;  %v529_v40 = vld [vmem:[#allocation2 + $0x10] sm:$0xe]  ;;  %v2305_v22 = vunpack.c.h.bf16 %v2506_v35 }
  0x58   :  { %v796_v55 = vor.u32 %v795_v54, %v791_v5  ;;  %v809_v34 = vrot.slane %v807_v9, 1  ;;  %v2778_v50 = vld [vmem:[#allocation2 + $0x88] sm:$0xf]  ;;  %v537_v5 = vld [vmem:[#allocation2 + $0x60] sm:$0xe]  ;;  %v919_v9 = vrot.slane %v903_v30, 1  ;;  %v882_v3 = vunpack.c.l.b16 %v529_v40 }
  0x59   :  { %v814_v10 = vshll.u32 %v717_v46, 16  ;;  %v812_v36 = vshrl.u32 %v717_v46, 16  ;;  %v702_v21 = vunpack.c.l.b16 %v2778_v50  ;;  %v896_v31 = vpack.c.b16 %v673_v49, %v880_v52  ;;  %v535_v52 = vld [vmem:[#allocation2 + $0x50] sm:$0xe] }
  0x5a   :  { %852 = vrot.lane.b32.xlu1 %v796_v55, %s2368_s28  ;;  %v810_v33 = vor.u32 %v809_v34, %v805_v61  ;;  %v530_v61 = vld [vmem:[#allocation2 + $0x18] sm:$0xe]  ;;  %v890_v6 = vunpack.c.l.b16 %v537_v5  ;;  %v898_v43 = vpack.c.b16 %v677_v44, %v882_v3  ;;  %v64_v44 = vmul.f32 %v2355_v39, %v2305_v22  ;;  %v538_v3 = vld [vmem:[#allocation2 + $0x68] sm:$0xe] }
  0x5b   :  { %v816_v17 = vrot.slane %v814_v10, 1  ;;  %v2782_v23 = vld [vmem:[#allocation2 + $0x8c] sm:$0x1]  ;;  %v912_v55 = vrot.slane %v896_v31, 1  ;;  %v883_v20 = vunpack.c.l.b16 %v530_v61  ;;  %v532_v10 = vld [vmem:[#allocation2 + $0x28] sm:$0xe] }
  0x5c   :  { %856 = vrot.lane.b32.xlu0 %v810_v33, %s2368_s28  ;;  %v703_v57 = vunpack.c.l.b16 %v2782_v23  ;;  %v906_v34 = vpack.c.b16 %v693_v15, %v890_v6  ;;  %v533_v33 = vld [vmem:[#allocation2 + $0x30] sm:$0xe]  ;;  %v885_v47 = vunpack.c.l.b16 %v532_v10  ;;  %v536_v5 = vld [vmem:[#allocation2 + $0x58] sm:$0xe]  ;;  %v891_v10 = vunpack.c.l.b16 %v538_v3  ;;  %v547_v3 = vld [vmem:[#allocation2 + $0x28] sm:$0xf] }
  0x5d   :  { %v817_v18 = vor.u32 %v816_v17, %v812_v36  ;;  %v899_v49 = vpack.c.b16 %v679_v8, %v883_v20  ;;  %v893_v17 = vunpack.c.l.b16 %v540_v11  ;;  %v886_v28 = vunpack.c.l.b16 %v533_v33  ;;  %v2356_v8 = vld [vmem:[%s3650_s2] ss:$0 sm:$0xff]  ;;  %v539_v20 = vld [vmem:[#allocation2 + $0x70] sm:$0xe]  ;;  %s2371_s2 = smov 40  }
  0x5e   :  { %v719_v60 = vpack.c.b16 %v703_v57, %v702_v21  ;;  %v922_v36 = vrot.slane %v906_v34, 1  ;;  %v83_v21 = vadd.f32 %v2356_v8, %v64_v44  ;;  %v901_v35 = vpack.c.b16 %v683_v14, %v885_v47  ;;  %v546_v34 = vld [vmem:[#allocation2 + $0x20] sm:$0xf] }
  0x5f   :  { %936 = vrot.lane.b32.xlu2 %v916_v24, %s2369_s0  ;;  %v914_v24 = vrot.slane %v898_v43, 1  ;;  %v915_v15 = vrot.slane %v899_v49, 1  ;;  %v909_v25 = vpack.c.b16 %v699_v42, %v893_v17  ;;  %v160_v42 = vld [vmem:[#allocation2 + $0x40] sm:$0x1]  ;;  %v889_v14 = vunpack.c.l.b16 %v536_v5 }
  0x60   :  { %v826_v51 = vshrl.u32 %v719_v60, 16  ;;  %v828_v54 = vshll.u32 %v719_v60, 16  ;;  %v99_v30 = vmax.f32 %v83_v21, 0.0  ;;  %v543_v60 = vld [vmem:[#allocation2 + $0x8] sm:$0xf]  ;;  %v161_v40 = vsel %vm2408_vm3, 0, %v160_v42 }
  0x61   :  { %v925_v38 = vrot.slane %v909_v25, 1  ;;  %162 = vst [vmem:[#allocation2 + $0x40] sm:$0x1] %v161_v40  ;;  %v2821_v53 = vunpack.c.l.b16 %v543_v60  ;;  %v2321_v43 = vunpack.c.h.bf16 %v2649_v7  ;;  %v892_v33 = vunpack.c.l.b16 %v539_v20  ;;  %v549_v25 = vld [vmem:[#allocation2 + $0x38] sm:$0xf] }
  0x62   :  { %858 = vrot.lane.b32.xlu1 %v817_v18, %s2368_s28  ;;  %v830_v46 = vrot.slane %v828_v54, 1  ;;  %v902_v18 = vpack.c.b16 %v685_v59, %v886_v28  ;;  %v115_v31 = vpack.c.bf16 %v99_v30, %v99_v30  ;;  %v888_v54 = vunpack.c.l.b16 %v535_v52  ;;  %v542_v28 = vld [vmem:[#allocation2 + $0x88] sm:$0xe]  ;;  %v552_v40 = vld [vmem:[#allocation2 + $0x60] sm:$0xf] }
  0x63   :  { %v72_v27 = vmul.f32 %v2355_v39, %v2321_v43  ;;  %v907_v7 = vpack.c.b16 %v695_v12, %v891_v10  ;;  %v908_v22 = vpack.c.b16 %v697_v26, %v892_v33  ;;  %v2853_v19 = vunpack.c.l.b16 %v549_v25 }
  0x64   :  { %v831_v62 = vor.u32 %v830_v46, %v826_v51  ;;  %v917_v51 = vrot.slane %v901_v35, 1  ;;  %v918_v0 = vrot.slane %v902_v18, 1  ;;  %v294_v61 = vshrl.u32 %v115_v31, 16 }
  0x65   :  { %v904_v6 = vpack.c.b16 %v689_v37, %v888_v54  ;;  %v905_v46 = vpack.c.b16 %v691_v41, %v889_v14  ;;  %v2838_v41 = vunpack.c.l.b16 %v546_v34  ;;  %v923_v12 = vrot.slane %v907_v7, 1 }
  0x66   :  { %862 = vrot.lane.b32.xlu0 %v831_v62, %s2368_s28  ;;  %v2823_v59 = vrot.slane %v294_v61, 7  ;;  %v992_v62 = vpack.c.b16 %v2821_v53, %v2821_v53  ;;  %v924_v21 = vrot.slane %v908_v22, 1  ;;  %v895_v35 = vunpack.c.l.b16 %v542_v28  ;;  %v555_v61 = vld [vmem:[#allocation2 + $0x78] sm:$0xf] }
  0x67   :  { %942 = vrot.lane.b32.xlu2 %v919_v9, %s2369_s0  ;;  %v297_v9 = vshll.u32 %v115_v31, 16  ;;  %v920_v49 = vrot.slane %v904_v6, 1  ;;  %v921_v37 = vrot.slane %v905_v46, 1  ;;  %v995_v39 = vpack.c.b16 %v2838_v41, %v2838_v41 }
  0x68   :  { %v441_v11 = vld [vmem:[#allocation2 + $0x40] sm:$0xf]  ;;  %v911_v5 = vpack.c.b16 %v703_v57, %v895_v35  ;;  %v998_v42 = vpack.c.b16 %v2853_v19, %v2853_v19  ;;  %v2871_v23 = vunpack.c.l.b16 %v552_v40  ;;  %v2888_v20 = vunpack.c.l.b16 %v555_v61  ;;  %v2944_v61 = vld [vmem:[#allocation2 + $0x34] sm:$0x1] }
  0x69   :  { %v556_v40 = vld [vmem:[#allocation2 + $0x80] sm:$0xf] }
  0x6a   :  { %928 = vrot.lane.b32.xlu1 %v912_v55, %s2369_s0  ;;  %v299_v55 = vor.u32 %v297_v9, %v2823_v59  ;;  %v927_v63 = vrot.slane %v911_v5, 1  ;;  %v1001_v4 = vpack.c.b16 %v2871_v23, %v2871_v23  ;;  %v2932_v5 = vld [vmem:[#allocation2 + $0x14] sm:$0x1] }
  0x6c   :  { %v442_v32 = vsel %vm2487_vm6, %v299_v55, %v441_v11  ;;  %v548_v55 = vld [vmem:[#allocation2 + $0x30] sm:$0xf]  ;;  %v1004_v11 = vpack.c.b16 %v2888_v20, %v2888_v20 }
  0x6d   :  { %443 = vst [vmem:[#allocation2 + $0x40] sm:$0xf] %v442_v32  ;;  %v2894_v34 = vunpack.c.l.b16 %v548_v55 }
  0x6e   :  { %932 = vrot.lane.b32.xlu0 %v914_v24, %s2369_s0  ;;  %v2843_v17 = vpop.permute.xlu2 %848  ;;  %v541_v24 = vld [vmem:[#allocation2 + $0x80] sm:$0xe] }
  0x6f   :  { %948 = vrot.lane.b32.xlu2 %v922_v36, %s2369_s0  ;;  %v91_v36 = vadd.f32 %v2356_v8, %v72_v27  ;;  %v894_v8 = vunpack.c.l.b16 %v541_v24  ;;  %v997_v10 = vpack.c.b16 %v2894_v34, %v2894_v34  ;;  %v559_v24 = vld [vmem:[#allocation2 + $0xc] sm:$0x1] }
  0x71   :  { %v107_v47 = vmax.f32 %v91_v36, 0.0  ;;  %v910_v30 = vpack.c.b16 %v701_v48, %v894_v8  ;;  %v544_v48 = vld [vmem:[#allocation2 + $0x10] sm:$0xf]  ;;  %v575_v36 = vld [vmem:[#allocation2 + $0x8] sm:$0xe] }
  0x72   :  { %934 = vrot.lane.b32.xlu1 %v915_v15, %s2369_s0  ;;  %v184_v15 = vld [vmem:[#allocation2 + $0x90] sm:$0x1]  ;;  %v2874_v57 = vunpack.c.l.b16 %v544_v48  ;;  %v557_v48 = vld [vmem:[#allocation2 + $0x88] sm:$0xf] }
  0x73   :  { %v185_v44 = vsel %vm2408_vm3, 0, %v184_v15  ;;  %v123_v56 = vpack.c.bf16 %v107_v47, %v107_v47  ;;  %v926_v54 = vrot.slane %v910_v30, 1  ;;  %v1248_v15 = vunpack.c.l.b16 %v575_v36 }
  0x74   :  { %186 = vst [vmem:[#allocation2 + $0x90] sm:$0x1] %v185_v44  ;;  %v993_v9 = vpack.c.b16 %v2874_v57, %v2874_v57  ;;  %v550_v32 = vld [vmem:[#allocation2 + $0x40] sm:$0xf]  ;;  %v1056_v44 = vunpack.c.l.b16 %v559_v24 }
  0x75   :  { %v358_v18 = vshrl.u32 %v123_v56, 16  ;;  %v361_v52 = vshll.u32 %v123_v56, 16  ;;  %v2908_v7 = vunpack.c.l.b16 %v550_v32  ;;  %v553_v56 = vld [vmem:[#allocation2 + $0x68] sm:$0xf]  ;;  %v1061_v32 = vunpack.c.l.b16 %v2944_v61 }
  0x76   :  { %938 = vrot.lane.b32.xlu0 %v917_v51, %s2369_s0  ;;  %v1264_v8 = vpack.c.b16 %v1056_v44, %v1248_v15 }
  0x77   :  { %954 = vrot.lane.b32.xlu2 %v925_v38, %s2369_s0  ;;  %v2855_v26 = vrot.slane %v358_v18, 7 }
  0x78   :  { %v1280_v30 = vrot.slane %v1264_v8, 1 }
  0x79   :  { %v363_v38 = vor.u32 %v361_v52, %v2855_v26 }
  0x7a   :  { %940 = vrot.lane.b32.xlu1 %v918_v0, %s2369_s0  ;;  %v545_v0 = vld [vmem:[#allocation2 + $0x18] sm:$0xf] }
  0x7b   :  { %v489_v31 = vld [vmem:[#allocation2 + $0x90] sm:$0xf]  ;;  %v2877_v14 = vunpack.c.l.b16 %v545_v0 }
  0x7c   :  { %v490_v51 = vsel %vm2487_vm6, %v363_v38, %v489_v31  ;;  %v593_v38 = vld [vmem:[#allocation2 + $0x18] sm:$0xf] }
  0x7d   :  { %491 = vst [vmem:[#allocation2 + $0x90] sm:$0xf] %v490_v51  ;;  %v994_v46 = vpack.c.b16 %v2877_v14, %v2877_v14  ;;  %v2942_v0 = vunpack.c.l.b16 %v593_v38 }
  0x7e   :  { %944 = vrot.lane.b32.xlu0 %v920_v49, %s2369_s0 }
  0x7f   :  { %1008 = vrot.lane.b32.xlu2 %v992_v62, %s2370_s1  ;;  %v2891_v62 = vunpack.c.l.b16 %v547_v3 }
  0x81   :  { %v2866_v60 = vpop.permute.xlu2 %840  ;;  %v996_v49 = vpack.c.b16 %v2891_v62, %v2891_v62 }
  0x82   :  { %946 = vrot.lane.b32.xlu1 %v921_v37, %s2369_s0  ;;  %v551_v37 = vld [vmem:[#allocation2 + $0x58] sm:$0xf] }
  0x83   :  { %v2911_v22 = vunpack.c.l.b16 %v551_v37 }
  0x84   :  { %v558_v43 = vld [vmem:[#allocation2 + $0x90] sm:$0xf] }
  0x85   :  { %v2905_v27 = vunpack.c.l.b16 %v558_v43  ;;  %v1000_v25 = vpack.c.b16 %v2911_v22, %v2911_v22  ;;  %v608_v43 = vld [vmem:[#allocation2 + $0x14] sm:$0x1] }
  0x86   :  { %950 = vrot.lane.b32.xlu0 %v923_v12, %s2369_s0  ;;  %v554_v12 = vld [vmem:[#allocation2 + $0x70] sm:$0xf]  ;;  %v1424_v24 = vunpack.c.l.b16 %v608_v43 }
  0x87   :  { %1014 = vrot.lane.b32.xlu2 %v995_v39, %s2370_s1  ;;  %v1007_v47 = vpack.c.b16 %v2905_v27, %v2905_v27  ;;  %v999_v39 = vpack.c.b16 %v2908_v7, %v2908_v7  ;;  %v2928_v18 = vunpack.c.l.b16 %v554_v12 }
  0x88   :  { %v2915_v28 = vpop.permute.xlu0 %832 }
  0x89   :  { %v2883_v6 = vpop.permute.xlu2 %842  ;;  %v1003_v31 = vpack.c.b16 %v2928_v18, %v2928_v18 }
  0x8a   :  { %952 = vrot.lane.b32.xlu1 %v924_v21, %s2369_s0  ;;  %v2923_v21 = vunpack.c.l.b16 %v553_v56  ;;  %v2972_v56 = vld [vmem:[#allocation2 + $0x5c] sm:$0x1] }
  0x8e   :  { %956 = vrot.lane.b32.xlu0 %v926_v54, %s2369_s0  ;;  %v1057_v54 = vunpack.c.l.b16 %v2932_v5 }
  0x8f   :  { %1020 = vrot.lane.b32.xlu2 %v998_v42, %s2370_s1  ;;  %v1002_v42 = vpack.c.b16 %v2923_v21, %v2923_v21 }
  0x92   :  { %958 = vrot.lane.b32.xlu1 %v927_v63, %s2369_s0 }
  0x96   :  { %1010 = vrot.lane.b32.xlu0 %v993_v9, %s2370_s1  ;;  %v2947_v9 = vunpack.c.l.b16 %v556_v40 }
  0x97   :  { %1026 = vrot.lane.b32.xlu2 %v1001_v4, %s2370_s1  ;;  %v624_v4 = vld [vmem:[#allocation2 + $0x10] sm:$0xe] }
  0x99   :  { %v2903_v33 = vpop.permute.xlu2 %854 }
  0x9a   :  { %1012 = vrot.lane.b32.xlu1 %v994_v46, %s2370_s1  ;;  %v1072_v46 = vpack.c.b16 %v1056_v44, %v2821_v53  ;;  %v1005_v53 = vpack.c.b16 %v2947_v9, %v2947_v9 }
  0x9c   :  { %v2930_v52 = vpop.permute.xlu1 %836  ;;  %v1091_v36 = vshll.u32 %v1072_v46, 16  ;;  %v1089_v12 = vshrl.u32 %v1072_v46, 16 }
  0x9e   :  { %1016 = vrot.lane.b32.xlu0 %v996_v49, %s2370_s1  ;;  %v835_v51 = vpop.permute.xlu0 %834  ;;  %v1361_v49 = vpack.c.b16 %v2942_v0, %v2942_v0  ;;  %v1093_v8 = vrot.slane %v1091_v36, 1 }
  0x9f   :  { %1032 = vrot.lane.b32.xlu2 %v1004_v11, %s2370_s1  ;;  %v1702_v63 = vsel %vm1696_vm7, %v2574_v45, %v835_v51  ;;  %v2951_v45 = vunpack.c.l.b16 %v557_v48  ;;  %v1073_v11 = vpack.c.b16 %v1057_v54, %v2874_v57  ;;  %v2979_v51 = vld [vmem:[#allocation2 + $0x1c] sm:$0x1] }
  0xa0   :  { %v1094_v48 = vor.u32 %v1093_v8, %v1089_v12  ;;  %v2997_v8 = vld [vmem:[#allocation2 + $0x2c] sm:$0x1] }
  0xa1   :  { %v1098_v15 = vshll.u32 %v1073_v11, 16  ;;  %v1096_v5 = vshrl.u32 %v1073_v11, 16  ;;  %v1425_v11 = vunpack.c.l.b16 %v2979_v51  ;;  %v3003_v51 = vld [vmem:[#allocation2 + $0x34] sm:$0x1] }
  0xa2   :  { %1018 = vrot.lane.b32.xlu1 %v997_v10, %s2370_s1  ;;  %v1616_v10 = vunpack.c.l.b16 %v624_v4 }
  0xa3   :  { %v1100_v38 = vrot.slane %v1098_v15, 1 }
  0xa4   :  { %v1632_v44 = vpack.c.b16 %v1424_v24, %v1616_v10 }
  0xa5   :  { %v1101_v43 = vor.u32 %v1100_v38, %v1096_v5 }
  0xa6   :  { %1022 = vrot.lane.b32.xlu0 %v999_v39, %s2370_s1  ;;  %v2357_v39 = vld [vmem:[#allocation2 + $0x20] sm:$0xf]  ;;  %v1648_v40 = vrot.slane %v1632_v44, 1 }
  0xa7   :  { %1038 = vrot.lane.b32.xlu2 %v1007_v47, %s2370_s1  ;;  %v1006_v47 = vpack.c.b16 %v2951_v45, %v2951_v45  ;;  %v1711_v57 = vsel %vm1696_vm7, %v2357_v39, %v2866_v60  ;;  %v576_v60 = vld [vmem:[#allocation2 + $0x10] sm:$0xe] }
  0xa8   :  { %v1249_v46 = vunpack.c.l.b16 %v576_v60  ;;  %v1060_v60 = vunpack.c.l.b16 %v2997_v8 }
  0xa9   :  { %v2925_v35 = vpop.permute.xlu2 %860 }
  0xaa   :  { %1024 = vrot.lane.b32.xlu1 %v1000_v25, %s2370_s1  ;;  %v1077_v25 = vpack.c.b16 %v1061_v32, %v2894_v34 }
  0xac   :  { %v2960_v37 = vpop.permute.xlu1 %838  ;;  %v1126_v34 = vshll.u32 %v1077_v25, 16  ;;  %v1124_v10 = vshrl.u32 %v1077_v25, 16  ;;  %v1441_v25 = vpack.c.b16 %v1425_v11, %v2942_v0 }
  0xae   :  { %1028 = vrot.lane.b32.xlu0 %v1002_v42, %s2370_s1 }
  0xaf   :  { %1296 = vrot.lane.b32.xlu2 %v1280_v30, %s2371_s2  ;;  %v2982_v4 = vpop.permute.xlu0 %844 }
  0xb1   :  { %v931_v3 = vpop.permute.xlu2 %930 }
  0xb2   :  { %1030 = vrot.lane.b32.xlu1 %v1003_v31, %s2370_s1  ;;  %v2954_v55 = vsel %vm1745_vm8, %v1702_v63, %v931_v3  ;;  %v592_v31 = vld [vmem:[#allocation2 + $0x10] sm:$0xf]  ;;  %v1064_v63 = vunpack.c.l.b16 %v2972_v56 }
  0xb3   :  { %v1344_v3 = vunpack.c.l.b16 %v592_v31  ;;  %v2362_v56 = vld [vmem:[#allocation2 + $0x30] sm:$0xf] }
  0xb4   :  { %v1080_v36 = vpack.c.b16 %v1064_v63, %v2911_v22 }
  0xb5   :  { %v1440_v39 = vpack.c.b16 %v1424_v24, %v1344_v3  ;;  %v1360_v38 = vpack.c.b16 %v1344_v3, %v1344_v3 }
  0xb6   :  { %1034 = vrot.lane.b32.xlu0 %v1005_v53, %s2370_s1  ;;  %v1128_v53 = vrot.slane %v1126_v34, 1  ;;  %v1147_v22 = vshll.u32 %v1080_v36, 16  ;;  %v1145_v24 = vshrl.u32 %v1080_v36, 16  ;;  %v1428_v36 = vunpack.c.l.b16 %v3003_v51 }
  0xb7   :  { %1378 = vrot.lane.b32.xlu2 %v1361_v49, %s2372_s18  ;;  %v1459_v5 = vshll.u32 %v1440_v39, 16  ;;  %v1457_v0 = vshrl.u32 %v1440_v39, 16 }
  0xb8   :  { %v1129_v12 = vor.u32 %v1128_v53, %v1124_v10  ;;  %v1149_v31 = vrot.slane %v1147_v22, 1 }
  0xb9   :  { %v937_v30 = vpop.permute.xlu2 %936  ;;  %v1461_v34 = vrot.slane %v1459_v5, 1 }
  0xba   :  { %1036 = vrot.lane.b32.xlu1 %v1006_v47, %s2370_s1  ;;  %v2977_v42 = vsel %vm1745_vm8, %v1711_v57, %v937_v30  ;;  %v1265_v47 = vpack.c.b16 %v1057_v54, %v1249_v46  ;;  %v1466_v54 = vshll.u32 %v1441_v25, 16  ;;  %v1464_v46 = vshrl.u32 %v1441_v25, 16 }
  0xbb   :  { %v847_v49 = vpop.permute.xlu1 %846  ;;  %v1150_v10 = vor.u32 %v1149_v31, %v1145_v24  ;;  %v579_v31 = vld [vmem:[#allocation2 + $0x28] sm:$0xe] }
  0xbc   :  { %v1720_v15 = vsel %vm1696_vm7, %v2683_v58, %v847_v49  ;;  %v1281_v30 = vrot.slane %v1265_v47, 1  ;;  %v1468_v3 = vrot.slane %v1466_v54, 1  ;;  %v1076_v49 = vpack.c.b16 %v1060_v60, %v2891_v62 }
  0xbe   :  { %1200 = vrot.lane.b32.xlu0 %v1094_v48, %s2374_s20  ;;  %v1469_v8 = vor.u32 %v1468_v3, %v1464_v46  ;;  %v1119_v25 = vshll.u32 %v1076_v49, 16  ;;  %v1117_v54 = vshrl.u32 %v1076_v49, 16 }
  0xbf   :  { %1664 = vrot.lane.b32.xlu2 %v1648_v40, %s2373_s19  ;;  %v3000_v58 = vpop.permute.xlu0 %850  ;;  %v596_v40 = vld [vmem:[#allocation2 + $0x30] sm:$0xf] }
  0xc0   :  { %v3008_v53 = vunpack.c.l.b16 %v596_v40  ;;  %v1121_v24 = vrot.slane %v1119_v25, 1  ;;  %v3026_v40 = vld [vmem:[#allocation2 + $0x64] sm:$0x1] }
  0xc1   :  { %v943_v57 = vpop.permute.xlu2 %942 }
  0xc2   :  { %1202 = vrot.lane.b32.xlu1 %v1101_v43, %s2374_s20  ;;  %v2994_v44 = vsel %vm1745_vm8, %v1720_v15, %v943_v57  ;;  %v625_v43 = vld [vmem:[#allocation2 + $0x18] sm:$0xe]  ;;  %v1462_v57 = vor.u32 %v1461_v34, %v1457_v0  ;;  %v580_v0 = vld [vmem:[#allocation2 + $0x30] sm:$0xe] }
  0xc3   :  { %v597_v15 = vld [vmem:[#allocation2 + $0x38] sm:$0xf] }
  0xc4   :  { %v3017_v62 = vunpack.c.l.b16 %v597_v15  ;;  %v1253_v15 = vunpack.c.l.b16 %v580_v0  ;;  %v2358_v0 = vld [vmem:[#allocation2] sm:$0xf] }
  0xc6   :  { %1298 = vrot.lane.b32.xlu0 %v1281_v30, %s2371_s2  ;;  %v1444_v30 = vpack.c.b16 %v1428_v36, %v3008_v53  ;;  %v1365_v34 = vpack.c.b16 %v3017_v62, %v3017_v62 }
  0xc7   :  { %1210 = vrot.lane.b32.xlu2 %v1129_v12, %s2374_s20  ;;  %v1617_v12 = vunpack.c.l.b16 %v625_v43 }
  0xc9   :  { %v949_v48 = vpop.permute.xlu2 %948 }
  0xca   :  { %1376 = vrot.lane.b32.xlu1 %v1360_v38, %s2372_s18 }
  0xcc   :  { %v853_v47 = vpop.permute.xlu1 %852 }
  0xcd   :  { %v1729_v39 = vsel %vm1696_vm7, %v2743_v13, %v853_v47  ;;  %v1633_v13 = vpack.c.b16 %v1425_v11, %v1617_v12  ;;  %v1065_v11 = vunpack.c.l.b16 %v3026_v40  ;;  %v1122_v47 = vor.u32 %v1121_v24, %v1117_v54  ;;  %v600_v12 = vld [vmem:[#allocation2 + $0x60] sm:$0xf] }
  0xce   :  { %v3014_v22 = vsel %vm1745_vm8, %v1729_v39, %v949_v48  ;;  %1568 = vrot.lane.b32.xlu0 %v1462_v57, %s2375_s21  ;;  %v3023_v5 = vpop.permute.xlu0 %856  ;;  %v1487_v48 = vshll.u32 %v1444_v30, 16  ;;  %v1485_v57 = vshrl.u32 %v1444_v30, 16  ;;  %v3048_v24 = vunpack.c.l.b16 %v600_v12  ;;  %v2359_v12 = vld [vmem:[#allocation2 + $0x10] sm:$0xf] }
  0xcf   :  { %1216 = vrot.lane.b32.xlu2 %v1150_v10, %s2374_s20  ;;  %v1649_v3 = vrot.slane %v1633_v13, 1  ;;  %v1252_v10 = vunpack.c.l.b16 %v579_v31  ;;  %v1735_v51 = vsel %vm1696_vm7, %v2752_v16, %v3023_v5  ;;  %v587_v16 = vld [vmem:[#allocation2 + $0x78] sm:$0xe]  ;;  %v595_v5 = vld [vmem:[#allocation2 + $0x28] sm:$0xf] }
  0xd0   :  { %v1489_v39 = vrot.slane %v1487_v48, 1 }
  0xd1   :  { %v955_v38 = vpop.permute.xlu2 %954  ;;  %v1268_v25 = vpack.c.b16 %v1060_v60, %v1252_v10  ;;  %v1699_v60 = vsel %vm1696_vm7, %v2358_v0, %v2915_v28 }
  0xd2   :  { %1570 = vrot.lane.b32.xlu1 %v1469_v8, %s2375_s21  ;;  %v3037_v8 = vld [vmem:[#allocation2 + $0x64] sm:$0x1]  ;;  %v1490_v30 = vor.u32 %v1489_v39, %v1485_v57  ;;  %v583_v57 = vld [vmem:[#allocation2 + $0x58] sm:$0xe]  ;;  %v3065_v39 = vld [vmem:[#allocation2 + $0x3c] sm:$0x1] }
  0xd3   :  { %v3654_v31 = vunpack.c.l.b16 %v3037_v8  ;;  %v1284_v48 = vrot.slane %v1268_v25, 1  ;;  %v1705_v25 = vsel %vm1696_vm7, %v2359_v12, %v2930_v52  ;;  %v1429_v52 = vunpack.c.l.b16 %v3065_v39 }
  0xd4   :  { %v859_v46 = vpop.permute.xlu1 %858 }
  0xd5   :  { %v1738_v43 = vsel %vm1696_vm7, %v2760_v29, %v859_v46  ;;  %v1081_v29 = vpack.c.b16 %v1065_v11, %v2871_v23  ;;  %v601_v23 = vld [vmem:[#allocation2 + $0x68] sm:$0xf]  ;;  %v1448_v10 = vpack.c.b16 %v3654_v31, %v3048_v24 }
  0xd6   :  { %v3034_v49 = vsel %vm1745_vm8, %v1738_v43, %v955_v38  ;;  %1666 = vrot.lane.b32.xlu0 %v1649_v3, %s2373_s19  ;;  %v1269_v38 = vpack.c.b16 %v1061_v32, %v1253_v15  ;;  %v3058_v43 = vunpack.c.l.b16 %v601_v23 }
  0xd7   :  { %1386 = vrot.lane.b32.xlu2 %v1365_v34, %s2372_s18  ;;  %v1154_v3 = vshll.u32 %v1081_v29, 16  ;;  %v1152_v28 = vshrl.u32 %v1081_v29, 16  ;;  %v1515_v0 = vshll.u32 %v1448_v10, 16 }
  0xd8   :  { %v3046_v54 = vpop.permute.xlu0 %862  ;;  %v1285_v61 = vrot.slane %v1269_v38, 1  ;;  %v584_v38 = vld [vmem:[#allocation2 + $0x60] sm:$0xe] }
  0xd9   :  { %v1009_v13 = vpop.permute.xlu2 %1008  ;;  %v1257_v31 = vunpack.c.l.b16 %v584_v38 }
  0xda   :  { %1208 = vrot.lane.b32.xlu1 %v1122_v47, %s2374_s20  ;;  %v1156_v47 = vrot.slane %v1154_v3, 1  ;;  %v1256_v3 = vunpack.c.l.b16 %v583_v57 }
  0xdc   :  { %v929_v34 = vpop.permute.xlu1 %928 }
  0xdd   :  { %v1747_v46 = vsel %vm1745_vm8, %v1699_v60, %v929_v34  ;;  %v2360_v60 = vld [vmem:[#allocation2 + $0x18] sm:$0xf] }
  0xde   :  { %v3055_v32 = vsel %vm1778_vm9, %v1747_v46, %v1009_v13  ;;  %1304 = vrot.lane.b32.xlu0 %v1284_v48, %s2371_s2  ;;  %v1708_v29 = vsel %vm1696_vm7, %v2360_v60, %v2960_v37  ;;  %v1157_v48 = vor.u32 %v1156_v47, %v1152_v28  ;;  %v1513_v37 = vshrl.u32 %v1448_v10, 16 }
  0xdf   :  { %1576 = vrot.lane.b32.xlu2 %v1490_v30, %s2375_s21  ;;  %v1369_v30 = vpack.c.b16 %v3058_v43, %v3058_v43  ;;  %v1517_v60 = vrot.slane %v1515_v0, 1  ;;  %v1272_v28 = vpack.c.b16 %v1064_v63, %v1256_v3  ;;  %v1445_v47 = vpack.c.b16 %v1429_v52, %v3017_v62  ;;  %v577_v3 = vld [vmem:[#allocation2 + $0x18] sm:$0xe] }
  0xe0   :  { %v933_v13 = vpop.permute.xlu0 %932  ;;  %v1717_v63 = vsel %vm1696_vm7, %v2362_v56, %v2982_v4 }
  0xe1   :  { %v1015_v15 = vpop.permute.xlu2 %1014  ;;  %v3074_v34 = vsel %vm1745_vm8, %v1705_v25, %v933_v13  ;;  %v633_v25 = vld [vmem:[#allocation2 + $0x68] sm:$0xe]  ;;  %v1492_v4 = vshrl.u32 %v1445_v47, 16 }
  0xe2   :  { %1306 = vrot.lane.b32.xlu1 %v1285_v61, %s2371_s2  ;;  %v1364_v61 = vpack.c.b16 %v3008_v53, %v3008_v53  ;;  %v1273_v53 = vpack.c.b16 %v1065_v11, %v1257_v31  ;;  %v2361_v13 = vld [vmem:[#allocation2 + $0x28] sm:$0xf]  ;;  %v1625_v0 = vunpack.c.l.b16 %v633_v25  ;;  %v1494_v11 = vshll.u32 %v1445_v47, 16  ;;  %v628_v25 = vld [vmem:[#allocation2 + $0x30] sm:$0xe] }
  0xe3   :  { %v1714_v10 = vsel %vm1696_vm7, %v2361_v13, %v2883_v6  ;;  %v629_v13 = vld [vmem:[#allocation2 + $0x38] sm:$0xe] }
  0xe4   :  { %v935_v23 = vpop.permute.xlu1 %934 }
  0xe5   :  { %v1753_v46 = vsel %vm1745_vm8, %v1708_v29, %v935_v23  ;;  %v1288_v23 = vrot.slane %v1272_v28, 1  ;;  %v561_v28 = vld [vmem:[#allocation2 + $0x1c] sm:$0x1] }
  0xe6   :  { %v3081_v12 = vsel %vm1778_vm9, %v1753_v46, %v1015_v15  ;;  %1218 = vrot.lane.b32.xlu0 %v1157_v48, %s2374_s20  ;;  %v617_v15 = vld [vmem:[#allocation2 + $0x6c] sm:$0x1]  ;;  %v1289_v48 = vrot.slane %v1273_v53, 1 }
  0xe7   :  { %1394 = vrot.lane.b32.xlu2 %v1369_v30, %s2372_s18  ;;  %v1518_v30 = vor.u32 %v1517_v60, %v1513_v37  ;;  %v1433_v31 = vunpack.c.l.b16 %v617_v15  ;;  %v1496_v37 = vrot.slane %v1494_v11, 1  ;;  %v2363_v15 = vld [vmem:[#allocation2 + $0x50] sm:$0xf]  ;;  %v1058_v11 = vunpack.c.l.b16 %v561_v28 }
  0xe8   :  { %v939_v38 = vpop.permute.xlu0 %938 }
  0xe9   :  { %v1021_v57 = vpop.permute.xlu2 %1020  ;;  %v3098_v62 = vsel %vm1745_vm8, %v1714_v10, %v939_v38  ;;  %v1641_v6 = vpack.c.b16 %v1433_v31, %v1625_v0  ;;  %v1250_v38 = vunpack.c.l.b16 %v577_v3  ;;  %v2364_v0 = vld [vmem:[#allocation2 + $0x58] sm:$0xf] }
  0xea   :  { %1384 = vrot.lane.b32.xlu1 %v1364_v61, %s2372_s18  ;;  %v3105_v61 = vld [vmem:[#allocation2 + $0x84] sm:$0x1]  ;;  %v1726_v47 = vsel %vm1696_vm7, %v2364_v0, %v3000_v58 }
  0xeb   :  { %v1657_v10 = vrot.slane %v1641_v6, 1  ;;  %v1621_v6 = vunpack.c.l.b16 %v629_v13  ;;  %v1266_v3 = vpack.c.b16 %v1058_v11, %v1250_v38 }
  0xec   :  { %v941_v29 = vpop.permute.xlu1 %940 }
  0xed   :  { %v1759_v40 = vsel %vm1745_vm8, %v1717_v63, %v941_v29  ;;  %v1497_v29 = vor.u32 %v1496_v37, %v1492_v4  ;;  %v1449_v37 = vpack.c.b16 %v1433_v31, %v3058_v43 }
  0xee   :  { %v3102_v46 = vsel %vm1778_vm9, %v1759_v40, %v1021_v57  ;;  %1312 = vrot.lane.b32.xlu0 %v1288_v23, %s2371_s2  ;;  %v1723_v57 = vsel %vm1696_vm7, %v2363_v15, %v2843_v17  ;;  %v1620_v40 = vunpack.c.l.b16 %v628_v25  ;;  %v1368_v17 = vpack.c.b16 %v3048_v24, %v3048_v24 }
  0xef   :  { %1584 = vrot.lane.b32.xlu2 %v1518_v30, %s2375_s21  ;;  %v1069_v30 = vunpack.c.l.b16 %v3105_v61  ;;  %v1637_v24 = vpack.c.b16 %v1429_v52, %v1621_v6  ;;  %v1522_v31 = vshll.u32 %v1449_v37, 16 }
  0xf0   :  { %v945_v53 = vpop.permute.xlu0 %944  ;;  %v1636_v4 = vpack.c.b16 %v1428_v36, %v1620_v40 }
  0xf1   :  { %v1027_v60 = vpop.permute.xlu2 %1026  ;;  %v3115_v56 = vsel %vm1745_vm8, %v1723_v57, %v945_v53  ;;  %v1085_v58 = vpack.c.b16 %v1069_v30, %v2947_v9  ;;  %v632_v57 = vld [vmem:[#allocation2 + $0x60] sm:$0xe]  ;;  %v1282_v9 = vrot.slane %v1266_v3, 1  ;;  %v3136_v53 = vld [vmem:[#allocation2 + $0x24] sm:$0x1]  ;;  %v1524_v40 = vrot.slane %v1522_v31, 1 }
  0xf2   :  { %1314 = vrot.lane.b32.xlu1 %v1289_v48, %s2371_s2  ;;  %v1652_v39 = vrot.slane %v1636_v4, 1  ;;  %v1624_v38 = vunpack.c.l.b16 %v632_v57  ;;  %v1059_v0 = vunpack.c.l.b16 %v3136_v53  ;;  %v2366_v3 = vld [vmem:[#allocation2 + $0x80] sm:$0xf]  ;;  %v3162_v57 = vunpack.c.l.b16 %v595_v5 }
  0xf3   :  { %v1182_v13 = vshll.u32 %v1085_v58, 16  ;;  %v1741_v4 = vsel %vm1696_vm7, %v2366_v3, %v2925_v35  ;;  %v1744_v35 = vsel %vm1696_vm7, %v2778_v50, %v3046_v54 }
  0xf4   :  { %v947_v63 = vpop.permute.xlu1 %946 }
  0xf5   :  { %v1765_v23 = vsel %vm1745_vm8, %v1726_v47, %v947_v63  ;;  %v1180_v47 = vshrl.u32 %v1085_v58, 16  ;;  %v1184_v63 = vrot.slane %v1182_v13, 1  ;;  %v3661_v58 = vunpack.c.l.b16 %v3037_v8 }
  0xf6   :  { %v3121_v48 = vsel %vm1778_vm9, %v1765_v23, %v1027_v60  ;;  %1578 = vrot.lane.b32.xlu0 %v1497_v29, %s2375_s21  ;;  %v2365_v60 = vld [vmem:[#allocation2 + $0x68] sm:$0xf]  ;;  %v3150_v29 = vld [vmem:[#allocation2 + $0x2c] sm:$0x1]  ;;  %v1520_v23 = vshrl.u32 %v1449_v37, 16 }
  0xf7   :  { %1682 = vrot.lane.b32.xlu2 %v1657_v10, %s2373_s19  ;;  %v1732_v28 = vsel %vm1696_vm7, %v2365_v60, %v2903_v33  ;;  %v1653_v10 = vrot.slane %v1637_v24, 1  ;;  %v1075_v24 = vpack.c.b16 %v1059_v0, %v2838_v41  ;;  %v571_v60 = vld [vmem:[#allocation2 + $0x7c] sm:$0x1]  ;;  %v1185_v37 = vor.u32 %v1184_v63, %v1180_v47 }
  0xf8   :  { %v951_v15 = vpop.permute.xlu0 %950 }
  0xf9   :  { %v1033_v25 = vpop.permute.xlu2 %1032  ;;  %v3142_v36 = vsel %vm1745_vm8, %v1732_v28, %v951_v15  ;;  %v1260_v15 = vunpack.c.l.b16 %v587_v16  ;;  %v1110_v47 = vshrl.u32 %v1075_v24, 16  ;;  %v578_v16 = vld [vmem:[#allocation2 + $0x20] sm:$0xe] }
  0xfa   :  { %1392 = vrot.lane.b32.xlu1 %v1368_v17, %s2372_s18  ;;  %v1074_v17 = vpack.c.b16 %v1058_v11, %v2877_v14  ;;  %v1427_v14 = vunpack.c.l.b16 %v3150_v29  ;;  %v586_v29 = vld [vmem:[#allocation2 + $0x70] sm:$0xe] }
  0xfc   :  { %v953_v43 = vpop.permute.xlu1 %952  ;;  %v1105_v41 = vshll.u32 %v1074_v17, 16  ;;  %v1443_v50 = vpack.c.b16 %v1427_v14, %v3162_v57  ;;  %v1103_v54 = vshrl.u32 %v1074_v17, 16 }
  0xfd   :  { %v1771_v52 = vsel %vm1745_vm8, %v1735_v51, %v953_v43  ;;  %v1068_v51 = vunpack.c.l.b16 %v571_v60 }
  0xfe   :  { %v3146_v33 = vsel %vm1778_vm9, %v1771_v52, %v1033_v25  ;;  %1672 = vrot.lane.b32.xlu0 %v1652_v39, %s2373_s19  ;;  %v1640_v25 = vpack.c.b16 %v3661_v58, %v1624_v38  ;;  %v1112_v52 = vshll.u32 %v1075_v24, 16 }
  0xff   :  { %1300 = vrot.lane.b32.xlu2 %v1282_v9, %s2371_s2  ;;  %v1525_v9 = vor.u32 %v1524_v40, %v1520_v23  ;;  %v1276_v31 = vpack.c.b16 %v1068_v51, %v1260_v15  ;;  %v1084_v5 = vpack.c.b16 %v1068_v51, %v2888_v20  ;;  %v1478_v20 = vshrl.u32 %v1443_v50, 16  ;;  %v626_v15 = vld [vmem:[#allocation2 + $0x20] sm:$0xe]  ;;  %v610_v51 = vld [vmem:[#allocation2 + $0x24] sm:$0x1] }
 0x100   :  { %v957_v28 = vpop.permute.xlu0 %956  ;;  %v1656_v43 = vrot.slane %v1640_v25, 1  ;;  %v1114_v63 = vrot.slane %v1112_v52, 1  ;;  %v1251_v25 = vunpack.c.l.b16 %v578_v16  ;;  %v1426_v16 = vunpack.c.l.b16 %v610_v51 }
 0x101   :  { %v1039_v6 = vpop.permute.xlu2 %1038  ;;  %v3169_v11 = vsel %vm1745_vm8, %v1741_v4, %v957_v28  ;;  %v1292_v40 = vrot.slane %v1276_v31, 1  ;;  %v210_v4 = vld [vmem:[#allocation2 + $0x44] sm:$0x1]  ;;  %v1175_v28 = vshll.u32 %v1084_v5, 16  ;;  %v1618_v31 = vunpack.c.l.b16 %v626_v15 }
 0x102   :  { %1674 = vrot.lane.b32.xlu1 %v1653_v10, %s2373_s19  ;;  %v1107_v10 = vrot.slane %v1105_v41, 1  ;;  %v1115_v60 = vor.u32 %v1114_v63, %v1110_v47  ;;  %v211_v24 = vsel %vm2415_vm5, 0, %v210_v4  ;;  %v594_v63 = vld [vmem:[#allocation2 + $0x20] sm:$0xf] }
 0x103   :  { %212 = vst [vmem:[#allocation2 + $0x44] sm:$0x1] %v211_v24  ;;  %v1346_v4 = vunpack.c.l.b16 %v594_v63 }
 0x104   :  { %v959_v8 = vpop.permute.xlu1 %958  ;;  %v1108_v58 = vor.u32 %v1107_v10, %v1103_v54 }
 0x105   :  { %v1777_v13 = vsel %vm1745_vm8, %v1744_v35, %v959_v8  ;;  %v605_v35 = vld [vmem:[#allocation2 + $0x88] sm:$0xf]  ;;  %v3193_v8 = vld [vmem:[#allocation2 + $0x8c] sm:$0x1]  ;;  %v1362_v51 = vpack.c.b16 %v1346_v4, %v1346_v4 }
 0x106   :  { %v3173_v39 = vsel %vm1778_vm9, %v1777_v13, %v1039_v6  ;;  %1586 = vrot.lane.b32.xlu0 %v1525_v9, %s2375_s21  ;;  %v1480_v6 = vshll.u32 %v1443_v50, 16  ;;  %v1173_v9 = vshrl.u32 %v1084_v5, 16  ;;  %v1177_v13 = vrot.slane %v1175_v28, 1 }
 0x107   :  { %1226 = vrot.lane.b32.xlu2 %v1185_v37, %s2374_s20  ;;  %v3201_v50 = vunpack.c.l.b16 %v605_v35  ;;  %v1437_v54 = vunpack.c.l.b16 %v3193_v8  ;;  %v300_v5 = vrot.slane %v2823_v59, 4  ;;  %v1984_v59 = vld [vmem:[%s3651_s3 + $0x20] sm:$0xf] }
 0x108   :  { %v3184_v23 = vpop.permute.xlu0 %1010  ;;  %v1482_v37 = vrot.slane %v1480_v6, 1  ;;  %v1634_v6 = vpack.c.b16 %v1426_v16, %v1618_v31  ;;  %v2042_v28 = vunpack.c.l.b16 %v1984_v59  ;;  %v1363_v31 = vpack.c.b16 %v3162_v57, %v3162_v57  ;;  %v2289_v57 = vld [vmem:[%s3651_s3 + $0x18] sm:$0xff]  ;;  %v604_v59 = vld [vmem:[#allocation2 + $0x80] sm:$0xf] }
 0x109   :  { %v3180_v38 = vpop.permute.xlu2 %1296 }
 0x10a   :  { %1680 = vrot.lane.b32.xlu1 %v1656_v43, %s2373_s19  ;;  %v1483_v52 = vor.u32 %v1482_v37, %v1478_v20  ;;  %v1650_v20 = vrot.slane %v1634_v6, 1 }
 0x10c   :  { %v1013_v3 = vpop.permute.xlu1 %1012 }
 0x10d   :  { %v3188_v17 = vsel %vm1778_vm9, %v3074_v34, %v1013_v3  ;;  %v1267_v34 = vpack.c.b16 %v1059_v0, %v1251_v25  ;;  %v1453_v3 = vpack.c.b16 %v1437_v54, %v3201_v50  ;;  %v588_v25 = vld [vmem:[#allocation2 + $0x80] sm:$0xe] }
 0x10e   :  { %1204 = vrot.lane.b32.xlu0 %v1108_v58, %s2374_s20  ;;  %v3217_v58 = vld [vmem:[#allocation2 + $0x3c] sm:$0x1] }
 0x10f   :  { %1320 = vrot.lane.b32.xlu2 %v1292_v40, %s2371_s2  ;;  %v1283_v0 = vrot.slane %v1267_v34, 1  ;;  %v1178_v40 = vor.u32 %v1177_v13, %v1173_v9  ;;  %v1550_v37 = vshll.u32 %v1453_v3, 16  ;;  %v1062_v15 = vunpack.c.l.b16 %v3217_v58 }
 0x110   :  { %v1017_v43 = vpop.permute.xlu0 %1016  ;;  %v2047_v13 = vpack.c.b16 %v2042_v28, %v2042_v28 }
 0x111   :  { %v3199_v41 = vpop.permute.xlu2 %1378  ;;  %v3206_v10 = vsel %vm1778_vm9, %v2977_v42, %v1017_v43  ;;  %v444_v42 = vld [vmem:[#allocation2 + $0x44] sm:$0x1]  ;;  %v1552_v63 = vrot.slane %v1550_v37, 1  ;;  %v1356_v37 = vunpack.c.l.b16 %v604_v59  ;;  %v637_v59 = vld [vmem:[#allocation2 + $0x88] sm:$0xe] }
 0x112   :  { %1206 = vrot.lane.b32.xlu1 %v1115_v60, %s2374_s20  ;;  %v1442_v60 = vpack.c.b16 %v1426_v16, %v1346_v4  ;;  %v1078_v16 = vpack.c.b16 %v1062_v15, %v2853_v19 }
 0x114   :  { %v1019_v53 = vpop.permute.xlu1 %1018  ;;  %v1133_v19 = vshll.u32 %v1078_v16, 16 }
 0x115   :  { %v3210_v47 = vsel %vm1778_vm9, %v3098_v62, %v1019_v53  ;;  %v445_v62 = vsel %vm2408_vm3, %v300_v5, %v444_v42  ;;  %v1473_v53 = vshll.u32 %v1442_v60, 16  ;;  %v1471_v5 = vshrl.u32 %v1442_v60, 16  ;;  %v3250_v42 = vld [vmem:[#allocation2 + $0x84] sm:$0x1] }
 0x116   :  { %1302 = vrot.lane.b32.xlu0 %v1283_v0, %s2371_s2  ;;  %446 = vst [vmem:[#allocation2 + $0x44] sm:$0x1] %v445_v62  ;;  %v2079_v0 = vsel %vm2077_vm10, %v2047_v13, 0  ;;  %v627_v13 = vld [vmem:[#allocation2 + $0x28] sm:$0xe] }
 0x117   :  { %1574 = vrot.lane.b32.xlu2 %v1483_v52, %s2375_s21  ;;  %v1261_v52 = vunpack.c.l.b16 %v588_v25  ;;  %2084 = vmatpush.bf16.msra.mxu0 %v2079_v0  ;;  %v2288_v25 = vld [vmem:[%s3651_s3 + $0x10] sm:$0xff] }
 0x118   :  { %v1023_v24 = vpop.permute.xlu0 %1022  ;;  %2329 = vmatpush.bf16.msra.mxu1 %v2079_v0  ;;  %2330 = vmatpush.bf16.msra.mxu2 %v2079_v0 }
 0x119   :  { %v3229_v35 = vsel %vm1778_vm9, %v2994_v44, %v1023_v24  ;;  %v3231_v9 = vpop.permute.xlu2 %1664  ;;  %v1548_v44 = vshrl.u32 %v1453_v3, 16  ;;  %2331 = vmatpush.bf16.msra.mxu3 %v2079_v0  ;;  %v1131_v24 = vshrl.u32 %v1078_v16, 16  ;;  %v1372_v16 = vpack.c.b16 %v1356_v37, %v1356_v37 }
 0x11a   :  { %1224 = vrot.lane.b32.xlu1 %v1178_v40, %s2374_s20  ;;  %v1475_v40 = vrot.slane %v1473_v53, 1 }
 0x11b   :  { %v1553_v3 = vor.u32 %v1552_v63, %v1548_v44  ;;  %2085 = vmatpush.bf16.msra.mxu0 %v2289_v57 }
 0x11c   :  { %v1025_v34 = vpop.permute.xlu1 %1024  ;;  %2332 = vmatpush.bf16.msra.mxu1 %v2289_v57  ;;  %2333 = vmatpush.bf16.msra.mxu2 %v2289_v57  ;;  %v1476_v60 = vor.u32 %v1475_v40, %v1471_v5  ;;  %v2286_v40 = vld [vmem:[%s3651_s3] sm:$0xff] }
 0x11d   :  { %v3235_v43 = vsel %vm1778_vm9, %v3115_v56, %v1025_v34  ;;  %v1277_v56 = vpack.c.b16 %v1069_v30, %v1261_v52  ;;  %2334 = vmatpush.bf16.msra.mxu3 %v2289_v57  ;;  %v582_v34 = vld [vmem:[#allocation2 + $0x40] sm:$0xe]  ;;  %v566_v52 = vld [vmem:[#allocation2 + $0x44] sm:$0x1]  ;;  %v1619_v57 = vunpack.c.l.b16 %v627_v13 }
 0x11e   :  { %1380 = vrot.lane.b32.xlu0 %v1362_v51, %s2372_s18  ;;  %v1255_v0 = vunpack.c.l.b16 %v582_v34  ;;  %v1063_v5 = vunpack.c.l.b16 %v566_v52  ;;  %v3297_v52 = vld [vmem:[#allocation2 + $0x6c] sm:$0x1]  ;;  %v3344_v1 = vld [vmem:[#allocation2 + $0x44] sm:$0x1] }
 0x11f   :  { %1668 = vrot.lane.b32.xlu2 %v1650_v20, %s2373_s19  ;;  %v1293_v30 = vrot.slane %v1277_v56, 1  ;;  %v1135_v20 = vrot.slane %v1133_v19, 1  ;;  %2086 = vmatpush.bf16.msra.mxu0 %v2288_v25 }
 0x120   :  { %v1029_v6 = vpop.permute.xlu0 %1028  ;;  %2335 = vmatpush.bf16.msra.mxu1 %v2288_v25  ;;  %2336 = vmatpush.bf16.msra.mxu2 %v2288_v25 }
 0x121   :  { %v3254_v4 = vsel %vm1778_vm9, %v3014_v22, %v1029_v6  ;;  %v3263_v28 = vpop.permute.xlu2 %1210  ;;  %v1436_v22 = vunpack.c.l.b16 %v3250_v42  ;;  %2337 = vmatpush.bf16.msra.mxu3 %v2288_v25  ;;  %v1136_v53 = vor.u32 %v1135_v20, %v1131_v24  ;;  %v1373_v6 = vpack.c.b16 %v3201_v50, %v3201_v50  ;;  %v636_v50 = vld [vmem:[#allocation2 + $0x80] sm:$0xe] }
 0x122   :  { %1382 = vrot.lane.b32.xlu1 %v1363_v31, %s2372_s18  ;;  %v598_v24 = vld [vmem:[#allocation2 + $0x40] sm:$0xf] }
 0x123   :  { %v1452_v51 = vpack.c.b16 %v1436_v22, %v1356_v37  ;;  %v1628_v37 = vunpack.c.l.b16 %v636_v50  ;;  %v3293_v13 = vunpack.c.l.b16 %v598_v24 }
 0x124   :  { %v1031_v61 = vpop.permute.xlu1 %1030 }
 0x125   :  { %v3258_v62 = vsel %vm1778_vm9, %v3142_v36, %v1031_v61  ;;  %v2287_v36 = vld [vmem:[%s3651_s3 + $0x8] sm:$0xff]  ;;  %v1541_v19 = vshrl.u32 %v1452_v51, 16 }
 0x126   :  { %1322 = vrot.lane.b32.xlu0 %v1293_v30, %s2371_s2  ;;  %2087 = vmatpush.bf16.msra.mxu0 %v2287_v36 }
 0x127   :  { %1594 = vrot.lane.b32.xlu2 %v1553_v3, %s2375_s21  ;;  %2338 = vmatpush.bf16.msra.mxu1 %v2287_v36  ;;  %v1271_v3 = vpack.c.b16 %v1063_v5, %v1255_v0  ;;  %v570_v0 = vld [vmem:[#allocation2 + $0x74] sm:$0x1] }
 0x128   :  { %v1035_v31 = vpop.permute.xlu0 %1034  ;;  %2339 = vmatpush.bf16.msra.mxu2 %v2287_v36  ;;  %2340 = vmatpush.bf16.msra.mxu3 %v2287_v36  ;;  %v1629_v36 = vunpack.c.l.b16 %v637_v59  ;;  %v1782_v59 = vsel %vm1778_vm9, %v2954_v55, %v3184_v23 }
 0x129   :  { %v3274_v44 = vsel %vm1778_vm9, %v3034_v49, %v1035_v31  ;;  %v1543_v49 = vshll.u32 %v1452_v51, 16  ;;  %v3286_v42 = vpop.permute.xlu2 %1216  ;;  %v1287_v25 = vrot.slane %v1271_v3, 1  ;;  %v1079_v51 = vpack.c.b16 %v1063_v5, %v2908_v7  ;;  %v234_v7 = vld [vmem:[#allocation2 + $0x94] sm:$0x1] }
 0x12a   :  { %1572 = vrot.lane.b32.xlu1 %v1476_v60, %s2375_s21  ;;  %2088 = vmatpush.bf16.msra.mxu0 %v2286_v40  ;;  %v1067_v3 = vunpack.c.l.b16 %v570_v0  ;;  %v235_v8 = vsel %vm2415_vm5, 0, %v234_v7 }
 0x12b   :  { %2341 = vmatpush.bf16.msra.mxu1 %v2286_v40  ;;  %v1545_v61 = vrot.slane %v1543_v49, 1  ;;  %v1140_v49 = vshll.u32 %v1079_v51, 16  ;;  %236 = vst [vmem:[#allocation2 + $0x94] sm:$0x1] %v235_v8  ;;  %v1138_v2 = vshrl.u32 %v1079_v51, 16 }
 0x12c   :  { %v1037_v63 = vpop.permute.xlu1 %1036  ;;  %2342 = vmatpush.bf16.msra.mxu2 %v2286_v40  ;;  %2343 = vmatpush.bf16.msra.mxu3 %v2286_v40  ;;  %v1259_v40 = vunpack.c.l.b16 %v586_v29  ;;  %v364_v29 = vrot.slane %v2855_v26, 4 }
 0x12d   :  { %v3278_v56 = vsel %vm1778_vm9, %v3169_v11, %v1037_v63  ;;  %v1635_v11 = vpack.c.b16 %v1427_v14, %v1619_v57  ;;  %v1546_v34 = vor.u32 %v1545_v61, %v1541_v19  ;;  %v1644_v14 = vpack.c.b16 %v1436_v22, %v1628_v37 }
 0x12e   :  { %1400 = vrot.lane.b32.xlu0 %v1372_v16, %s2372_s18  ;;  %v581_v16 = vld [vmem:[#allocation2 + $0x38] sm:$0xe]  ;;  %v1366_v57 = vpack.c.b16 %v3293_v13, %v3293_v13  ;;  %v1066_v22 = vunpack.c.l.b16 %v3297_v52 }
 0x12f   :  { %1212 = vrot.lane.b32.xlu2 %v1136_v53, %s2374_s20  ;;  %v1651_v20 = vrot.slane %v1635_v11, 1  ;;  %v1645_v53 = vpack.c.b16 %v1437_v54, %v1629_v36  ;;  %v1660_v5 = vrot.slane %v1644_v14, 1  ;;  %v1254_v19 = vunpack.c.l.b16 %v581_v16  ;;  %v602_v36 = vld [vmem:[#allocation2 + $0x70] sm:$0xf] }
 0x130   :  { %v1201_v30 = vpop.permute.xlu0 %1200  ;;  %v1275_v54 = vpack.c.b16 %v1067_v3, %v1259_v40  ;;  %v1082_v50 = vpack.c.b16 %v1066_v22, %v2923_v21 }
 0x131   :  { %v3300_v31 = vpop.permute.xlu2 %1386  ;;  %v1661_v11 = vrot.slane %v1645_v53, 1  ;;  %v1813_v61 = vsel %vm1811_vm11, %v3055_v32, %v1201_v30  ;;  %v1270_v32 = vpack.c.b16 %v1062_v15, %v1254_v19  ;;  %v1083_v30 = vpack.c.b16 %v1067_v3, %v2928_v18 }
 0x132   :  { %1402 = vrot.lane.b32.xlu1 %v1373_v6, %s2372_s18  ;;  %v1846_v21 = vsel %vm1844_vm12, %v1813_v61, %v3180_v38  ;;  %v1291_v37 = vrot.slane %v1275_v54, 1  ;;  %v492_v51 = vld [vmem:[#allocation2 + $0x94] sm:$0x1]  ;;  %v3333_v53 = vunpack.c.l.b16 %v602_v36  ;;  %v1159_v26 = vshrl.u32 %v1082_v50, 16 }
 0x133   :  { %v1286_v18 = vrot.slane %v1270_v32, 1  ;;  %v1168_v14 = vshll.u32 %v1083_v30, 16  ;;  %v493_v0 = vsel %vm2408_vm3, %v364_v29, %v492_v51  ;;  %v1166_v7 = vshrl.u32 %v1083_v30, 16 }
 0x134   :  { %v1203_v60 = vpop.permute.xlu1 %1202  ;;  %494 = vst [vmem:[#allocation2 + $0x94] sm:$0x1] %v493_v0 }
 0x135   :  { %v1815_v24 = vsel %vm1811_vm11, %v1782_v59, %v1203_v60  ;;  %v1161_v60 = vshll.u32 %v1082_v50, 16  ;;  %v599_v59 = vld [vmem:[#allocation2 + $0x48] sm:$0xf] }
 0x136   :  { %1670 = vrot.lane.b32.xlu0 %v1651_v20, %s2373_s19 }
 0x137   :  { %1310 = vrot.lane.b32.xlu2 %v1287_v25, %s2371_s2  ;;  %v1142_v25 = vrot.slane %v1140_v49, 1  ;;  %v615_v49 = vld [vmem:[#allocation2 + $0x4c] sm:$0x1] }
 0x138   :  { %v1299_v63 = vpop.permute.xlu0 %1298 }
 0x139   :  { %v1848_v58 = vsel %vm1844_vm12, %v1815_v24, %v1299_v63  ;;  %v1143_v15 = vor.u32 %v1142_v25, %v1138_v2  ;;  %v631_v63 = vld [vmem:[#allocation2 + $0x48] sm:$0xe]  ;;  %v1430_v2 = vunpack.c.l.b16 %v3344_v1  ;;  %v1431_v25 = vunpack.c.l.b16 %v615_v49  ;;  %v630_v49 = vld [vmem:[#allocation2 + $0x40] sm:$0xe] }
 0x13a   :  { %1592 = vrot.lane.b32.xlu1 %v1546_v34, %s2375_s21  ;;  %v3327_v34 = vpop.permute.xlu2 %1576  ;;  %v1881_v16 = vsel %vm1877_vm13, %v1848_v58, %v3199_v41  ;;  %v585_v41 = vld [vmem:[#allocation2 + $0x68] sm:$0xe]  ;;  %v1623_v19 = vunpack.c.l.b16 %v631_v63  ;;  %v618_v58 = vld [vmem:[#allocation2 + $0x74] sm:$0x1] }
 0x13b   :  { %v1258_v30 = vunpack.c.l.b16 %v585_v41  ;;  %v619_v41 = vld [vmem:[#allocation2 + $0x7c] sm:$0x1] }
 0x13c   :  { %v1377_v6 = vpop.permute.xlu1 %1376 }
 0x13d   :  { %v1879_v55 = vsel %vm1877_vm13, %v1846_v21, %v1377_v6  ;;  %v1274_v36 = vpack.c.b16 %v1066_v22, %v1258_v30 }
 0x13e   :  { %1688 = vrot.lane.b32.xlu0 %v1660_v5, %s2373_s19  ;;  %v1170_v5 = vrot.slane %v1168_v14, 1 }
 0x13f   :  { %1388 = vrot.lane.b32.xlu2 %v1366_v57, %s2372_s18  ;;  %v1163_v57 = vrot.slane %v1161_v60, 1  ;;  %v1446_v60 = vpack.c.b16 %v1430_v2, %v3293_v13 }
 0x140   :  { %v1569_v20 = vpop.permute.xlu0 %1568  ;;  %v1171_v32 = vor.u32 %v1170_v5, %v1166_v7 }
 0x141   :  { %v1912_v38 = vsel %vm1910_vm14, %v1879_v55, %v1569_v20  ;;  %v1164_v54 = vor.u32 %v1163_v57, %v1159_v26  ;;  %v1639_v20 = vpack.c.b16 %v1431_v25, %v1623_v19  ;;  %v634_v55 = vld [vmem:[#allocation2 + $0x70] sm:$0xe]  ;;  %v1434_v26 = vunpack.c.l.b16 %v618_v58 }
 0x142   :  { %1690 = vrot.lane.b32.xlu1 %v1661_v11, %s2373_s19  ;;  %v1945_v6 = vsel %vm1943_vm15, %v1912_v38, %v3231_v9  ;;  %v1370_v11 = vpack.c.b16 %v3333_v53, %v3333_v53  ;;  %v3352_v24 = vpop.permute.xlu2 %1394  ;;  %v1626_v14 = vunpack.c.l.b16 %v634_v55  ;;  %v1290_v57 = vrot.slane %v1274_v36, 1  ;;  %v3384_v55 = vld [vmem:[#allocation2 + $0x8c] sm:$0x1] }
 0x143   :  { %v2001_v50 = vunpack.c.l.b16 %v1945_v6  ;;  %v1450_v30 = vpack.c.b16 %v1434_v26, %v3333_v53 }
 0x144   :  { %v1571_v23 = vpop.permute.xlu1 %1570  ;;  %v1642_v63 = vpack.c.b16 %v1434_v26, %v1626_v14  ;;  %v1070_v14 = vunpack.c.l.b16 %v3384_v55 }
 0x145   :  { %v1914_v40 = vsel %vm1910_vm14, %v1881_v16, %v1571_v23  ;;  %v3355_v23 = vld [vmem:[#allocation2 + $0x94] sm:$0x1]  ;;  %v1501_v16 = vshll.u32 %v1446_v60, 16  ;;  %v1527_v53 = vshrl.u32 %v1450_v30, 16 }
 0x146   :  { %1214 = vrot.lane.b32.xlu0 %v1143_v15, %s2374_s20  ;;  %v1071_v51 = vunpack.c.l.b16 %v3355_v23 }
 0x147   :  { %1318 = vrot.lane.b32.xlu2 %v1291_v37, %s2371_s2  ;;  %v1351_v37 = vunpack.c.l.b16 %v599_v59  ;;  %v1503_v6 = vrot.slane %v1501_v16, 1 }
 0x148   :  { %v1667_v3 = vpop.permute.xlu0 %1666  ;;  %v1087_v52 = vpack.c.b16 %v1071_v51, %v2905_v27 }
 0x149   :  { %v1947_v8 = vsel %vm1943_vm15, %v1914_v40, %v1667_v3  ;;  %v1447_v29 = vpack.c.b16 %v1431_v25, %v1351_v37  ;;  %v1367_v0 = vpack.c.b16 %v1351_v37, %v1351_v37  ;;  %v1499_v40 = vshrl.u32 %v1446_v60, 16 }
 0x14a   :  { %1308 = vrot.lane.b32.xlu1 %v1286_v18, %s2371_s2  ;;  %v2002_v9 = vunpack.c.l.b16 %v1947_v8  ;;  %v1655_v18 = vrot.slane %v1639_v20, 1  ;;  %v3372_v22 = vpop.permute.xlu2 %1584  ;;  %v1658_v3 = vrot.slane %v1642_v63, 1  ;;  %v1194_v59 = vshrl.u32 %v1087_v52, 16 }
 0x14b   :  { %v1508_v13 = vshll.u32 %v1447_v29, 16  ;;  %v1506_v7 = vshrl.u32 %v1447_v29, 16  ;;  %v1504_v8 = vor.u32 %v1503_v6, %v1499_v40 }
 0x14c   :  { %v3349_v61 = vpop.permute.xlu1 %1208  ;;  %v2017_v21 = vpack.c.b16 %v2002_v9, %v2001_v50  ;;  %v1622_v50 = vunpack.c.l.b16 %v630_v49  ;;  %v1435_v9 = vunpack.c.l.b16 %v619_v41 }
 0x14d   :  { %v1510_v5 = vrot.slane %v1508_v13, 1  ;;  %v1821_v40 = vsel %vm1811_vm11, %v3206_v10, %v3349_v61  ;;  %v606_v61 = vld [vmem:[#allocation2 + $0x90] sm:$0xf] }
 0x14e   :  { %1220 = vrot.lane.b32.xlu0 %v1164_v54, %s2374_s20  ;;  %2278 = vmatmul.msk.bf16.vlgmr.msra.gmra.mxu0 %vm2052_vm2, %v2017_v21  ;;  %v603_v54 = vld [vmem:[#allocation2 + $0x78] sm:$0xf]  ;;  %v1638_v20 = vpack.c.b16 %v1430_v2, %v1622_v50  ;;  %v1086_v2 = vpack.c.b16 %v1070_v14, %v2951_v45  ;;  %v1823_v45 = vsel %vm1811_vm11, %v3210_v47, %v3263_v28 }
 0x14f   :  { %1396 = vrot.lane.b32.xlu2 %v1370_v11, %s2372_s18  ;;  %v1196_v11 = vshll.u32 %v1087_v52, 16  ;;  %v1511_v27 = vor.u32 %v1510_v5, %v1506_v7 }
 0x150   :  { %v3363_v15 = vpop.permute.xlu0 %1304 }
 0x151   :  { %v1198_v25 = vrot.slane %v1196_v11, 1  ;;  %v1854_v11 = vsel %vm1844_vm12, %v1821_v40, %v3363_v15 }
 0x152   :  { %1222 = vrot.lane.b32.xlu1 %v1171_v32, %s2374_s20  ;;  %v1355_v32 = vunpack.c.l.b16 %v603_v54  ;;  %v3381_v21 = vpop.permute.xlu2 %1682 }
 0x153   :  { %v1199_v36 = vor.u32 %v1198_v25, %v1194_v59  ;;  %v589_v59 = vld [vmem:[#allocation2 + $0x88] sm:$0xe]  ;;  %v590_v25 = vld [vmem:[#allocation2 + $0x90] sm:$0xe] }
 0x154   :  { %v3366_v38 = vpop.permute.xlu1 %1306  ;;  %v1451_v37 = vpack.c.b16 %v1435_v9, %v1355_v32  ;;  %v1371_v58 = vpack.c.b16 %v1355_v32, %v1355_v32 }
 0x156   :  { %1390 = vrot.lane.b32.xlu0 %v1367_v0, %s2372_s18  ;;  %v1654_v0 = vrot.slane %v1638_v20, 1  ;;  %v1536_v16 = vshll.u32 %v1451_v37, 16  ;;  %v1534_v13 = vshrl.u32 %v1451_v37, 16 }
 0x157   :  { %1678 = vrot.lane.b32.xlu2 %v1655_v18, %s2373_s19  ;;  %v1529_v18 = vshll.u32 %v1450_v30, 16 }
 0x158   :  { %v3376_v1 = vpop.permute.xlu0 %1218  ;;  %v1538_v63 = vrot.slane %v1536_v16, 1  ;;  %v607_v16 = vld [vmem:[#allocation2 + $0x98] sm:$0xf] }
 0x159   :  { %v1531_v26 = vrot.slane %v1529_v18, 1 }
 0x15a   :  { %1316 = vrot.lane.b32.xlu1 %v1290_v57, %s2371_s2  ;;  %v635_v57 = vld [vmem:[#allocation2 + $0x78] sm:$0xe]  ;;  %v3394_v6 = vpop.permute.xlu2 %1300  ;;  %v1539_v41 = vor.u32 %v1538_v63, %v1534_v13 }
 0x15b   :  { %v1627_v5 = vunpack.c.l.b16 %v635_v57  ;;  %v1532_v49 = vor.u32 %v1531_v26, %v1527_v53  ;;  %v623_v26 = vld [vmem:[#allocation2 + $0x9c] sm:$0x1]  ;;  %v1829_v57 = vsel %vm1811_vm11, %v3235_v43, %v3286_v42 }
 0x15c   :  { %v1385_v19 = vpop.permute.xlu1 %1384 }
 0x15d   :  { %v1887_v54 = vsel %vm1877_vm13, %v1854_v11, %v1385_v19  ;;  %v1643_v10 = vpack.c.b16 %v1435_v9, %v1627_v5  ;;  %v1358_v19 = vunpack.c.l.b16 %v606_v61 }
 0x15e   :  { %1580 = vrot.lane.b32.xlu0 %v1504_v8, %s2375_s21  ;;  %v1856_v8 = vsel %vm1844_vm12, %v1823_v45, %v3366_v38  ;;  %v1920_v28 = vsel %vm1910_vm14, %v1887_v54, %v3327_v34  ;;  %v3410_v38 = vld [vmem:[#allocation2 + $0x94] sm:$0x1] }
 0x15f   :  { %1684 = vrot.lane.b32.xlu2 %v1658_v3, %s2373_s19  ;;  %v1189_v3 = vshll.u32 %v1086_v2, 16  ;;  %v1889_v47 = vsel %vm1877_vm13, %v1856_v8, %v3300_v31  ;;  %v1659_v30 = vrot.slane %v1643_v10, 1  ;;  %v1438_v53 = vunpack.c.l.b16 %v3410_v38 }
 0x160   :  { %v1313_v60 = vpop.permute.xlu0 %1312 }
 0x161   :  { %v1191_v50 = vrot.slane %v1189_v3, 1  ;;  %v1862_v13 = vsel %vm1844_vm12, %v1829_v57, %v1313_v60  ;;  %v1439_v3 = vunpack.c.l.b16 %v623_v26  ;;  %v1454_v43 = vpack.c.b16 %v1438_v53, %v1358_v19 }
 0x162   :  { %1582 = vrot.lane.b32.xlu1 %v1511_v27, %s2375_s21  ;;  %v1187_v27 = vshrl.u32 %v1086_v2, 16  ;;  %v3415_v31 = vpop.permute.xlu2 %1226  ;;  %v1831_v2 = vsel %vm1811_vm11, %v3121_v48, %v3376_v1 }
 0x163   :  { %v1557_v10 = vshll.u32 %v1454_v43, 16 }
 0x164   :  { %v1315_v29 = vpop.permute.xlu1 %1314  ;;  %v1192_v55 = vor.u32 %v1191_v50, %v1187_v27 }
 0x165   :  { %v1864_v63 = vsel %vm1844_vm12, %v1831_v2, %v1315_v29 }
 0x166   :  { %1398 = vrot.lane.b32.xlu0 %v1371_v58, %s2372_s18  ;;  %v1374_v58 = vpack.c.b16 %v1358_v19, %v1358_v19  ;;  %v1897_v42 = vsel %vm1877_vm13, %v1864_v63, %v3352_v24 }
 0x167   :  { %1230 = vrot.lane.b32.xlu2 %v1199_v36, %s2374_s20  ;;  %v1262_v36 = vunpack.c.l.b16 %v589_v59 }
 0x168   :  { %v1579_v52 = vpop.permute.xlu0 %1578 }
 0x169   :  { %v1922_v9 = vsel %vm1910_vm14, %v1889_v47, %v1579_v52  ;;  %v1278_v5 = vpack.c.b16 %v1070_v14, %v1262_v36  ;;  %v638_v47 = vld [vmem:[#allocation2 + $0x90] sm:$0xe] }
 0x16a   :  { %1676 = vrot.lane.b32.xlu1 %v1654_v0, %s2373_s19  ;;  %v1263_v0 = vunpack.c.l.b16 %v590_v25  ;;  %v1321_v27 = vpop.permute.xlu2 %1320  ;;  %v1630_v19 = vunpack.c.l.b16 %v638_v47 }
 0x16b   :  { %v1294_v45 = vrot.slane %v1278_v5, 1 }
 0x16c   :  { %v1393_v7 = vpop.permute.xlu1 %1392  ;;  %v1279_v48 = vpack.c.b16 %v1071_v51, %v1263_v0 }
 0x16d   :  { %v1895_v40 = vsel %vm1877_vm13, %v1862_v13, %v1393_v7 }
 0x16e   :  { %1588 = vrot.lane.b32.xlu0 %v1532_v49, %s2375_s21  ;;  %v1359_v49 = vunpack.c.l.b16 %v607_v16  ;;  %v1928_v14 = vsel %vm1910_vm14, %v1895_v40, %v3372_v22  ;;  %v1295_v54 = vrot.slane %v1279_v48, 1  ;;  %v1555_v22 = vshrl.u32 %v1454_v43, 16 }
 0x16f   :  { %1404 = vrot.lane.b32.xlu2 %v1374_v58, %s2372_s18 }
 0x170   :  { %v1673_v15 = vpop.permute.xlu0 %1672  ;;  %v1455_v60 = vpack.c.b16 %v1439_v3, %v1359_v49  ;;  %v1375_v38 = vpack.c.b16 %v1359_v49, %v1359_v49 }
 0x171   :  { %v1953_v32 = vsel %vm1943_vm15, %v1920_v28, %v1673_v15  ;;  %v639_v15 = vld [vmem:[#allocation2 + $0x98] sm:$0xe] }
 0x172   :  { %1590 = vrot.lane.b32.xlu1 %v1539_v41, %s2375_s21  ;;  %v2005_v18 = vunpack.c.l.b16 %v1953_v32  ;;  %v1564_v23 = vshll.u32 %v1455_v60, 16  ;;  %v1562_v24 = vshrl.u32 %v1455_v60, 16  ;;  %v1631_v32 = vunpack.c.l.b16 %v639_v15 }
 0x174   :  { %v1675_v20 = vpop.permute.xlu1 %1674  ;;  %v1566_v61 = vrot.slane %v1564_v23, 1 }
 0x175   :  { %v1955_v37 = vsel %vm1943_vm15, %v1922_v9, %v1675_v20  ;;  %v1575_v20 = vpop.permute.xlu2 %1574 }
 0x176   :  { %v2006_v34 = vunpack.c.l.b16 %v1955_v37  ;;  %1686 = vrot.lane.b32.xlu0 %v1659_v30, %s2373_s19  ;;  %v1567_v59 = vor.u32 %v1566_v61, %v1562_v24  ;;  %v1646_v30 = vpack.c.b16 %v1438_v53, %v1630_v19  ;;  %v1647_v37 = vpack.c.b16 %v1439_v3, %v1631_v32 }
 0x178   :  { %v2019_v52 = vpack.c.b16 %v2006_v34, %v2005_v18  ;;  %v1587_v1 = vpop.permute.xlu0 %1586  ;;  %1598 = vrot.lane.b32.xlu2 %v1567_v59, %s2375_s21  ;;  %v1662_v58 = vrot.slane %v1646_v30, 1  ;;  %v1663_v18 = vrot.slane %v1647_v37, 1 }
 0x179   :  { %v1930_v29 = vsel %vm1910_vm14, %v1897_v42, %v1587_v1 }
 0x17a   :  { %1228 = vrot.lane.b32.xlu1 %v1192_v55, %s2374_s20  ;;  %2280 = vmatmul.msk.bf16.vlgmr.msra.gmra.mxu1 %vm2052_vm2, %v2019_v52  ;;  %v1963_v41 = vsel %vm1943_vm15, %v1930_v29, %v3381_v21  ;;  %v1559_v21 = vrot.slane %v1557_v10, 1 }
 0x17b   :  { %v2010_v51 = vunpack.c.l.b16 %v1963_v41 }
 0x17c   :  { %v1681_v7 = vpop.permute.xlu1 %1680  ;;  %v1560_v9 = vor.u32 %v1559_v21, %v1555_v22 }
 0x17d   :  { %v1961_v11 = vsel %vm1943_vm15, %v1928_v14, %v1681_v7  ;;  %v1669_v0 = vpop.permute.xlu2 %1668  ;;  %v1839_v14 = vsel %vm1811_vm11, %v3274_v44, %v3415_v31 }
 0x17e   :  { %v2009_v8 = vunpack.c.l.b16 %v1961_v11  ;;  %1324 = vrot.lane.b32.xlu0 %v1294_v45, %s2371_s2 }
 0x180   :  { %v2021_v50 = vpack.c.b16 %v2010_v51, %v2009_v8  ;;  %v1205_v28 = vpop.permute.xlu0 %1204 }
 0x181   :  { %v1817_v53 = vsel %vm1811_vm11, %v3188_v17, %v1205_v28 }
 0x182   :  { %1326 = vrot.lane.b32.xlu1 %v1295_v54, %s2371_s2  ;;  %2282 = vmatmul.msk.bf16.vlgmr.msra.gmra.mxu2 %vm2052_vm2, %v2021_v50  ;;  %v1850_v40 = vsel %vm1844_vm12, %v1817_v53, %v3394_v6 }
 0x184   :  { %v1207_v25 = vpop.permute.xlu1 %1206 }
 0x185   :  { %v1595_v2 = vpop.permute.xlu2 %1594  ;;  %v1819_v63 = vsel %vm1811_vm11, %v3081_v12, %v1207_v25 }
 0x186   :  { %1406 = vrot.lane.b32.xlu0 %v1375_v38, %s2372_s18 }
 0x188   :  { %v1303_v55 = vpop.permute.xlu0 %1302 }
 0x189   :  { %v1852_v49 = vsel %vm1844_vm12, %v1819_v63, %v1303_v55 }
 0x18a   :  { %1596 = vrot.lane.b32.xlu1 %v1560_v9, %s2375_s21 }
 0x18c   :  { %v1225_v36 = vpop.permute.xlu1 %1224 }
 0x18d   :  { %v1213_v43 = vpop.permute.xlu2 %1212  ;;  %v1837_v12 = vsel %vm1811_vm11, %v3146_v33, %v1225_v36 }
 0x18e   :  { %1692 = vrot.lane.b32.xlu0 %v1662_v58, %s2373_s19  ;;  %v1870_v41 = vsel %vm1844_vm12, %v1837_v12, %v1321_v27  ;;  %v1825_v58 = vsel %vm1811_vm11, %v3102_v46, %v1213_v43 }
 0x190   :  { %v1381_v34 = vpop.permute.xlu0 %1380 }
 0x191   :  { %v1883_v5 = vsel %vm1877_vm13, %v1850_v40, %v1381_v34 }
 0x192   :  { %1694 = vrot.lane.b32.xlu1 %v1663_v18, %s2373_s19 }
 0x194   :  { %v1383_v16 = vpop.permute.xlu1 %1382 }
 0x195   :  { %v1885_v48 = vsel %vm1877_vm13, %v1852_v49, %v1383_v16  ;;  %v1311_v8 = vpop.permute.xlu2 %1310 }
 0x196   :  { %v1918_v17 = vsel %vm1910_vm14, %v1885_v48, %v1575_v20 }
 0x198   :  { %v1323_v26 = vpop.permute.xlu0 %1322 }
 0x199   :  { %v1872_v11 = vsel %vm1844_vm12, %v1839_v14, %v1323_v26 }
 0x19c   :  { %v1573_v57 = vpop.permute.xlu1 %1572 }
 0x19d   :  { %v1916_v3 = vsel %vm1910_vm14, %v1883_v5, %v1573_v57  ;;  %v1389_v22 = vpop.permute.xlu2 %1388 }
 0x19e   :  { %v1949_v42 = vsel %vm1943_vm15, %v1916_v3, %v1669_v0 }
 0x19f   :  { %v2003_v29 = vunpack.c.l.b16 %v1949_v42 }
 0x1a0   :  { %v1401_v13 = vpop.permute.xlu0 %1400 }
 0x1a1   :  { %v1903_v23 = vsel %vm1877_vm13, %v1870_v41, %v1401_v13 }
 0x1a4   :  { %v1403_v52 = vpop.permute.xlu1 %1402 }
 0x1a5   :  { %v1905_v51 = vsel %vm1877_vm13, %v1872_v11, %v1403_v52  ;;  %v1319_v15 = vpop.permute.xlu2 %1318 }
 0x1a6   :  { %v1938_v44 = vsel %vm1910_vm14, %v1905_v51, %v1595_v2 }
 0x1a8   :  { %v1671_v1 = vpop.permute.xlu0 %1670 }
 0x1a9   :  { %v1951_v60 = vsel %vm1943_vm15, %v1918_v17, %v1671_v1 }
 0x1aa   :  { %v2004_v7 = vunpack.c.l.b16 %v1951_v60 }
 0x1ac   :  { %v1593_v6 = vpop.permute.xlu1 %1592  ;;  %v2018_v45 = vpack.c.b16 %v2004_v7, %v2003_v29 }
 0x1ad   :  { %v1936_v33 = vsel %vm1910_vm14, %v1903_v23, %v1593_v6  ;;  %v1397_v32 = vpop.permute.xlu2 %1396 }
 0x1ae   :  { %2279 = vmatmul.msk.bf16.gmra.mxu0 %vm2052_vm2, %v2018_v45 }
 0x1b0   :  { %v1689_v54 = vpop.permute.xlu0 %1688 }
 0x1b1   :  { %v1969_v10 = vsel %vm1943_vm15, %v1936_v33, %v1689_v54 }
 0x1b2   :  { %v2013_v61 = vunpack.c.l.b16 %v1969_v10 }
 0x1b4   :  { %v1691_v24 = vpop.permute.xlu1 %1690 }
 0x1b5   :  { %v1971_v31 = vsel %vm1943_vm15, %v1938_v44, %v1691_v24 }
 0x1b6   :  { %v2014_v27 = vunpack.c.l.b16 %v1971_v31 }
 0x1b8   :  { %v2023_v50 = vpack.c.b16 %v2014_v27, %v2013_v61  ;;  %v1215_v59 = vpop.permute.xlu0 %1214 }
 0x1b9   :  { %v1827_v30 = vsel %vm1811_vm11, %v3229_v35, %v1215_v59  ;;  %v1679_v35 = vpop.permute.xlu2 %1678 }
 0x1ba   :  { %2284 = vmatmul.msk.bf16.vlgmr.msra.gmra.mxu3 %vm2052_vm2, %v2023_v50  ;;  %v1860_v55 = vsel %vm1844_vm12, %v1827_v30, %v1311_v8 }
 0x1bc   :  { %v1309_v21 = vpop.permute.xlu1 %1308 }
 0x1bd   :  { %v1858_v0 = vsel %vm1844_vm12, %v1825_v58, %v1309_v21 }
 0x1be   :  { %v1891_v26 = vsel %vm1877_vm13, %v1858_v0, %v1389_v22 }
 0x1c0   :  { %v1221_v47 = vpop.permute.xlu0 %1220 }
 0x1c1   :  { %v1833_v5 = vsel %vm1811_vm11, %v3254_v4, %v1221_v47  ;;  %v1685_v42 = vpop.permute.xlu2 %1684 }
 0x1c4   :  { %v1223_v28 = vpop.permute.xlu1 %1222 }
 0x1c5   :  { %v1835_v48 = vsel %vm1811_vm11, %v3258_v62, %v1223_v28 }
 0x1c6   :  { %v1868_v1 = vsel %vm1844_vm12, %v1835_v48, %v1319_v15 }
 0x1c8   :  { %v1391_v25 = vpop.permute.xlu0 %1390 }
 0x1c9   :  { %v1893_v18 = vsel %vm1877_vm13, %v1860_v55, %v1391_v25  ;;  %v1231_v45 = vpop.permute.xlu2 %1230 }
 0x1ca   :  { %v1843_v31 = vsel %vm1811_vm11, %v3173_v39, %v1231_v45 }
 0x1cb   :  { %v3477_v19 = vpop.f32.mrf.mxu0 }
 0x1cc   :  { %v1317_v38 = vpop.permute.xlu1 %1316  ;;  %v2130_v9 = vpack.c.bf16 %v3477_v19, %v3477_v19 }
 0x1cd   :  { %v1866_v49 = vsel %vm1844_vm12, %v1833_v5, %v1317_v38 }
 0x1ce   :  { %2146 = vst.msk [vmem:[%s3652_s4] sm:$0xf] %vm124_vm0, %v2130_v9  ;;  %v1899_v17 = vsel %vm1877_vm13, %v1866_v49, %v1397_v32 }
 0x1d0   :  { %v1581_v20 = vpop.permute.xlu0 %1580 }
 0x1d1   :  { %v1924_v2 = vsel %vm1910_vm14, %v1891_v26, %v1581_v20  ;;  %v1405_v33 = vpop.permute.xlu2 %1404 }
 0x1d3   :  { %v3488_v36 = vpop.f32.mrf.mxu0 }
 0x1d4   :  { %v1583_v37 = vpop.permute.xlu1 %1582  ;;  %v2131_v34 = vpack.c.bf16 %v3488_v36, %v3488_v36  ;;  %v2163_v0 = vsel %vm1696_vm7, %v3488_v36, 0.0 }
 0x1d5   :  { %v1926_v16 = vsel %vm1910_vm14, %v1893_v18, %v1583_v37  ;;  %v2201_v18 = vmul.f32 %v3488_v36, %v3488_v36 }
 0x1d6   :  { %2147 = vst.msk [vmem:[%s3652_s4 + $0x4] sm:$0xf] %vm124_vm0, %v2131_v34  ;;  %v1959_v57 = vsel %vm1943_vm15, %v1926_v16, %v1679_v35  ;;  %v2200_v34 = vmul.f32 %v3477_v19, %v3477_v19  ;;  %v2162_v16 = vsel %vm1696_vm7, %v3477_v19, 0.0 }
 0x1d7   :  { %v2008_v63 = vunpack.c.l.b16 %v1959_v57  ;;  %v2217_v35 = vsel %vm1696_vm7, %v2201_v18, 0.0  ;;  %v2164_v26 = vadd.f32 %v2163_v0, %v2162_v16 }
 0x1d8   :  { %v1399_v46 = vpop.permute.xlu0 %1398 }
 0x1d9   :  { %v1901_v60 = vsel %vm1877_vm13, %v1868_v1, %v1399_v46  ;;  %v1599_v21 = vpop.permute.xlu2 %1598  ;;  %v2216_v46 = vsel %vm1696_vm7, %v2200_v34, 0.0 }
 0x1dc   :  { %v1677_v53 = vpop.permute.xlu1 %1676 }
 0x1dd   :  { %v1957_v13 = vsel %vm1943_vm15, %v1924_v2, %v1677_v53 }
 0x1de   :  { %v2007_v52 = vunpack.c.l.b16 %v1957_v13 }
 0x1e0   :  { %v2020_v40 = vpack.c.b16 %v2008_v63, %v2007_v52  ;;  %v1589_v3 = vpop.permute.xlu0 %1588  ;;  %v2218_v63 = vadd.f32 %v2217_v35, %v2216_v46 }
 0x1e1   :  { %v1932_v12 = vsel %vm1910_vm14, %v1899_v17, %v1589_v3 }
 0x1e2   :  { %2281 = vmatmul.msk.bf16.gmra.mxu1 %vm2052_vm2, %v2020_v40  ;;  %v1965_v6 = vsel %vm1943_vm15, %v1932_v12, %v1685_v42 }
 0x1e3   :  { %v2011_v41 = vunpack.c.l.b16 %v1965_v6 }
 0x1e4   :  { %v1591_v43 = vpop.permute.xlu1 %1590 }
 0x1e5   :  { %v1934_v4 = vsel %vm1910_vm14, %v1901_v60, %v1591_v43 }
 0x1e8   :  { %v1687_v29 = vpop.permute.xlu0 %1686 }
 0x1e9   :  { %v1967_v7 = vsel %vm1943_vm15, %v1934_v4, %v1687_v29 }
 0x1ea   :  { %v2012_v62 = vunpack.c.l.b16 %v1967_v7 }
 0x1ec   :  { %v1229_v14 = vpop.permute.xlu1 %1228  ;;  %v2022_v11 = vpack.c.b16 %v2012_v62, %v2011_v41 }
 0x1ed   :  { %v1841_v10 = vsel %vm1811_vm11, %v3278_v56, %v1229_v14 }
 0x1ee   :  { %2283 = vmatmul.msk.bf16.gmra.mxu2 %vm2052_vm2, %v2022_v11 }
 0x1f0   :  { %v1325_v23 = vpop.permute.xlu0 %1324 }
 0x1f1   :  { %v1874_v61 = vsel %vm1844_vm12, %v1841_v10, %v1325_v23 }
 0x1f2   :  { %v1907_v59 = vsel %vm1877_vm13, %v1874_v61, %v1405_v33 }
 0x1f4   :  { %v1327_v51 = vpop.permute.xlu1 %1326 }
 0x1f5   :  { %v1876_v27 = vsel %vm1844_vm12, %v1843_v31, %v1327_v51 }
 0x1f7   :  { %v2100_v8 = vpop.f32.mrf.mxu1 }
 0x1f8   :  { %v2134_v54 = vpack.c.bf16 %v2100_v8, %v2100_v8  ;;  %v1407_v24 = vpop.permute.xlu0 %1406  ;;  %v2204_v5 = vmul.f32 %v2100_v8, %v2100_v8  ;;  %v2169_v42 = vsel %vm1696_vm7, %v2100_v8, 0.0 }
 0x1f9   :  { %v1909_v56 = vsel %vm1877_vm13, %v1876_v27, %v1407_v24 }
 0x1fa   :  { %2150 = vst.msk [vmem:[%s3652_s4 + $0x10] sm:$0xf] %vm124_vm0, %v2134_v54  ;;  %v1942_v39 = vsel %vm1910_vm14, %v1909_v56, %v1599_v21  ;;  %v2223_v60 = vsel %vm1696_vm7, %v2204_v5, 0.0 }
 0x1fc   :  { %v1597_v44 = vpop.permute.xlu1 %1596 }
 0x1fd   :  { %v1940_v47 = vsel %vm1910_vm14, %v1907_v59, %v1597_v44 }
 0x1ff   :  { %v2102_v50 = vpop.f32.mrf.mxu1 }
 0x200   :  { %v2135_v22 = vpack.c.bf16 %v2102_v50, %v2102_v50  ;;  %v1693_v28 = vpop.permute.xlu0 %1692  ;;  %v2205_v45 = vmul.f32 %v2102_v50, %v2102_v50  ;;  %v2171_v23 = vsel %vm1696_vm7, %v2102_v50, 0.0 }
 0x201   :  { %v1973_v15 = vsel %vm1943_vm15, %v1940_v47, %v1693_v28 }
 0x202   :  { %2151 = vst.msk [vmem:[%s3652_s4 + $0x14] sm:$0xf] %vm124_vm0, %v2135_v22  ;;  %v2015_v32 = vunpack.c.l.b16 %v1973_v15  ;;  %v2225_v8 = vsel %vm1696_vm7, %v2205_v45, 0.0 }
 0x204   :  { %v1695_v25 = vpop.permute.xlu1 %1694 }
 0x205   :  { %v1975_v38 = vsel %vm1943_vm15, %v1942_v39, %v1695_v25  ;;  %v3539_v9 = vpop.f32.mrf.mxu2 }
 0x206   :  { %v2016_v30 = vunpack.c.l.b16 %v1975_v38  ;;  %v2138_v20 = vpack.c.bf16 %v3539_v9, %v3539_v9  ;;  %v2208_v31 = vmul.f32 %v3539_v9, %v3539_v9  ;;  %v2177_v50 = vsel %vm1696_vm7, %v3539_v9, 0.0 }
 0x208   :  { %2154 = vst.msk [vmem:[%s3652_s4 + $0x20] sm:$0xf] %vm124_vm0, %v2138_v20  ;;  %v2024_v37 = vpack.c.b16 %v2016_v30, %v2015_v32  ;;  %v2231_v39 = vsel %vm1696_vm7, %v2208_v31, 0.0 }
 0x20a   :  { %2285 = vmatmul.msk.bf16.gmra.mxu3 %vm2052_vm2, %v2024_v37 }
 0x20d   :  { %v3548_v55 = vpop.f32.mrf.mxu2 }
 0x20e   :  { %v2139_v58 = vpack.c.bf16 %v3548_v55, %v3548_v55  ;;  %v2209_v38 = vmul.f32 %v3548_v55, %v3548_v55  ;;  %v2179_v9 = vsel %vm1696_vm7, %v3548_v55, 0.0 }
 0x210   :  { %2155 = vst.msk [vmem:[%s3652_s4 + $0x24] sm:$0xf] %vm124_vm0, %v2139_v58  ;;  %v2233_v37 = vsel %vm1696_vm7, %v2209_v38, 0.0 }
 0x22b   :  { %v2095_v57 = vpop.f32.mrf.mxu0 }
 0x22c   :  { %v2132_v2 = vpack.c.bf16 %v2095_v57, %v2095_v57  ;;  %v2165_v53 = vsel %vm1696_vm7, %v2095_v57, 0.0  ;;  %v2202_v13 = vmul.f32 %v2095_v57, %v2095_v57 }
 0x22d   :  { %v2166_v52 = vadd.f32 %v2165_v53, %v2164_v26 }
 0x22e   :  { %2148 = vst.msk [vmem:[%s3652_s4 + $0x8] sm:$0xf] %vm124_vm0, %v2132_v2  ;;  %v2219_v36 = vsel %vm1696_vm7, %v2202_v13, 0.0 }
 0x22f   :  { %v2220_v19 = vadd.f32 %v2219_v36, %v2218_v63 }
 0x233   :  { %v2097_v40 = vpop.f32.mrf.mxu0 }
 0x234   :  { %v2133_v49 = vpack.c.bf16 %v2097_v40, %v2097_v40  ;;  %v2167_v3 = vsel %vm1696_vm7, %v2097_v40, 0.0  ;;  %v2203_v48 = vmul.f32 %v2097_v40, %v2097_v40 }
 0x235   :  { %v2168_v43 = vadd.f32 %v2167_v3, %v2166_v52 }
 0x236   :  { %2149 = vst.msk [vmem:[%s3652_s4 + $0xc] sm:$0xf] %vm124_vm0, %v2133_v49  ;;  %v2221_v17 = vsel %vm1696_vm7, %v2203_v48, 0.0 }
 0x237   :  { %v2170_v1 = vadd.f32 %v2169_v42, %v2168_v43  ;;  %v2222_v12 = vadd.f32 %v2221_v17, %v2220_v19 }
 0x239   :  { %v2224_v4 = vadd.f32 %v2223_v60, %v2222_v12  ;;  %v2172_v33 = vadd.f32 %v2171_v23, %v2170_v1 }
 0x23b   :  { %v2226_v24 = vadd.f32 %v2225_v8, %v2224_v4 }
 0x23d   :  { %v2120_v6 = vpop.f32.mrf.mxu3 }
 0x23e   :  { %v2142_v29 = vpack.c.bf16 %v2120_v6, %v2120_v6  ;;  %v2212_v35 = vmul.f32 %v2120_v6, %v2120_v6  ;;  %v2185_v53 = vsel %vm1696_vm7, %v2120_v6, 0.0 }
 0x240   :  { %2158 = vst.msk [vmem:[%s3652_s4 + $0x30] sm:$0xf] %vm124_vm0, %v2142_v29  ;;  %v2239_v36 = vsel %vm1696_vm7, %v2212_v35, 0.0 }
 0x245   :  { %v2122_v7 = vpop.f32.mrf.mxu3 }
 0x246   :  { %v2143_v14 = vpack.c.bf16 %v2122_v7, %v2122_v7  ;;  %v2213_v49 = vmul.f32 %v2122_v7, %v2122_v7  ;;  %v2187_v48 = vsel %vm1696_vm7, %v2122_v7, 0.0 }
 0x248   :  { %2159 = vst.msk [vmem:[%s3652_s4 + $0x34] sm:$0xf] %vm124_vm0, %v2143_v14  ;;  %v2241_v17 = vsel %vm1696_vm7, %v2213_v49, 0.0 }
 0x25f   :  { %v2105_v41 = vpop.f32.mrf.mxu1 }
 0x260   :  { %v2136_v62 = vpack.c.bf16 %v2105_v41, %v2105_v41  ;;  %v2206_v11 = vmul.f32 %v2105_v41, %v2105_v41  ;;  %v2173_v51 = vsel %vm1696_vm7, %v2105_v41, 0.0 }
 0x261   :  { %v2174_v10 = vadd.f32 %v2173_v51, %v2172_v33 }
 0x262   :  { %2152 = vst.msk [vmem:[%s3652_s4 + $0x18] sm:$0xf] %vm124_vm0, %v2136_v62  ;;  %v2227_v54 = vsel %vm1696_vm7, %v2206_v11, 0.0 }
 0x263   :  { %v2228_v22 = vadd.f32 %v2227_v54, %v2226_v24 }
 0x267   :  { %v2107_v44 = vpop.f32.mrf.mxu1 }
 0x268   :  { %v2137_v61 = vpack.c.bf16 %v2107_v44, %v2107_v44  ;;  %v2175_v27 = vsel %vm1696_vm7, %v2107_v44, 0.0  ;;  %v2207_v59 = vmul.f32 %v2107_v44, %v2107_v44 }
 0x269   :  { %v2176_v56 = vadd.f32 %v2175_v27, %v2174_v10 }
 0x26a   :  { %2153 = vst.msk [vmem:[%s3652_s4 + $0x1c] sm:$0xf] %vm124_vm0, %v2137_v61  ;;  %v2229_v21 = vsel %vm1696_vm7, %v2207_v59, 0.0 }
 0x26b   :  { %v2178_v47 = vadd.f32 %v2177_v50, %v2176_v56  ;;  %v2230_v28 = vadd.f32 %v2229_v21, %v2228_v22 }
 0x26d   :  { %v2232_v15 = vadd.f32 %v2231_v39, %v2230_v28  ;;  %v2180_v20 = vadd.f32 %v2179_v9, %v2178_v47 }
 0x26f   :  { %v2234_v18 = vadd.f32 %v2233_v37, %v2232_v15 }
 0x271   :  { %v2115_v25 = vpop.f32.mrf.mxu2 }
 0x272   :  { %v2140_v32 = vpack.c.bf16 %v2115_v25, %v2115_v25  ;;  %v2210_v30 = vmul.f32 %v2115_v25, %v2115_v25  ;;  %v2181_v58 = vsel %vm1696_vm7, %v2115_v25, 0.0 }
 0x273   :  { %v2182_v0 = vadd.f32 %v2181_v58, %v2180_v20 }
 0x274   :  { %2156 = vst.msk [vmem:[%s3652_s4 + $0x28] sm:$0xf] %vm124_vm0, %v2140_v32  ;;  %v2235_v34 = vsel %vm1696_vm7, %v2210_v30, 0.0 }
 0x275   :  { %v2236_v46 = vadd.f32 %v2235_v34, %v2234_v18 }
 0x279   :  { %v2117_v16 = vpop.f32.mrf.mxu2 }
 0x27a   :  { %v2141_v26 = vpack.c.bf16 %v2117_v16, %v2117_v16  ;;  %v2183_v55 = vsel %vm1696_vm7, %v2117_v16, 0.0  ;;  %v2211_v57 = vmul.f32 %v2117_v16, %v2117_v16 }
 0x27b   :  { %v2184_v2 = vadd.f32 %v2183_v55, %v2182_v0 }
 0x27c   :  { %2157 = vst.msk [vmem:[%s3652_s4 + $0x2c] sm:$0xf] %vm124_vm0, %v2141_v26  ;;  %v2237_v13 = vsel %vm1696_vm7, %v2211_v57, 0.0 }
 0x27d   :  { %v2186_v63 = vadd.f32 %v2185_v53, %v2184_v2  ;;  %v2238_v52 = vadd.f32 %v2237_v13, %v2236_v46 }
 0x27f   :  { %v2240_v19 = vadd.f32 %v2239_v36, %v2238_v52  ;;  %v2188_v42 = vadd.f32 %v2187_v48, %v2186_v63 }
 0x281   :  { %v2242_v60 = vadd.f32 %v2241_v17, %v2240_v19 }
 0x28d   :  { %v2125_v40 = vpop.f32.mrf.mxu3 }
 0x28e   :  { %v2144_v5 = vpack.c.bf16 %v2125_v40, %v2125_v40  ;;  %v2214_v3 = vmul.f32 %v2125_v40, %v2125_v40  ;;  %v2189_v43 = vsel %vm1696_vm7, %v2125_v40, 0.0 }
 0x28f   :  { %v2190_v12 = vadd.f32 %v2189_v43, %v2188_v42 }
 0x290   :  { %2160 = vst.msk [vmem:[%s3652_s4 + $0x38] sm:$0xf] %vm124_vm0, %v2144_v5  ;;  %v2243_v1 = vsel %vm1696_vm7, %v2214_v3, 0.0 }
 0x291   :  { %v2244_v41 = vadd.f32 %v2243_v1, %v2242_v60 }
 0x295   :  { %v2127_v4 = vpop.f32.mrf.mxu3 }
 0x296   :  { %v2145_v6 = vpack.c.bf16 %v2127_v4, %v2127_v4  ;;  %v2191_v29 = vsel %vm1696_vm7, %v2127_v4, 0.0  ;;  %v2215_v14 = vmul.f32 %v2127_v4, %v2127_v4 }
 0x297   :  { %v2192_v62 = vadd.f32 %v2191_v29, %v2190_v12 }
 0x298   :  { %2161 = vst.msk [vmem:[%s3652_s4 + $0x3c] sm:$0xf] %vm124_vm0, %v2145_v6  ;;  %v2245_v7 = vsel %vm1696_vm7, %v2215_v14, 0.0 }
 0x299   :  { %v2193_v45 = vrot.slane %v2192_v62, 4  ;;  %v2246_v11 = vadd.f32 %v2245_v7, %v2244_v41 }
 0x29b   :  { %v2194_v23 = vadd.f32 %v2193_v45, %v2192_v62  ;;  %v2247_v51 = vrot.slane %v2246_v11, 4 }
 0x29d   :  { %v2195_v33 = vrot.slane %v2194_v23, 2  ;;  %v2248_v8 = vadd.f32 %v2247_v51, %v2246_v11 }
 0x29f   :  { %v2196_v54 = vadd.f32 %v2195_v33, %v2194_v23  ;;  %v2249_v10 = vrot.slane %v2248_v8, 2 }
 0x2a1   :  { %v2197_v24 = vrot.slane %v2196_v54, 1  ;;  %v2250_v44 = vadd.f32 %v2249_v10, %v2248_v8 }
 0x2a3   :  { %v2198_v31 = vadd.f32 %v2197_v24, %v2196_v54  ;;  %v2251_v61 = vrot.slane %v2250_v44, 1 }
 0x2a5   :  { %2199 = vst.msk [vmem:[%s3653_s5] sm:$0x1] %vm126_vm1, %v2198_v31  ;;  %v2252_v27 = vadd.f32 %v2251_v61, %v2250_v44 }
 0x2a7   :  { %2253 = vst.msk [vmem:[%s3653_s5 + $0x1] sm:$0x1] %vm126_vm1, %v2252_v27 }

</bundles_post_ra>
